<compile_context>
chip_gen: v5e
topology: v5e:2x2
jax: 0.10.0
libtpu: 0.0.40
codegen_flags: <defaults>
</compile_context>

<pallas_src>
import functools

import jax
import jax.numpy as jnp
import numpy as np
from jax.experimental import pallas as pl
from jax.experimental.pallas import tpu as pltpu

EPS = 1e-5                      # nn.BatchNorm2d default eps
LANE = 128                      # pad Cout up to a multiple of 128 -> unmasked lane-dense stores
MAX_TM = 2048                   # max rows per M-tile (kept a multiple of 16)
VMEM_BUDGET = 8 * 1024 * 1024   # conservative double-buffered working set (fits v5e 16 MiB default)


# ---------------------------------------------------------------------------
# Pallas kernels
# ---------------------------------------------------------------------------
def _gemm_stats_kernel(x_ref, w_ref, y_ref, s_ref, ss_ref):
    # x:(1,tm,K) bf16  w:(1,K,Cp) bf16  y:(1,tm,Cp) bf16  s/ss:(1,1,1,Cp) f32
    # Conv bias is NOT added: it cancels exactly under BN mean subtraction.
    y = jnp.dot(x_ref[0], w_ref[0], preferred_element_type=jnp.float32)   # MXU, f32 accumulation
    y_ref[0] = y.astype(y_ref.dtype)
    s_ref[0, 0] = jnp.sum(y, axis=0, keepdims=True)          # (1, Cp)
    ss_ref[0, 0] = jnp.sum(y * y, axis=0, keepdims=True)      # (1, Cp)


def _gemm_bias_act_kernel(x_ref, w_ref, b_ref, o_ref, *, act):
    # Fused GEMM + conv bias + activation for the non-BN (final) layer: no stats, single pass.
    y = jnp.dot(x_ref[0], w_ref[0], preferred_element_type=jnp.float32) + b_ref[0]
    y = jnp.maximum(y, 0.0) if act == "relu" else jnp.tanh(y)
    o_ref[0] = y.astype(o_ref.dtype)


def _scale_act_kernel(y_ref, scale_ref, shift_ref, o_ref, *, act):
    # Fused per-channel affine (BN normalize*gamma+beta) + activation.
    y = y_ref[0].astype(jnp.float32) * scale_ref[0] + shift_ref[0]
    y = jnp.maximum(y, 0.0) if act == "relu" else jnp.tanh(y)
    o_ref[0] = y.astype(o_ref.dtype)


# ---------------------------------------------------------------------------
# pallas_call wrappers
# ---------------------------------------------------------------------------
def phase_gemm_stats(x_all, w_all, tm):
    # x_all:(4, M_pad, K) bf16, w_all:(4, K, Cp) bf16 -> y:(4, M_pad, Cp) bf16 + partial stats.
    P, M_pad, K = x_all.shape
    Cp = w_all.shape[-1]
    nt = M_pad // tm
    return pl.pallas_call(
        _gemm_stats_kernel,
        out_shape=(jax.ShapeDtypeStruct((P, M_pad, Cp), jnp.bfloat16),
                   jax.ShapeDtypeStruct((P, nt, 1, Cp), jnp.float32),
                   jax.ShapeDtypeStruct((P, nt, 1, Cp), jnp.float32)),
        grid_spec=pltpu.PrefetchScalarGridSpec(
            num_scalar_prefetch=0,
            grid=(P, nt),
            in_specs=[pl.BlockSpec((1, tm, K), lambda p, m: (p, m, 0)),
                      pl.BlockSpec((1, K, Cp), lambda p, m: (p, 0, 0))],
            out_specs=(pl.BlockSpec((1, tm, Cp), lambda p, m: (p, m, 0)),
                       pl.BlockSpec((1, 1, 1, Cp), lambda p, m: (p, m, 0, 0)),
                       pl.BlockSpec((1, 1, 1, Cp), lambda p, m: (p, m, 0, 0)))),
        compiler_params=pltpu.CompilerParams(
            dimension_semantics=("parallel", "parallel")),
    )(x_all, w_all)


def phase_gemm_bias_act(x_all, w_all, bias, tm, act):
    # Single fused pass for the non-BN layer: GEMM + bias + activation -> bf16.
    P, M_pad, K = x_all.shape
    Cp = w_all.shape[-1]
    nt = M_pad // tm
    kernel = functools.partial(_gemm_bias_act_kernel, act=act)
    return pl.pallas_call(
        kernel,
        out_shape=jax.ShapeDtypeStruct((P, M_pad, Cp), jnp.bfloat16),
        grid_spec=pltpu.PrefetchScalarGridSpec(
            num_scalar_prefetch=0,
            grid=(P, nt),
            in_specs=[pl.BlockSpec((1, tm, K), lambda p, m: (p, m, 0)),
                      pl.BlockSpec((1, K, Cp), lambda p, m: (p, 0, 0)),
                      pl.BlockSpec((1, 1, Cp), lambda p, m: (0, 0, 0))],
            out_specs=pl.BlockSpec((1, tm, Cp), lambda p, m: (p, m, 0))),
        compiler_params=pltpu.CompilerParams(
            dimension_semantics=("parallel", "parallel")),
    )(x_all, w_all, bias)


def scale_act(y, scale, shift, tm, act):
    # y:(4, M_pad, Cp) bf16; scale/shift:(1,1,Cp) f32 -> bf16 activated output, same layout.
    P, M_pad, Cp = y.shape
    nt = M_pad // tm
    kernel = functools.partial(_scale_act_kernel, act=act)
    return pl.pallas_call(
        kernel,
        out_shape=jax.ShapeDtypeStruct((P, M_pad, Cp), jnp.bfloat16),
        grid_spec=pltpu.PrefetchScalarGridSpec(
            num_scalar_prefetch=0,
            grid=(P, nt),
            in_specs=[pl.BlockSpec((1, tm, Cp), lambda p, m: (p, m, 0)),
                      pl.BlockSpec((1, 1, Cp), lambda p, m: (0, 0, 0)),
                      pl.BlockSpec((1, 1, Cp), lambda p, m: (0, 0, 0))],
            out_specs=pl.BlockSpec((1, tm, Cp), lambda p, m: (p, m, 0))),
        compiler_params=pltpu.CompilerParams(
            dimension_semantics=("parallel", "parallel")),
    )(y, scale, shift)


# ---------------------------------------------------------------------------
# Upsample-folding machinery (pure weight algebra / XLA glue)
# ---------------------------------------------------------------------------
def _phase_map(pad, t):
    # Output-index parity t -> (row start into the 1-zero-padded source, kh->dh tap map).
    phi = (2 * t - pad) % 4
    start = (2 * t - pad) // 4 + 1
    dmap = tuple(0 if phi + k < 4 else 1 for k in range(4))
    return start, dmap


def fold_layer_weights(w, pad, cout_pad):
    # (4,4,Cin,Cout) HWIO conv weight -> (4, 4*Cin, cout_pad) per-phase GEMM matrices.
    KH, KW, Cin, Cout = w.shape
    mats = []
    for th in range(2):
        _, hmap = _phase_map(pad, th)
        for tw in range(2):
            _, wmap = _phase_map(pad, tw)
            acc = jnp.zeros((2, 2, Cin, Cout), w.dtype)
            for kh in range(KH):
                for kw in range(KW):
                    acc = acc.at[hmap[kh], wmap[kw]].add(w[kh, kw])
            m = jnp.pad(acc.reshape(4 * Cin, Cout), ((0, 0), (0, cout_pad - Cout)))
            mats.append(m)
    return jnp.stack(mats, axis=0)


def _pick_tile(m, k, cp):
    # Biggest tile that keeps the double-buffered bf16 working set (x tm*K + y tm*Cp blocks, plus
    # the K*Cp weight block) under VMEM_BUDGET; multiple of 16 for bf16 sublane packing.
    fit = (VMEM_BUDGET - 4 * k * cp) // (4 * (k + cp))
    tm = max(16, min(m, MAX_TM, fit))
    return ((tm + 15) // 16) * 16


def upconv_layer(x, p):
    # Upsample(x4 nearest) -> Conv2d(4, 2, pad) -> [BatchNorm2d] -> relu/tanh, on NHWC.
    N, H, W, Cin = x.shape
    pad = p["pad"]
    H_out, W_out = 2 * H + pad - 1, 2 * W + pad - 1
    # Equal-sized phases (and the BN element count below) require even output extents;
    # true for the module's pads (3 and 1).
    assert H_out % 2 == 0 and W_out % 2 == 0
    Qh, Qw = H_out // 2, W_out // 2
    Cout = p["w"].shape[-1]
    Cp = p["w_folded"].shape[-1]
    K = 4 * Cin
    M = N * Qh * Qw

    x_ext = jnp.pad(x, ((0, 0), (1, 1), (1, 1), (0, 0))).astype(jnp.bfloat16)

    # Per-phase 2x2/stride-1 im2col (XLA glue, bf16).
    # TODO(synk): build the (tm, 4*Cin) patch tile inside the GEMM kernel (x_ext via
    # memory_space=pl.ANY + strided copies into VMEM scratch) to remove the 4x-per-phase HBM
    # duplication -- the biggest remaining lever on v5e's ~0.8 TB/s HBM.
    phases = []
    for th in range(2):
        sh, _ = _phase_map(pad, th)
        for tw in range(2):
            sw, _ = _phase_map(pad, tw)
            cols = [x_ext[:, sh + dh:sh + dh + Qh, sw + dw:sw + dw + Qw, :]
                    for dh in range(2) for dw in range(2)]
            phases.append(jnp.concatenate(cols, axis=-1).reshape(M, K))
    x_all = jnp.stack(phases, axis=0)                                    # (4, M, K)

    tm = _pick_tile(M, K, Cp)
    M_pad = -(-M // tm) * tm
    if M_pad != M:                                    # zero rows -> contribute 0 to stats
        x_all = jnp.pad(x_all, ((0, 0), (0, M_pad - M), (0, 0)))

    if p["has_bn"]:
        y, s, ss = phase_gemm_stats(x_all, p["w_folded"], tm)            # Pallas pass 1
        cnt = jnp.float32(N * H_out * W_out)                             # true element count
        mean = jnp.sum(s, axis=(0, 1, 2)) / cnt
        var = jnp.sum(ss, axis=(0, 1, 2)) / cnt - mean * mean
        var = jnp.maximum(var, 0.0)       # guard E[y^2]-E[y]^2 cancellation (f32 accumulation)
        scale = p["gamma_p"] * jax.lax.rsqrt(var + EPS)
        shift = p["beta_p"] - mean * scale
        o = scale_act(y, scale.reshape(1, 1, Cp), shift.reshape(1, 1, Cp),
                      tm, p["act"])                                      # Pallas pass 2 (bf16)
    else:
        # No BN -> no cross-tile dependence: fuse conv bias + activation into the GEMM pass,
        # skipping the second HBM round-trip of the largest activation; bf16 output.
        o = phase_gemm_bias_act(x_all, p["w_folded"],
                                p["bias_p"].reshape(1, 1, Cp), tm, p["act"])

    # TODO(synk): emit the phase-interleaved (N, H_out, W_out, C) layout directly from the Pallas
    # epilogue (needs an in-kernel sublane interleave of the two column phases) to drop this
    # XLA slice + transpose relayout.
    o = o[:, :M, :Cout]                                                  # drop M / lane padding
    o = o.reshape(2, 2, N, Qh, Qw, Cout).transpose(2, 3, 0, 4, 1, 5)     # interleave the 4 phases
    return o.reshape(N, H_out, W_out, Cout)


# ---------------------------------------------------------------------------
# Model
# ---------------------------------------------------------------------------
def init_params(key, d, hidden_size):
    # (Cin, Cout, padding, has_bn, activation) — mirrors generator_Upsampling.__init__
    cfgs = [
        (hidden_size, d * 8, 3, True, "relu"),
        (d * 8,       d * 4, 1, True, "relu"),
        (d * 4,       d * 2, 1, True, "relu"),
        (d * 2,       d,     1, True, "relu"),
        (d,           3,     1, False, "tanh"),
    ]
    params = []
    for cin, cout, pad, has_bn, act in cfgs:
        key, wk = jax.random.split(key)
        # normal_init(m, 0.0, 0.02): conv weight ~ N(0, 0.02), bias = 0
        w = jax.random.normal(wk, (4, 4, cin, cout), jnp.float32) * 0.02   # HWIO
        b = jnp.zeros((cout,), jnp.float32)
        gamma = jnp.ones((cout,), jnp.float32)                             # BatchNorm2d defaults
        beta = jnp.zeros((cout,), jnp.float32)
        cp = ((cout + LANE - 1) // LANE) * LANE
        params.append(dict(
            w=w, b=b, gamma=gamma, beta=beta, pad=pad, has_bn=has_bn, act=act,
            w_folded=fold_layer_weights(w, pad, cp).astype(jnp.bfloat16),
            gamma_p=jnp.pad(gamma, (0, cp - cout)),
            beta_p=jnp.pad(beta, (0, cp - cout)),
            bias_p=jnp.pad(b, (0, cp - cout)),
        ))
    return params


def generator_forward(x_nchw, params):
    x = jnp.transpose(x_nchw, (0, 2, 3, 1)).astype(jnp.float32)            # NCHW -> NHWC
    for p in params:
        x = upconv_layer(x, p)
    return jnp.transpose(x, (0, 3, 1, 2)).astype(jnp.float32)              # NHWC -> NCHW


def reference_forward(x_nchw, params):
    # Pure-JAX f32 reference (explicit upsample + lax conv + bias + batch-stat BN + act).
    x = jnp.transpose(x_nchw, (0, 2, 3, 1)).astype(jnp.float32)
    for p in params:
        x = jnp.repeat(jnp.repeat(x, 4, axis=1), 4, axis=2)
        y = jax.lax.conv_general_dilated(
            x, p["w"], window_strides=(2, 2),
            padding=[(p["pad"], p["pad"]), (p["pad"], p["pad"])],
            dimension_numbers=("NHWC", "HWIO", "NHWC"),
            precision=jax.lax.Precision.HIGHEST)
        y = y + p["b"]
        if p["has_bn"]:
            mean = jnp.mean(y, axis=(0, 1, 2), keepdims=True)
            var = jnp.mean((y - mean) ** 2, axis=(0, 1, 2), keepdims=True)
            y = (y - mean) * jax.lax.rsqrt(var + EPS) * p["gamma"] + p["beta"]
        x = jnp.maximum(y, 0.0) if p["act"] == "relu" else jnp.tanh(y)
    return jnp.transpose(x, (0, 3, 1, 2))


if __name__ == "__main__":
    d, hidden_size, batch = 16, 16, 2          # small but structurally faithful
    key = jax.random.PRNGKey(0)
    key, xk = jax.random.split(key)
    # GAN latent input: (N, hidden_size, 1, 1) in NCHW, as the PyTorch module expects.
    x = jax.random.normal(xk, (batch, hidden_size, 1, 1), jnp.float32)
    params = init_params(key, d, hidden_size)

    fwd = jax.jit(functools.partial(generator_forward, params=params))
    out = jax.block_until_ready(fwd(x))
    ref = jax.block_until_ready(reference_forward(x, params))

    assert out.shape == (batch, 3, 64, 64), out.shape
    max_err = float(np.max(np.abs(np.asarray(out) - np.asarray(ref))))
    # bf16 MXU operands + folded bf16 weights + bf16 final tanh store vs f32 reference.
    assert max_err < 4e-2, max_err
    print("KERNEL_OK")
</pallas_src>

<mosaic_0001>
module attributes {stable_mosaic.version = 11 : i64} {
  func.func @_gemm_stats_kernel(%arg0: i32, %arg1: i32, %arg2: memref<1x16x64xbf16, #tpu.memory_space<vmem>>, %arg3: memref<1x64x128xbf16, #tpu.memory_space<vmem>>, %arg4: memref<1x16x128xbf16, #tpu.memory_space<vmem>>, %arg5: memref<1x1x1x128xf32, #tpu.memory_space<vmem>>, %arg6: memref<1x1x1x128xf32, #tpu.memory_space<vmem>>) attributes {dimension_semantics = [#tpu.dimension_semantics<parallel>, #tpu.dimension_semantics<parallel>], iteration_bounds = array<i64: 4, 1>, scalar_prefetch = 0 : i64, scratch_operands = 0 : i64, tpu.core_type = #tpu.core_type<tc>, window_params = [{transform_indices = @transform_0, window_bounds = array<i64: 1, 16, 64>}, {transform_indices = @transform_1, window_bounds = array<i64: 1, 64, 128>}, {transform_indices = @transform_2, window_bounds = array<i64: 1, 16, 128>}, {transform_indices = @transform_3, window_bounds = array<i64: 1, 1, 1, 128>}, {transform_indices = @transform_4, window_bounds = array<i64: 1, 1, 1, 128>}]} {
    %c0 = arith.constant 0 : index
    %c0_0 = arith.constant 0 : index
    %c0_1 = arith.constant 0 : index
    %0 = vector.load %arg2[%c0, %c0_0, %c0_1] : memref<1x16x64xbf16, #tpu.memory_space<vmem>>, vector<1x16x64xbf16>
    %1 = vector.shape_cast %0 : vector<1x16x64xbf16> to vector<16x64xbf16>
    %c0_2 = arith.constant 0 : index
    %c0_3 = arith.constant 0 : index
    %c0_4 = arith.constant 0 : index
    %2 = vector.load %arg3[%c0_2, %c0_3, %c0_4] : memref<1x64x128xbf16, #tpu.memory_space<vmem>>, vector<1x64x128xbf16>
    %3 = vector.shape_cast %2 : vector<1x64x128xbf16> to vector<64x128xbf16>
    %cst = arith.constant dense<0.000000e+00> : vector<16x128xf32>
    %4 = tpu.matmul %1, %3, %cst {dimension_numbers = #tpu.dot_dimension_numbers<[1], [0], [0], [1], [0, 0, 1, 1], [], []>} : vector<16x64xbf16>, vector<64x128xbf16>, vector<16x128xf32> -> vector<16x128xf32>
    %5 = arith.truncf %4 : vector<16x128xf32> to vector<16x128xbf16>
    %c0_5 = arith.constant 0 : index
    %c0_6 = arith.constant 0 : index
    %c0_7 = arith.constant 0 : index
    %6 = vector.load %arg4[%c0_5, %c0_6, %c0_7] : memref<1x16x128xbf16, #tpu.memory_space<vmem>>, vector<1x16x128xbf16>
    %7 = vector.shape_cast %6 : vector<1x16x128xbf16> to vector<16x128xbf16>
    %8 = vector.shape_cast %5 : vector<16x128xbf16> to vector<1x16x128xbf16>
    tpu.vector_store %arg4[%c0_5, %c0_6, %c0_7], %8 {strides = array<i32>} : memref<1x16x128xbf16, #tpu.memory_space<vmem>>, vector<1x16x128xbf16>,
    %cst_8 = arith.constant dense<0.000000e+00> : vector<128xf32>
    %9 = vector.multi_reduction <add>, %4, %cst_8 [0] : vector<16x128xf32> to vector<128xf32>
    %10 = vector.shape_cast %9 : vector<128xf32> to vector<1x128xf32>
    %c0_9 = arith.constant 0 : index
    %c0_10 = arith.constant 0 : index
    %c0_11 = arith.constant 0 : index
    %c0_12 = arith.constant 0 : index
    %11 = vector.load %arg5[%c0_9, %c0_10, %c0_11, %c0_12] : memref<1x1x1x128xf32, #tpu.memory_space<vmem>>, vector<1x1x1x128xf32>
    %12 = vector.shape_cast %11 : vector<1x1x1x128xf32> to vector<1x128xf32>
    %13 = vector.shape_cast %10 : vector<1x128xf32> to vector<1x1x1x128xf32>
    tpu.vector_store %arg5[%c0_9, %c0_10, %c0_11, %c0_12], %13 {strides = array<i32>} : memref<1x1x1x128xf32, #tpu.memory_space<vmem>>, vector<1x1x1x128xf32>,
    %14 = arith.mulf %4, %4 : vector<16x128xf32>
    %cst_13 = arith.constant dense<0.000000e+00> : vector<128xf32>
    %15 = vector.multi_reduction <add>, %14, %cst_13 [0] : vector<16x128xf32> to vector<128xf32>
    %16 = vector.shape_cast %15 : vector<128xf32> to vector<1x128xf32>
    %c0_14 = arith.constant 0 : index
    %c0_15 = arith.constant 0 : index
    %c0_16 = arith.constant 0 : index
    %c0_17 = arith.constant 0 : index
    %17 = vector.load %arg6[%c0_14, %c0_15, %c0_16, %c0_17] : memref<1x1x1x128xf32, #tpu.memory_space<vmem>>, vector<1x1x1x128xf32>
    %18 = vector.shape_cast %17 : vector<1x1x1x128xf32> to vector<1x128xf32>
    %19 = vector.shape_cast %16 : vector<1x128xf32> to vector<1x1x1x128xf32>
    tpu.vector_store %arg6[%c0_14, %c0_15, %c0_16, %c0_17], %19 {strides = array<i32>} : memref<1x1x1x128xf32, #tpu.memory_space<vmem>>, vector<1x1x1x128xf32>,
    return
  }
  func.func @transform_0(%arg0: i32, %arg1: i32) -> (i32, i32, i32) {
    %c0_i32 = arith.constant 0 : i32
    %c0_i32_0 = arith.constant 0 : i32
    return %arg0, %arg1, %c0_i32 : i32, i32, i32
  }
  func.func @transform_1(%arg0: i32, %arg1: i32) -> (i32, i32, i32) {
    %c0_i32 = arith.constant 0 : i32
    %c0_i32_0 = arith.constant 0 : i32
    %c0_i32_1 = arith.constant 0 : i32
    return %arg0, %c0_i32, %c0_i32_0 : i32, i32, i32
  }
  func.func @transform_2(%arg0: i32, %arg1: i32) -> (i32, i32, i32) {
    %c0_i32 = arith.constant 0 : i32
    %c0_i32_0 = arith.constant 0 : i32
    return %arg0, %arg1, %c0_i32 : i32, i32, i32
  }
  func.func @transform_3(%arg0: i32, %arg1: i32) -> (i32, i32, i32, i32) {
    %c0_i32 = arith.constant 0 : i32
    %c0_i32_0 = arith.constant 0 : i32
    %c0_i32_1 = arith.constant 0 : i32
    return %arg0, %arg1, %c0_i32, %c0_i32_0 : i32, i32, i32, i32
  }
  func.func @transform_4(%arg0: i32, %arg1: i32) -> (i32, i32, i32, i32) {
    %c0_i32 = arith.constant 0 : i32
    %c0_i32_0 = arith.constant 0 : i32
    %c0_i32_1 = arith.constant 0 : i32
    return %arg0, %arg1, %c0_i32, %c0_i32_0 : i32, i32, i32, i32
  }
}

module attributes {stable_mosaic.version = 11 : i64} {
  func.func @_scale_act_kernel(%arg0: i32, %arg1: i32, %arg2: memref<1x16x128xbf16, #tpu.memory_space<vmem>>, %arg3: memref<1x1x128xf32, #tpu.memory_space<vmem>>, %arg4: memref<1x1x128xf32, #tpu.memory_space<vmem>>, %arg5: memref<1x16x128xbf16, #tpu.memory_space<vmem>>) attributes {dimension_semantics = [#tpu.dimension_semantics<parallel>, #tpu.dimension_semantics<parallel>], iteration_bounds = array<i64: 4, 1>, scalar_prefetch = 0 : i64, scratch_operands = 0 : i64, tpu.core_type = #tpu.core_type<tc>, window_params = [{transform_indices = @transform_0, window_bounds = array<i64: 1, 16, 128>}, {pipeline_mode = #tpu.pipeline_mode<synchronous>, transform_indices = @transform_1, window_bounds = array<i64: 1, 1, 128>}, {pipeline_mode = #tpu.pipeline_mode<synchronous>, transform_indices = @transform_2, window_bounds = array<i64: 1, 1, 128>}, {transform_indices = @transform_3, window_bounds = array<i64: 1, 16, 128>}]} {
    %c0 = arith.constant 0 : index
    %c0_0 = arith.constant 0 : index
    %c0_1 = arith.constant 0 : index
    %0 = vector.load %arg2[%c0, %c0_0, %c0_1] : memref<1x16x128xbf16, #tpu.memory_space<vmem>>, vector<1x16x128xbf16>
    %1 = vector.shape_cast %0 : vector<1x16x128xbf16> to vector<16x128xbf16>
    %2 = arith.extf %1 : vector<16x128xbf16> to vector<16x128xf32>
    %c0_2 = arith.constant 0 : index
    %c0_3 = arith.constant 0 : index
    %c0_4 = arith.constant 0 : index
    %3 = vector.load %arg3[%c0_2, %c0_3, %c0_4] : memref<1x1x128xf32, #tpu.memory_space<vmem>>, vector<1x1x128xf32>
    %4 = vector.shape_cast %3 : vector<1x1x128xf32> to vector<1x128xf32>
    %5 = vector.broadcast %4 : vector<1x128xf32> to vector<16x128xf32>
    %6 = arith.mulf %2, %5 : vector<16x128xf32>
    %c0_5 = arith.constant 0 : index
    %c0_6 = arith.constant 0 : index
    %c0_7 = arith.constant 0 : index
    %7 = vector.load %arg4[%c0_5, %c0_6, %c0_7] : memref<1x1x128xf32, #tpu.memory_space<vmem>>, vector<1x1x128xf32>
    %8 = vector.shape_cast %7 : vector<1x1x128xf32> to vector<1x128xf32>
    %9 = vector.broadcast %8 : vector<1x128xf32> to vector<16x128xf32>
    %10 = arith.addf %6, %9 : vector<16x128xf32>
    %cst = arith.constant 0.000000e+00 : f32
    %11 = vector.broadcast %cst : f32 to vector<16x128xf32>
    %12 = arith.maximumf %10, %11 : vector<16x128xf32>
    %13 = arith.truncf %12 : vector<16x128xf32> to vector<16x128xbf16>
    %c0_8 = arith.constant 0 : index
    %c0_9 = arith.constant 0 : index
    %c0_10 = arith.constant 0 : index
    %14 = vector.load %arg5[%c0_8, %c0_9, %c0_10] : memref<1x16x128xbf16, #tpu.memory_space<vmem>>, vector<1x16x128xbf16>
    %15 = vector.shape_cast %14 : vector<1x16x128xbf16> to vector<16x128xbf16>
    %16 = vector.shape_cast %13 : vector<16x128xbf16> to vector<1x16x128xbf16>
    tpu.vector_store %arg5[%c0_8, %c0_9, %c0_10], %16 {strides = array<i32>} : memref<1x16x128xbf16, #tpu.memory_space<vmem>>, vector<1x16x128xbf16>,
    return
  }
  func.func @transform_0(%arg0: i32, %arg1: i32) -> (i32, i32, i32) {
    %c0_i32 = arith.constant 0 : i32
    %c0_i32_0 = arith.constant 0 : i32
    return %arg0, %arg1, %c0_i32 : i32, i32, i32
  }
  func.func @transform_1(%arg0: i32, %arg1: i32) -> (i32, i32, i32) {
    %c0_i32 = arith.constant 0 : i32
    %c0_i32_0 = arith.constant 0 : i32
    %c0_i32_1 = arith.constant 0 : i32
    %c0_i32_2 = arith.constant 0 : i32
    return %c0_i32, %c0_i32_0, %c0_i32_1 : i32, i32, i32
  }
  func.func @transform_2(%arg0: i32, %arg1: i32) -> (i32, i32, i32) {
    %c0_i32 = arith.constant 0 : i32
    %c0_i32_0 = arith.constant 0 : i32
    %c0_i32_1 = arith.constant 0 : i32
    %c0_i32_2 = arith.constant 0 : i32
    return %c0_i32, %c0_i32_0, %c0_i32_1 : i32, i32, i32
  }
  func.func @transform_3(%arg0: i32, %arg1: i32) -> (i32, i32, i32) {
    %c0_i32 = arith.constant 0 : i32
    %c0_i32_0 = arith.constant 0 : i32
    return %arg0, %arg1, %c0_i32 : i32, i32, i32
  }
}

module attributes {stable_mosaic.version = 11 : i64} {
  func.func @_gemm_stats_kernel(%arg0: i32, %arg1: i32, %arg2: memref<1x32x512xbf16, #tpu.memory_space<vmem>>, %arg3: memref<1x512x128xbf16, #tpu.memory_space<vmem>>, %arg4: memref<1x32x128xbf16, #tpu.memory_space<vmem>>, %arg5: memref<1x1x1x128xf32, #tpu.memory_space<vmem>>, %arg6: memref<1x1x1x128xf32, #tpu.memory_space<vmem>>) attributes {dimension_semantics = [#tpu.dimension_semantics<parallel>, #tpu.dimension_semantics<parallel>], iteration_bounds = array<i64: 4, 1>, scalar_prefetch = 0 : i64, scratch_operands = 0 : i64, tpu.core_type = #tpu.core_type<tc>, window_params = [{transform_indices = @transform_0, window_bounds = array<i64: 1, 32, 512>}, {transform_indices = @transform_1, window_bounds = array<i64: 1, 512, 128>}, {transform_indices = @transform_2, window_bounds = array<i64: 1, 32, 128>}, {transform_indices = @transform_3, window_bounds = array<i64: 1, 1, 1, 128>}, {transform_indices = @transform_4, window_bounds = array<i64: 1, 1, 1, 128>}]} {
    %c0 = arith.constant 0 : index
    %c0_0 = arith.constant 0 : index
    %c0_1 = arith.constant 0 : index
    %0 = vector.load %arg2[%c0, %c0_0, %c0_1] : memref<1x32x512xbf16, #tpu.memory_space<vmem>>, vector<1x32x512xbf16>
    %1 = vector.shape_cast %0 : vector<1x32x512xbf16> to vector<32x512xbf16>
    %c0_2 = arith.constant 0 : index
    %c0_3 = arith.constant 0 : index
    %c0_4 = arith.constant 0 : index
    %2 = vector.load %arg3[%c0_2, %c0_3, %c0_4] : memref<1x512x128xbf16, #tpu.memory_space<vmem>>, vector<1x512x128xbf16>
    %3 = vector.shape_cast %2 : vector<1x512x128xbf16> to vector<512x128xbf16>
    %cst = arith.constant dense<0.000000e+00> : vector<32x128xf32>
    %4 = tpu.matmul %1, %3, %cst {dimension_numbers = #tpu.dot_dimension_numbers<[1], [0], [0], [1], [0, 0, 1, 1], [], []>} : vector<32x512xbf16>, vector<512x128xbf16>, vector<32x128xf32> -> vector<32x128xf32>
    %5 = arith.truncf %4 : vector<32x128xf32> to vector<32x128xbf16>
    %c0_5 = arith.constant 0 : index
    %c0_6 = arith.constant 0 : index
    %c0_7 = arith.constant 0 : index
    %6 = vector.load %arg4[%c0_5, %c0_6, %c0_7] : memref<1x32x128xbf16, #tpu.memory_space<vmem>>, vector<1x32x128xbf16>
    %7 = vector.shape_cast %6 : vector<1x32x128xbf16> to vector<32x128xbf16>
    %8 = vector.shape_cast %5 : vector<32x128xbf16> to vector<1x32x128xbf16>
    tpu.vector_store %arg4[%c0_5, %c0_6, %c0_7], %8 {strides = array<i32>} : memref<1x32x128xbf16, #tpu.memory_space<vmem>>, vector<1x32x128xbf16>,
    %cst_8 = arith.constant dense<0.000000e+00> : vector<128xf32>
    %9 = vector.multi_reduction <add>, %4, %cst_8 [0] : vector<32x128xf32> to vector<128xf32>
    %10 = vector.shape_cast %9 : vector<128xf32> to vector<1x128xf32>
    %c0_9 = arith.constant 0 : index
    %c0_10 = arith.constant 0 : index
    %c0_11 = arith.constant 0 : index
    %c0_12 = arith.constant 0 : index
    %11 = vector.load %arg5[%c0_9, %c0_10, %c0_11, %c0_12] : memref<1x1x1x128xf32, #tpu.memory_space<vmem>>, vector<1x1x1x128xf32>
    %12 = vector.shape_cast %11 : vector<1x1x1x128xf32> to vector<1x128xf32>
    %13 = vector.shape_cast %10 : vector<1x128xf32> to vector<1x1x1x128xf32>
    tpu.vector_store %arg5[%c0_9, %c0_10, %c0_11, %c0_12], %13 {strides = array<i32>} : memref<1x1x1x128xf32, #tpu.memory_space<vmem>>, vector<1x1x1x128xf32>,
    %14 = arith.mulf %4, %4 : vector<32x128xf32>
    %cst_13 = arith.constant dense<0.000000e+00> : vector<128xf32>
    %15 = vector.multi_reduction <add>, %14, %cst_13 [0] : vector<32x128xf32> to vector<128xf32>
    %16 = vector.shape_cast %15 : vector<128xf32> to vector<1x128xf32>
    %c0_14 = arith.constant 0 : index
    %c0_15 = arith.constant 0 : index
    %c0_16 = arith.constant 0 : index
    %c0_17 = arith.constant 0 : index
    %17 = vector.load %arg6[%c0_14, %c0_15, %c0_16, %c0_17] : memref<1x1x1x128xf32, #tpu.memory_space<vmem>>, vector<1x1x1x128xf32>
    %18 = vector.shape_cast %17 : vector<1x1x1x128xf32> to vector<1x128xf32>
    %19 = vector.shape_cast %16 : vector<1x128xf32> to vector<1x1x1x128xf32>
    tpu.vector_store %arg6[%c0_14, %c0_15, %c0_16, %c0_17], %19 {strides = array<i32>} : memref<1x1x1x128xf32, #tpu.memory_space<vmem>>, vector<1x1x1x128xf32>,
    return
  }
  func.func @transform_0(%arg0: i32, %arg1: i32) -> (i32, i32, i32) {
    %c0_i32 = arith.constant 0 : i32
    %c0_i32_0 = arith.constant 0 : i32
    return %arg0, %arg1, %c0_i32 : i32, i32, i32
  }
  func.func @transform_1(%arg0: i32, %arg1: i32) -> (i32, i32, i32) {
    %c0_i32 = arith.constant 0 : i32
    %c0_i32_0 = arith.constant 0 : i32
    %c0_i32_1 = arith.constant 0 : i32
    return %arg0, %c0_i32, %c0_i32_0 : i32, i32, i32
  }
  func.func @transform_2(%arg0: i32, %arg1: i32) -> (i32, i32, i32) {
    %c0_i32 = arith.constant 0 : i32
    %c0_i32_0 = arith.constant 0 : i32
    return %arg0, %arg1, %c0_i32 : i32, i32, i32
  }
  func.func @transform_3(%arg0: i32, %arg1: i32) -> (i32, i32, i32, i32) {
    %c0_i32 = arith.constant 0 : i32
    %c0_i32_0 = arith.constant 0 : i32
    %c0_i32_1 = arith.constant 0 : i32
    return %arg0, %arg1, %c0_i32, %c0_i32_0 : i32, i32, i32, i32
  }
  func.func @transform_4(%arg0: i32, %arg1: i32) -> (i32, i32, i32, i32) {
    %c0_i32 = arith.constant 0 : i32
    %c0_i32_0 = arith.constant 0 : i32
    %c0_i32_1 = arith.constant 0 : i32
    return %arg0, %arg1, %c0_i32, %c0_i32_0 : i32, i32, i32, i32
  }
}

module attributes {stable_mosaic.version = 11 : i64} {
  func.func @_scale_act_kernel(%arg0: i32, %arg1: i32, %arg2: memref<1x32x128xbf16, #tpu.memory_space<vmem>>, %arg3: memref<1x1x128xf32, #tpu.memory_space<vmem>>, %arg4: memref<1x1x128xf32, #tpu.memory_space<vmem>>, %arg5: memref<1x32x128xbf16, #tpu.memory_space<vmem>>) attributes {dimension_semantics = [#tpu.dimension_semantics<parallel>, #tpu.dimension_semantics<parallel>], iteration_bounds = array<i64: 4, 1>, scalar_prefetch = 0 : i64, scratch_operands = 0 : i64, tpu.core_type = #tpu.core_type<tc>, window_params = [{transform_indices = @transform_0, window_bounds = array<i64: 1, 32, 128>}, {pipeline_mode = #tpu.pipeline_mode<synchronous>, transform_indices = @transform_1, window_bounds = array<i64: 1, 1, 128>}, {pipeline_mode = #tpu.pipeline_mode<synchronous>, transform_indices = @transform_2, window_bounds = array<i64: 1, 1, 128>}, {transform_indices = @transform_3, window_bounds = array<i64: 1, 32, 128>}]} {
    %c0 = arith.constant 0 : index
    %c0_0 = arith.constant 0 : index
    %c0_1 = arith.constant 0 : index
    %0 = vector.load %arg2[%c0, %c0_0, %c0_1] : memref<1x32x128xbf16, #tpu.memory_space<vmem>>, vector<1x32x128xbf16>
    %1 = vector.shape_cast %0 : vector<1x32x128xbf16> to vector<32x128xbf16>
    %2 = arith.extf %1 : vector<32x128xbf16> to vector<32x128xf32>
    %c0_2 = arith.constant 0 : index
    %c0_3 = arith.constant 0 : index
    %c0_4 = arith.constant 0 : index
    %3 = vector.load %arg3[%c0_2, %c0_3, %c0_4] : memref<1x1x128xf32, #tpu.memory_space<vmem>>, vector<1x1x128xf32>
    %4 = vector.shape_cast %3 : vector<1x1x128xf32> to vector<1x128xf32>
    %5 = vector.broadcast %4 : vector<1x128xf32> to vector<32x128xf32>
    %6 = arith.mulf %2, %5 : vector<32x128xf32>
    %c0_5 = arith.constant 0 : index
    %c0_6 = arith.constant 0 : index
    %c0_7 = arith.constant 0 : index
    %7 = vector.load %arg4[%c0_5, %c0_6, %c0_7] : memref<1x1x128xf32, #tpu.memory_space<vmem>>, vector<1x1x128xf32>
    %8 = vector.shape_cast %7 : vector<1x1x128xf32> to vector<1x128xf32>
    %9 = vector.broadcast %8 : vector<1x128xf32> to vector<32x128xf32>
    %10 = arith.addf %6, %9 : vector<32x128xf32>
    %cst = arith.constant 0.000000e+00 : f32
    %11 = vector.broadcast %cst : f32 to vector<32x128xf32>
    %12 = arith.maximumf %10, %11 : vector<32x128xf32>
    %13 = arith.truncf %12 : vector<32x128xf32> to vector<32x128xbf16>
    %c0_8 = arith.constant 0 : index
    %c0_9 = arith.constant 0 : index
    %c0_10 = arith.constant 0 : index
    %14 = vector.load %arg5[%c0_8, %c0_9, %c0_10] : memref<1x32x128xbf16, #tpu.memory_space<vmem>>, vector<1x32x128xbf16>
    %15 = vector.shape_cast %14 : vector<1x32x128xbf16> to vector<32x128xbf16>
    %16 = vector.shape_cast %13 : vector<32x128xbf16> to vector<1x32x128xbf16>
    tpu.vector_store %arg5[%c0_8, %c0_9, %c0_10], %16 {strides = array<i32>} : memref<1x32x128xbf16, #tpu.memory_space<vmem>>, vector<1x32x128xbf16>,
    return
  }
  func.func @transform_0(%arg0: i32, %arg1: i32) -> (i32, i32, i32) {
    %c0_i32 = arith.constant 0 : i32
    %c0_i32_0 = arith.constant 0 : i32
    return %arg0, %arg1, %c0_i32 : i32, i32, i32
  }
  func.func @transform_1(%arg0: i32, %arg1: i32) -> (i32, i32, i32) {
    %c0_i32 = arith.constant 0 : i32
    %c0_i32_0 = arith.constant 0 : i32
    %c0_i32_1 = arith.constant 0 : i32
    %c0_i32_2 = arith.constant 0 : i32
    return %c0_i32, %c0_i32_0, %c0_i32_1 : i32, i32, i32
  }
  func.func @transform_2(%arg0: i32, %arg1: i32) -> (i32, i32, i32) {
    %c0_i32 = arith.constant 0 : i32
    %c0_i32_0 = arith.constant 0 : i32
    %c0_i32_1 = arith.constant 0 : i32
    %c0_i32_2 = arith.constant 0 : i32
    return %c0_i32, %c0_i32_0, %c0_i32_1 : i32, i32, i32
  }
  func.func @transform_3(%arg0: i32, %arg1: i32) -> (i32, i32, i32) {
    %c0_i32 = arith.constant 0 : i32
    %c0_i32_0 = arith.constant 0 : i32
    return %arg0, %arg1, %c0_i32 : i32, i32, i32
  }
}

module attributes {stable_mosaic.version = 11 : i64} {
  func.func @_scale_act_kernel(%arg0: i32, %arg1: i32, %arg2: memref<1x128x128xbf16, #tpu.memory_space<vmem>>, %arg3: memref<1x1x128xf32, #tpu.memory_space<vmem>>, %arg4: memref<1x1x128xf32, #tpu.memory_space<vmem>>, %arg5: memref<1x128x128xbf16, #tpu.memory_space<vmem>>) attributes {dimension_semantics = [#tpu.dimension_semantics<parallel>, #tpu.dimension_semantics<parallel>], iteration_bounds = array<i64: 4, 1>, scalar_prefetch = 0 : i64, scratch_operands = 0 : i64, tpu.core_type = #tpu.core_type<tc>, window_params = [{transform_indices = @transform_0, window_bounds = array<i64: 1, 128, 128>}, {pipeline_mode = #tpu.pipeline_mode<synchronous>, transform_indices = @transform_1, window_bounds = array<i64: 1, 1, 128>}, {pipeline_mode = #tpu.pipeline_mode<synchronous>, transform_indices = @transform_2, window_bounds = array<i64: 1, 1, 128>}, {transform_indices = @transform_3, window_bounds = array<i64: 1, 128, 128>}]} {
    %c0 = arith.constant 0 : index
    %c0_0 = arith.constant 0 : index
    %c0_1 = arith.constant 0 : index
    %0 = vector.load %arg2[%c0, %c0_0, %c0_1] : memref<1x128x128xbf16, #tpu.memory_space<vmem>>, vector<1x128x128xbf16>
    %1 = vector.shape_cast %0 : vector<1x128x128xbf16> to vector<128x128xbf16>
    %2 = arith.extf %1 : vector<128x128xbf16> to vector<128x128xf32>
    %c0_2 = arith.constant 0 : index
    %c0_3 = arith.constant 0 : index
    %c0_4 = arith.constant 0 : index
    %3 = vector.load %arg3[%c0_2, %c0_3, %c0_4] : memref<1x1x128xf32, #tpu.memory_space<vmem>>, vector<1x1x128xf32>
    %4 = vector.shape_cast %3 : vector<1x1x128xf32> to vector<1x128xf32>
    %5 = vector.broadcast %4 : vector<1x128xf32> to vector<128x128xf32>
    %6 = arith.mulf %2, %5 : vector<128x128xf32>
    %c0_5 = arith.constant 0 : index
    %c0_6 = arith.constant 0 : index
    %c0_7 = arith.constant 0 : index
    %7 = vector.load %arg4[%c0_5, %c0_6, %c0_7] : memref<1x1x128xf32, #tpu.memory_space<vmem>>, vector<1x1x128xf32>
    %8 = vector.shape_cast %7 : vector<1x1x128xf32> to vector<1x128xf32>
    %9 = vector.broadcast %8 : vector<1x128xf32> to vector<128x128xf32>
    %10 = arith.addf %6, %9 : vector<128x128xf32>
    %cst = arith.constant 0.000000e+00 : f32
    %11 = vector.broadcast %cst : f32 to vector<128x128xf32>
    %12 = arith.maximumf %10, %11 : vector<128x128xf32>
    %13 = arith.truncf %12 : vector<128x128xf32> to vector<128x128xbf16>
    %c0_8 = arith.constant 0 : index
    %c0_9 = arith.constant 0 : index
    %c0_10 = arith.constant 0 : index
    %14 = vector.load %arg5[%c0_8, %c0_9, %c0_10] : memref<1x128x128xbf16, #tpu.memory_space<vmem>>, vector<1x128x128xbf16>
    %15 = vector.shape_cast %14 : vector<1x128x128xbf16> to vector<128x128xbf16>
    %16 = vector.shape_cast %13 : vector<128x128xbf16> to vector<1x128x128xbf16>
    tpu.vector_store %arg5[%c0_8, %c0_9, %c0_10], %16 {strides = array<i32>} : memref<1x128x128xbf16, #tpu.memory_space<vmem>>, vector<1x128x128xbf16>,
    return
  }
  func.func @transform_0(%arg0: i32, %arg1: i32) -> (i32, i32, i32) {
    %c0_i32 = arith.constant 0 : i32
    %c0_i32_0 = arith.constant 0 : i32
    return %arg0, %arg1, %c0_i32 : i32, i32, i32
  }
  func.func @transform_1(%arg0: i32, %arg1: i32) -> (i32, i32, i32) {
    %c0_i32 = arith.constant 0 : i32
    %c0_i32_0 = arith.constant 0 : i32
    %c0_i32_1 = arith.constant 0 : i32
    %c0_i32_2 = arith.constant 0 : i32
    return %c0_i32, %c0_i32_0, %c0_i32_1 : i32, i32, i32
  }
  func.func @transform_2(%arg0: i32, %arg1: i32) -> (i32, i32, i32) {
    %c0_i32 = arith.constant 0 : i32
    %c0_i32_0 = arith.constant 0 : i32
    %c0_i32_1 = arith.constant 0 : i32
    %c0_i32_2 = arith.constant 0 : i32
    return %c0_i32, %c0_i32_0, %c0_i32_1 : i32, i32, i32
  }
  func.func @transform_3(%arg0: i32, %arg1: i32) -> (i32, i32, i32) {
    %c0_i32 = arith.constant 0 : i32
    %c0_i32_0 = arith.constant 0 : i32
    return %arg0, %arg1, %c0_i32 : i32, i32, i32
  }
}

module attributes {stable_mosaic.version = 11 : i64} {
  func.func @_gemm_stats_kernel(%arg0: i32, %arg1: i32, %arg2: memref<1x128x256xbf16, #tpu.memory_space<vmem>>, %arg3: memref<1x256x128xbf16, #tpu.memory_space<vmem>>, %arg4: memref<1x128x128xbf16, #tpu.memory_space<vmem>>, %arg5: memref<1x1x1x128xf32, #tpu.memory_space<vmem>>, %arg6: memref<1x1x1x128xf32, #tpu.memory_space<vmem>>) attributes {dimension_semantics = [#tpu.dimension_semantics<parallel>, #tpu.dimension_semantics<parallel>], iteration_bounds = array<i64: 4, 1>, scalar_prefetch = 0 : i64, scratch_operands = 0 : i64, tpu.core_type = #tpu.core_type<tc>, window_params = [{transform_indices = @transform_0, window_bounds = array<i64: 1, 128, 256>}, {transform_indices = @transform_1, window_bounds = array<i64: 1, 256, 128>}, {transform_indices = @transform_2, window_bounds = array<i64: 1, 128, 128>}, {transform_indices = @transform_3, window_bounds = array<i64: 1, 1, 1, 128>}, {transform_indices = @transform_4, window_bounds = array<i64: 1, 1, 1, 128>}]} {
    %c0 = arith.constant 0 : index
    %c0_0 = arith.constant 0 : index
    %c0_1 = arith.constant 0 : index
    %0 = vector.load %arg2[%c0, %c0_0, %c0_1] : memref<1x128x256xbf16, #tpu.memory_space<vmem>>, vector<1x128x256xbf16>
    %1 = vector.shape_cast %0 : vector<1x128x256xbf16> to vector<128x256xbf16>
    %c0_2 = arith.constant 0 : index
    %c0_3 = arith.constant 0 : index
    %c0_4 = arith.constant 0 : index
    %2 = vector.load %arg3[%c0_2, %c0_3, %c0_4] : memref<1x256x128xbf16, #tpu.memory_space<vmem>>, vector<1x256x128xbf16>
    %3 = vector.shape_cast %2 : vector<1x256x128xbf16> to vector<256x128xbf16>
    %cst = arith.constant dense<0.000000e+00> : vector<128x128xf32>
    %4 = tpu.matmul %1, %3, %cst {dimension_numbers = #tpu.dot_dimension_numbers<[1], [0], [0], [1], [0, 0, 1, 1], [], []>} : vector<128x256xbf16>, vector<256x128xbf16>, vector<128x128xf32> -> vector<128x128xf32>
    %5 = arith.truncf %4 : vector<128x128xf32> to vector<128x128xbf16>
    %c0_5 = arith.constant 0 : index
    %c0_6 = arith.constant 0 : index
    %c0_7 = arith.constant 0 : index
    %6 = vector.load %arg4[%c0_5, %c0_6, %c0_7] : memref<1x128x128xbf16, #tpu.memory_space<vmem>>, vector<1x128x128xbf16>
    %7 = vector.shape_cast %6 : vector<1x128x128xbf16> to vector<128x128xbf16>
    %8 = vector.shape_cast %5 : vector<128x128xbf16> to vector<1x128x128xbf16>
    tpu.vector_store %arg4[%c0_5, %c0_6, %c0_7], %8 {strides = array<i32>} : memref<1x128x128xbf16, #tpu.memory_space<vmem>>, vector<1x128x128xbf16>,
    %cst_8 = arith.constant dense<0.000000e+00> : vector<128xf32>
    %9 = vector.multi_reduction <add>, %4, %cst_8 [0] : vector<128x128xf32> to vector<128xf32>
    %10 = vector.shape_cast %9 : vector<128xf32> to vector<1x128xf32>
    %c0_9 = arith.constant 0 : index
    %c0_10 = arith.constant 0 : index
    %c0_11 = arith.constant 0 : index
    %c0_12 = arith.constant 0 : index
    %11 = vector.load %arg5[%c0_9, %c0_10, %c0_11, %c0_12] : memref<1x1x1x128xf32, #tpu.memory_space<vmem>>, vector<1x1x1x128xf32>
    %12 = vector.shape_cast %11 : vector<1x1x1x128xf32> to vector<1x128xf32>
    %13 = vector.shape_cast %10 : vector<1x128xf32> to vector<1x1x1x128xf32>
    tpu.vector_store %arg5[%c0_9, %c0_10, %c0_11, %c0_12], %13 {strides = array<i32>} : memref<1x1x1x128xf32, #tpu.memory_space<vmem>>, vector<1x1x1x128xf32>,
    %14 = arith.mulf %4, %4 : vector<128x128xf32>
    %cst_13 = arith.constant dense<0.000000e+00> : vector<128xf32>
    %15 = vector.multi_reduction <add>, %14, %cst_13 [0] : vector<128x128xf32> to vector<128xf32>
    %16 = vector.shape_cast %15 : vector<128xf32> to vector<1x128xf32>
    %c0_14 = arith.constant 0 : index
    %c0_15 = arith.constant 0 : index
    %c0_16 = arith.constant 0 : index
    %c0_17 = arith.constant 0 : index
    %17 = vector.load %arg6[%c0_14, %c0_15, %c0_16, %c0_17] : memref<1x1x1x128xf32, #tpu.memory_space<vmem>>, vector<1x1x1x128xf32>
    %18 = vector.shape_cast %17 : vector<1x1x1x128xf32> to vector<1x128xf32>
    %19 = vector.shape_cast %16 : vector<1x128xf32> to vector<1x1x1x128xf32>
    tpu.vector_store %arg6[%c0_14, %c0_15, %c0_16, %c0_17], %19 {strides = array<i32>} : memref<1x1x1x128xf32, #tpu.memory_space<vmem>>, vector<1x1x1x128xf32>,
    return
  }
  func.func @transform_0(%arg0: i32, %arg1: i32) -> (i32, i32, i32) {
    %c0_i32 = arith.constant 0 : i32
    %c0_i32_0 = arith.constant 0 : i32
    return %arg0, %arg1, %c0_i32 : i32, i32, i32
  }
  func.func @transform_1(%arg0: i32, %arg1: i32) -> (i32, i32, i32) {
    %c0_i32 = arith.constant 0 : i32
    %c0_i32_0 = arith.constant 0 : i32
    %c0_i32_1 = arith.constant 0 : i32
    return %arg0, %c0_i32, %c0_i32_0 : i32, i32, i32
  }
  func.func @transform_2(%arg0: i32, %arg1: i32) -> (i32, i32, i32) {
    %c0_i32 = arith.constant 0 : i32
    %c0_i32_0 = arith.constant 0 : i32
    return %arg0, %arg1, %c0_i32 : i32, i32, i32
  }
  func.func @transform_3(%arg0: i32, %arg1: i32) -> (i32, i32, i32, i32) {
    %c0_i32 = arith.constant 0 : i32
    %c0_i32_0 = arith.constant 0 : i32
    %c0_i32_1 = arith.constant 0 : i32
    return %arg0, %arg1, %c0_i32, %c0_i32_0 : i32, i32, i32, i32
  }
  func.func @transform_4(%arg0: i32, %arg1: i32) -> (i32, i32, i32, i32) {
    %c0_i32 = arith.constant 0 : i32
    %c0_i32_0 = arith.constant 0 : i32
    %c0_i32_1 = arith.constant 0 : i32
    return %arg0, %arg1, %c0_i32, %c0_i32_0 : i32, i32, i32, i32
  }
}

module attributes {stable_mosaic.version = 11 : i64} {
  func.func @_gemm_stats_kernel(%arg0: i32, %arg1: i32, %arg2: memref<1x512x128xbf16, #tpu.memory_space<vmem>>, %arg3: memref<1x128x128xbf16, #tpu.memory_space<vmem>>, %arg4: memref<1x512x128xbf16, #tpu.memory_space<vmem>>, %arg5: memref<1x1x1x128xf32, #tpu.memory_space<vmem>>, %arg6: memref<1x1x1x128xf32, #tpu.memory_space<vmem>>) attributes {dimension_semantics = [#tpu.dimension_semantics<parallel>, #tpu.dimension_semantics<parallel>], iteration_bounds = array<i64: 4, 1>, scalar_prefetch = 0 : i64, scratch_operands = 0 : i64, tpu.core_type = #tpu.core_type<tc>, window_params = [{transform_indices = @transform_0, window_bounds = array<i64: 1, 512, 128>}, {transform_indices = @transform_1, window_bounds = array<i64: 1, 128, 128>}, {transform_indices = @transform_2, window_bounds = array<i64: 1, 512, 128>}, {transform_indices = @transform_3, window_bounds = array<i64: 1, 1, 1, 128>}, {transform_indices = @transform_4, window_bounds = array<i64: 1, 1, 1, 128>}]} {
    %c0 = arith.constant 0 : index
    %c0_0 = arith.constant 0 : index
    %c0_1 = arith.constant 0 : index
    %0 = vector.load %arg2[%c0, %c0_0, %c0_1] : memref<1x512x128xbf16, #tpu.memory_space<vmem>>, vector<1x512x128xbf16>
    %1 = vector.shape_cast %0 : vector<1x512x128xbf16> to vector<512x128xbf16>
    %c0_2 = arith.constant 0 : index
    %c0_3 = arith.constant 0 : index
    %c0_4 = arith.constant 0 : index
    %2 = vector.load %arg3[%c0_2, %c0_3, %c0_4] : memref<1x128x128xbf16, #tpu.memory_space<vmem>>, vector<1x128x128xbf16>
    %3 = vector.shape_cast %2 : vector<1x128x128xbf16> to vector<128x128xbf16>
    %cst = arith.constant dense<0.000000e+00> : vector<512x128xf32>
    %4 = tpu.matmul %1, %3, %cst {dimension_numbers = #tpu.dot_dimension_numbers<[1], [0], [0], [1], [0, 0, 1, 1], [], []>} : vector<512x128xbf16>, vector<128x128xbf16>, vector<512x128xf32> -> vector<512x128xf32>
    %5 = arith.truncf %4 : vector<512x128xf32> to vector<512x128xbf16>
    %c0_5 = arith.constant 0 : index
    %c0_6 = arith.constant 0 : index
    %c0_7 = arith.constant 0 : index
    %6 = vector.load %arg4[%c0_5, %c0_6, %c0_7] : memref<1x512x128xbf16, #tpu.memory_space<vmem>>, vector<1x512x128xbf16>
    %7 = vector.shape_cast %6 : vector<1x512x128xbf16> to vector<512x128xbf16>
    %8 = vector.shape_cast %5 : vector<512x128xbf16> to vector<1x512x128xbf16>
    tpu.vector_store %arg4[%c0_5, %c0_6, %c0_7], %8 {strides = array<i32>} : memref<1x512x128xbf16, #tpu.memory_space<vmem>>, vector<1x512x128xbf16>,
    %cst_8 = arith.constant dense<0.000000e+00> : vector<128xf32>
    %9 = vector.multi_reduction <add>, %4, %cst_8 [0] : vector<512x128xf32> to vector<128xf32>
    %10 = vector.shape_cast %9 : vector<128xf32> to vector<1x128xf32>
    %c0_9 = arith.constant 0 : index
    %c0_10 = arith.constant 0 : index
    %c0_11 = arith.constant 0 : index
    %c0_12 = arith.constant 0 : index
    %11 = vector.load %arg5[%c0_9, %c0_10, %c0_11, %c0_12] : memref<1x1x1x128xf32, #tpu.memory_space<vmem>>, vector<1x1x1x128xf32>
    %12 = vector.shape_cast %11 : vector<1x1x1x128xf32> to vector<1x128xf32>
    %13 = vector.shape_cast %10 : vector<1x128xf32> to vector<1x1x1x128xf32>
    tpu.vector_store %arg5[%c0_9, %c0_10, %c0_11, %c0_12], %13 {strides = array<i32>} : memref<1x1x1x128xf32, #tpu.memory_space<vmem>>, vector<1x1x1x128xf32>,
    %14 = arith.mulf %4, %4 : vector<512x128xf32>
    %cst_13 = arith.constant dense<0.000000e+00> : vector<128xf32>
    %15 = vector.multi_reduction <add>, %14, %cst_13 [0] : vector<512x128xf32> to vector<128xf32>
    %16 = vector.shape_cast %15 : vector<128xf32> to vector<1x128xf32>
    %c0_14 = arith.constant 0 : index
    %c0_15 = arith.constant 0 : index
    %c0_16 = arith.constant 0 : index
    %c0_17 = arith.constant 0 : index
    %17 = vector.load %arg6[%c0_14, %c0_15, %c0_16, %c0_17] : memref<1x1x1x128xf32, #tpu.memory_space<vmem>>, vector<1x1x1x128xf32>
    %18 = vector.shape_cast %17 : vector<1x1x1x128xf32> to vector<1x128xf32>
    %19 = vector.shape_cast %16 : vector<1x128xf32> to vector<1x1x1x128xf32>
    tpu.vector_store %arg6[%c0_14, %c0_15, %c0_16, %c0_17], %19 {strides = array<i32>} : memref<1x1x1x128xf32, #tpu.memory_space<vmem>>, vector<1x1x1x128xf32>,
    return
  }
  func.func @transform_0(%arg0: i32, %arg1: i32) -> (i32, i32, i32) {
    %c0_i32 = arith.constant 0 : i32
    %c0_i32_0 = arith.constant 0 : i32
    return %arg0, %arg1, %c0_i32 : i32, i32, i32
  }
  func.func @transform_1(%arg0: i32, %arg1: i32) -> (i32, i32, i32) {
    %c0_i32 = arith.constant 0 : i32
    %c0_i32_0 = arith.constant 0 : i32
    %c0_i32_1 = arith.constant 0 : i32
    return %arg0, %c0_i32, %c0_i32_0 : i32, i32, i32
  }
  func.func @transform_2(%arg0: i32, %arg1: i32) -> (i32, i32, i32) {
    %c0_i32 = arith.constant 0 : i32
    %c0_i32_0 = arith.constant 0 : i32
    return %arg0, %arg1, %c0_i32 : i32, i32, i32
  }
  func.func @transform_3(%arg0: i32, %arg1: i32) -> (i32, i32, i32, i32) {
    %c0_i32 = arith.constant 0 : i32
    %c0_i32_0 = arith.constant 0 : i32
    %c0_i32_1 = arith.constant 0 : i32
    return %arg0, %arg1, %c0_i32, %c0_i32_0 : i32, i32, i32, i32
  }
  func.func @transform_4(%arg0: i32, %arg1: i32) -> (i32, i32, i32, i32) {
    %c0_i32 = arith.constant 0 : i32
    %c0_i32_0 = arith.constant 0 : i32
    %c0_i32_1 = arith.constant 0 : i32
    return %arg0, %arg1, %c0_i32, %c0_i32_0 : i32, i32, i32, i32
  }
}

module attributes {stable_mosaic.version = 11 : i64} {
  func.func @_scale_act_kernel(%arg0: i32, %arg1: i32, %arg2: memref<1x512x128xbf16, #tpu.memory_space<vmem>>, %arg3: memref<1x1x128xf32, #tpu.memory_space<vmem>>, %arg4: memref<1x1x128xf32, #tpu.memory_space<vmem>>, %arg5: memref<1x512x128xbf16, #tpu.memory_space<vmem>>) attributes {dimension_semantics = [#tpu.dimension_semantics<parallel>, #tpu.dimension_semantics<parallel>], iteration_bounds = array<i64: 4, 1>, scalar_prefetch = 0 : i64, scratch_operands = 0 : i64, tpu.core_type = #tpu.core_type<tc>, window_params = [{transform_indices = @transform_0, window_bounds = array<i64: 1, 512, 128>}, {pipeline_mode = #tpu.pipeline_mode<synchronous>, transform_indices = @transform_1, window_bounds = array<i64: 1, 1, 128>}, {pipeline_mode = #tpu.pipeline_mode<synchronous>, transform_indices = @transform_2, window_bounds = array<i64: 1, 1, 128>}, {transform_indices = @transform_3, window_bounds = array<i64: 1, 512, 128>}]} {
    %c0 = arith.constant 0 : index
    %c0_0 = arith.constant 0 : index
    %c0_1 = arith.constant 0 : index
    %0 = vector.load %arg2[%c0, %c0_0, %c0_1] : memref<1x512x128xbf16, #tpu.memory_space<vmem>>, vector<1x512x128xbf16>
    %1 = vector.shape_cast %0 : vector<1x512x128xbf16> to vector<512x128xbf16>
    %2 = arith.extf %1 : vector<512x128xbf16> to vector<512x128xf32>
    %c0_2 = arith.constant 0 : index
    %c0_3 = arith.constant 0 : index
    %c0_4 = arith.constant 0 : index
    %3 = vector.load %arg3[%c0_2, %c0_3, %c0_4] : memref<1x1x128xf32, #tpu.memory_space<vmem>>, vector<1x1x128xf32>
    %4 = vector.shape_cast %3 : vector<1x1x128xf32> to vector<1x128xf32>
    %5 = vector.broadcast %4 : vector<1x128xf32> to vector<512x128xf32>
    %6 = arith.mulf %2, %5 : vector<512x128xf32>
    %c0_5 = arith.constant 0 : index
    %c0_6 = arith.constant 0 : index
    %c0_7 = arith.constant 0 : index
    %7 = vector.load %arg4[%c0_5, %c0_6, %c0_7] : memref<1x1x128xf32, #tpu.memory_space<vmem>>, vector<1x1x128xf32>
    %8 = vector.shape_cast %7 : vector<1x1x128xf32> to vector<1x128xf32>
    %9 = vector.broadcast %8 : vector<1x128xf32> to vector<512x128xf32>
    %10 = arith.addf %6, %9 : vector<512x128xf32>
    %cst = arith.constant 0.000000e+00 : f32
    %11 = vector.broadcast %cst : f32 to vector<512x128xf32>
    %12 = arith.maximumf %10, %11 : vector<512x128xf32>
    %13 = arith.truncf %12 : vector<512x128xf32> to vector<512x128xbf16>
    %c0_8 = arith.constant 0 : index
    %c0_9 = arith.constant 0 : index
    %c0_10 = arith.constant 0 : index
    %14 = vector.load %arg5[%c0_8, %c0_9, %c0_10] : memref<1x512x128xbf16, #tpu.memory_space<vmem>>, vector<1x512x128xbf16>
    %15 = vector.shape_cast %14 : vector<1x512x128xbf16> to vector<512x128xbf16>
    %16 = vector.shape_cast %13 : vector<512x128xbf16> to vector<1x512x128xbf16>
    tpu.vector_store %arg5[%c0_8, %c0_9, %c0_10], %16 {strides = array<i32>} : memref<1x512x128xbf16, #tpu.memory_space<vmem>>, vector<1x512x128xbf16>,
    return
  }
  func.func @transform_0(%arg0: i32, %arg1: i32) -> (i32, i32, i32) {
    %c0_i32 = arith.constant 0 : i32
    %c0_i32_0 = arith.constant 0 : i32
    return %arg0, %arg1, %c0_i32 : i32, i32, i32
  }
  func.func @transform_1(%arg0: i32, %arg1: i32) -> (i32, i32, i32) {
    %c0_i32 = arith.constant 0 : i32
    %c0_i32_0 = arith.constant 0 : i32
    %c0_i32_1 = arith.constant 0 : i32
    %c0_i32_2 = arith.constant 0 : i32
    return %c0_i32, %c0_i32_0, %c0_i32_1 : i32, i32, i32
  }
  func.func @transform_2(%arg0: i32, %arg1: i32) -> (i32, i32, i32) {
    %c0_i32 = arith.constant 0 : i32
    %c0_i32_0 = arith.constant 0 : i32
    %c0_i32_1 = arith.constant 0 : i32
    %c0_i32_2 = arith.constant 0 : i32
    return %c0_i32, %c0_i32_0, %c0_i32_1 : i32, i32, i32
  }
  func.func @transform_3(%arg0: i32, %arg1: i32) -> (i32, i32, i32) {
    %c0_i32 = arith.constant 0 : i32
    %c0_i32_0 = arith.constant 0 : i32
    return %arg0, %arg1, %c0_i32 : i32, i32, i32
  }
}

module attributes {stable_mosaic.version = 11 : i64} {
  func.func @_gemm_bias_act_kernel(%arg0: i32, %arg1: i32, %arg2: memref<1x2048x64xbf16, #tpu.memory_space<vmem>>, %arg3: memref<1x64x128xbf16, #tpu.memory_space<vmem>>, %arg4: memref<1x1x128xf32, #tpu.memory_space<vmem>>, %arg5: memref<1x2048x128xbf16, #tpu.memory_space<vmem>>) attributes {dimension_semantics = [#tpu.dimension_semantics<parallel>, #tpu.dimension_semantics<parallel>], iteration_bounds = array<i64: 4, 1>, scalar_prefetch = 0 : i64, scratch_operands = 0 : i64, tpu.core_type = #tpu.core_type<tc>, window_params = [{transform_indices = @transform_0, window_bounds = array<i64: 1, 2048, 64>}, {transform_indices = @transform_1, window_bounds = array<i64: 1, 64, 128>}, {pipeline_mode = #tpu.pipeline_mode<synchronous>, transform_indices = @transform_2, window_bounds = array<i64: 1, 1, 128>}, {transform_indices = @transform_3, window_bounds = array<i64: 1, 2048, 128>}]} {
    %c0 = arith.constant 0 : index
    %c0_0 = arith.constant 0 : index
    %c0_1 = arith.constant 0 : index
    %0 = vector.load %arg2[%c0, %c0_0, %c0_1] : memref<1x2048x64xbf16, #tpu.memory_space<vmem>>, vector<1x2048x64xbf16>
    %1 = vector.shape_cast %0 : vector<1x2048x64xbf16> to vector<2048x64xbf16>
    %c0_2 = arith.constant 0 : index
    %c0_3 = arith.constant 0 : index
    %c0_4 = arith.constant 0 : index
    %2 = vector.load %arg3[%c0_2, %c0_3, %c0_4] : memref<1x64x128xbf16, #tpu.memory_space<vmem>>, vector<1x64x128xbf16>
    %3 = vector.shape_cast %2 : vector<1x64x128xbf16> to vector<64x128xbf16>
    %cst = arith.constant dense<0.000000e+00> : vector<2048x128xf32>
    %4 = tpu.matmul %1, %3, %cst {dimension_numbers = #tpu.dot_dimension_numbers<[1], [0], [0], [1], [0, 0, 1, 1], [], []>} : vector<2048x64xbf16>, vector<64x128xbf16>, vector<2048x128xf32> -> vector<2048x128xf32>
    %c0_5 = arith.constant 0 : index
    %c0_6 = arith.constant 0 : index
    %c0_7 = arith.constant 0 : index
    %5 = vector.load %arg4[%c0_5, %c0_6, %c0_7] : memref<1x1x128xf32, #tpu.memory_space<vmem>>, vector<1x1x128xf32>
    %6 = vector.shape_cast %5 : vector<1x1x128xf32> to vector<1x128xf32>
    %7 = vector.broadcast %6 : vector<1x128xf32> to vector<2048x128xf32>
    %8 = arith.addf %4, %7 : vector<2048x128xf32>
    %9 = math.tanh %8 : vector<2048x128xf32>
    %10 = arith.truncf %9 : vector<2048x128xf32> to vector<2048x128xbf16>
    %c0_8 = arith.constant 0 : index
    %c0_9 = arith.constant 0 : index
    %c0_10 = arith.constant 0 : index
    %11 = vector.load %arg5[%c0_8, %c0_9, %c0_10] : memref<1x2048x128xbf16, #tpu.memory_space<vmem>>, vector<1x2048x128xbf16>
    %12 = vector.shape_cast %11 : vector<1x2048x128xbf16> to vector<2048x128xbf16>
    %13 = vector.shape_cast %10 : vector<2048x128xbf16> to vector<1x2048x128xbf16>
    tpu.vector_store %arg5[%c0_8, %c0_9, %c0_10], %13 {strides = array<i32>} : memref<1x2048x128xbf16, #tpu.memory_space<vmem>>, vector<1x2048x128xbf16>,
    return
  }
  func.func @transform_0(%arg0: i32, %arg1: i32) -> (i32, i32, i32) {
    %c0_i32 = arith.constant 0 : i32
    %c0_i32_0 = arith.constant 0 : i32
    return %arg0, %arg1, %c0_i32 : i32, i32, i32
  }
  func.func @transform_1(%arg0: i32, %arg1: i32) -> (i32, i32, i32) {
    %c0_i32 = arith.constant 0 : i32
    %c0_i32_0 = arith.constant 0 : i32
    %c0_i32_1 = arith.constant 0 : i32
    return %arg0, %c0_i32, %c0_i32_0 : i32, i32, i32
  }
  func.func @transform_2(%arg0: i32, %arg1: i32) -> (i32, i32, i32) {
    %c0_i32 = arith.constant 0 : i32
    %c0_i32_0 = arith.constant 0 : i32
    %c0_i32_1 = arith.constant 0 : i32
    %c0_i32_2 = arith.constant 0 : i32
    return %c0_i32, %c0_i32_0, %c0_i32_1 : i32, i32, i32
  }
  func.func @transform_3(%arg0: i32, %arg1: i32) -> (i32, i32, i32) {
    %c0_i32 = arith.constant 0 : i32
    %c0_i32_0 = arith.constant 0 : i32
    return %arg0, %arg1, %c0_i32 : i32, i32, i32
  }
}

</mosaic_0001>

<bundles_post_ra>
// kernel: generator_forward.9
= control target key start
LH: loop header
LB: loop body
LE: loop exit
PB: predicated region body
PF: predicated region fallthrough
CT: control target
= control target key end

     0   :  { %10 = vsyncpa [#allocation3], 0  ;;  %s889_s0 = inlined_call_operand.vmem [shape: bf16[4,16,64], index: 0, kind: input, shape index: {}]   ;;  %s890_s1 = inlined_call_operand.hbm [shape: bf16[4,64,128], index: 1, kind: input, shape index: {}]   ;;  %s891_s2 = inlined_call_operand.vmem [shape: bf16[4,16,128], index: 2, kind: output, shape index: {0}]   ;;  %s892_s3 = inlined_call_operand.vmem [shape: f32[4,1,1,128], index: 3, kind: output, shape index: {1}]   ;;  %s893_s4 = inlined_call_operand.vmem [shape: f32[4,1,1,128], index: 4, kind: output, shape index: {2}]  }
   0x1   :  { %12 = vsyncpa [#allocation3 + $0x1], 0  ;;  %s787_s15 = smov 0   ;;  %s789_s16 = smov 0  }
   0x2   :  { %s791_s17 = smov 0   ;;  %s793_s18 = smov 0  }
   0x3   :  { %s795_s19 = smov 0   ;;  %s797_s20 = smov 0  }
   0x4 LB: > { %s572_s21 = sadd.s32 4294967295, %s758_s20   ;;  %s30_s22 = sadd.s32 1, %s754_s19  ;;  %s758_s20 = sphi %s797_s20, %s18_s20   ;;  %s754_s19 = sphi %s795_s19, %s900_s19   ;;  %s750_s18 = sphi %s793_s18, %s899_s18   ;;  %s746_s17 = sphi %s791_s17, %s898_s17   ;;  %s742_s16 = sphi %s789_s16, %s897_s16   ;;  %s738_s15 = sphi %s787_s15, %s896_s15  }
   0x5   : > { %p32_p0 = scmp.ge.s32.totalorder %s30_s22, 4  ;;  %s65_s23 = sadd.s32 1, %s746_s17 }
   0x6   : > { %p72_p1 = scmp.ne.s32.totalorder %s746_s17, %s742_s16  ;;  %p73_p2 = scmp.eq.s32.totalorder %s758_s20, 0 }
   0x7   : > { %s902_s22 = smov (%p32_p0, %s30_s22), 0  ;;  %p78_p4 = scmp.ne.s32.totalorder %s742_s16, %s738_s15 }
   0x8   : > { %p823_p3 = por %p73_p2, %p72_p1  ;;  %s62_s25 = ssub.s32 %s754_s19, %s902_s22 }
   0x9   : > { %p79_p5 = scmp.eq.s32.totalorder %s572_s21, 0  ;;  %p63_p6 = scmp.eq.s32.totalorder %s62_s25, 0 }
   0xa   : > { %p627_p8 = scmp.lt.s32.totalorder %s758_s20, 4  ;;  %s199_s28 = sand.u32 1, %s746_s17  }
   0xb   : > { %p830_p7 = por %p79_p5, %p78_p4  ;;  %s608_s29 = sshll.u32 %s754_s19, 5 }
   0xc   : > { %s836_s27 = scalar_select %p63_p6, %s746_s17, %s65_s23  }
   0xd   : > { %s576_s30 = sshll.u32 %s199_s28, 5  ;;  %s208_s7 = scalar_lea.hbm %s890_s1, %s608_s29 }
   0xe   : > { %s209_s8 = sshll.u32 %s208_s7, 4  ;;  %s203_s9 = scalar_lea.vmem [#allocation2], %s576_s30  ;;  %s210_s8 = int_to_ptr.hbm [resolvable:$true] %s209_s8 }
   0xf   : > { %s211_s10 = sshll.u32 %s203_s9, 4  ;;  %p624_p9 = pnand %p627_p8, %p823_p3  ;;  %s212_s10 = int_to_ptr.vmem [resolvable:$true] %s211_s10 }
  0x10   : > { %p579_p10 = scmp.ge.s32.totalorder %s758_s20, 1  ;;  %p219_p11 = scmp.lt.s32.totalorder %s758_s20, 5 }
  0x11   : > { %s200_s11 = scalar_lea.sflag [#allocation3], %s199_s28  ;;  %s760_s12 = smov 64  }
  0x12   : > { %s761_s13 = smov 4   ;;  %p220_p12 = pnand %p579_p10, %p219_p11 }
  0x13   : > { %626 = dma.hbm_to_vmem [thread:$0]  (!%p624_p9), %s210_s8, 512, %s212_s10, %s200_s11, %s760_s12, %s760_s12, %s761_s13  }
  0x14   : > { %223 = sbr.rel (%p220_p12) target bundleno = 193 (0xc1), region = 28  ;;  %s225_s14 = sand.u32 (!%p220_p12), 1, %s742_s16  }
  0x15   : > { %s580_s15 = sshll.u32 (!%p220_p12), %s225_s14, 5  ;;  %s226_s21 = scalar_lea.sflag (!%p220_p12), [#allocation3], %s225_s14 }
  0x16   : > { %s229_s23 = scalar_lea.vmem (!%p220_p12), [#allocation2], %s580_s15 }
  0x19   : > { %733 = dma.done.wait (%p830_p7), %s226_s21, 512  }
  0x1a   : > { %735 = vsyncadd (%p830_p7), %s226_s21, 4294966784  ;;  %p281_p13 = scmp.lt.s32.totalorder %s750_s18, 3  ;;  %v615_v0 = vld [vmem:[%s229_s23 + $0x18] sm:$0xff]  ;;  %v614_v1 = vld [vmem:[%s229_s23 + $0x10] sm:$0xff]  ;;  %vm352_vm0 = vcmask 523264  }
  0x1b   : > { %360 = vmatpush.bf16.msra.mxu0 %v615_v0  ;;  %v613_v2 = vld [vmem:[%s229_s23 + $0x8] sm:$0xff]  ;;  %v612_v3 = vld [vmem:[%s229_s23] sm:$0xff] }
  0x1c   : > { %s904_s18 = smov (!%p281_p13, %s750_s18), 3 }
  0x1d   : > { %s609_s24 = sshll.u32 %s904_s18, 3  ;;  %s305_s8 = scalar_lea.vmem %s892_s3, %s904_s18 }
  0x1e   : > { %s288_s29 = scalar_lea.vmem %s889_s0, %s609_s24  ;;  %s298_s5 = scalar_lea.vmem %s891_s2, %s609_s24 }
  0x1f   : > { %361 = vmatpush.bf16.msra.mxu0 %v614_v1  ;;  %v611_v4 = vld [vmem:[%s288_s29] sm:$0xff]  ;;  %s311_s11 = scalar_lea.vmem %s893_s4, %s904_s18 }
  0x23   : > { %362 = vmatpush.bf16.msra.mxu0 %v613_v2 }
  0x27   : > { %363 = vmatpush.bf16.msra.mxu0 %v612_v3 }
  0x2a   : > { %605 = vmatmul.msk.bf16.vlgmr.msra.gmra.mxu0 %vm352_vm0, %v611_v4 }
  0xa7   : > { %v365_v5 = vpop.f32.mrf.mxu0 }
  0xa8   : > { %v382_v7 = vmul.f32 %v365_v5, %v365_v5 }
  0xaf   : > { %v367_v6 = vpop.f32.mrf.mxu0 }
  0xb0   : > { %v619_v8 = vpack.c.bf16 %v367_v6, %v365_v5  ;;  %v374_v9 = vadd.f32 %v367_v6, %v365_v5  ;;  %v383_v10 = vmul.f32 %v367_v6, %v367_v6 }
  0xb2   : > { %620 = vst [vmem:[%s298_s5] sm:$0xff] %v619_v8   ;;  %v375_v11 = vrot.slane %v374_v9, 4  ;;  %v384_v12 = vadd.f32 %v383_v10, %v382_v7 }
  0xb4   : > { %v376_v13 = vadd.f32 %v375_v11, %v374_v9  ;;  %v385_v14 = vrot.slane %v384_v12, 4 }
  0xb6   : > { %v377_v15 = vrot.slane %v376_v13, 2  ;;  %v386_v16 = vadd.f32 %v385_v14, %v384_v12 }
  0xb8   : > { %v378_v17 = vadd.f32 %v377_v15, %v376_v13  ;;  %v387_v18 = vrot.slane %v386_v16, 2 }
  0xba   : > { %v379_v19 = vrot.slane %v378_v17, 1  ;;  %v388_v20 = vadd.f32 %v387_v18, %v386_v16 }
  0xbc   : > { %v380_v21 = vadd.f32 %v379_v19, %v378_v17  ;;  %v389_v22 = vrot.slane %v388_v20, 1 }
  0xbe   : > { %381 = vst [vmem:[%s305_s8] sm:$0x1] %v380_v21  ;;  %v390_v23 = vadd.f32 %v389_v22, %v388_v20 }
  0xc0   : > { %391 = vst [vmem:[%s311_s11] sm:$0x1] %v390_v23 }
  0xc1 PF: > { %s18_s20 = sadd.s32 1, %s758_s20   ;;  %s896_s15 = smov %s742_s16 }
  0xc2   : > { %p15_p0 = scmp.ge.s32.totalorder %s18_s20, 6   ;;  %s897_s16 = smov %s746_s17 }
  0xc3   : > { %s898_s17 = smov %s836_s27  ;;  %s899_s18 = smov %s754_s19 }
  0xc4   : > { %s900_s19 = smov %s902_s22  ;;  %17 = sbr.rel (!%p15_p0) target bundleno = 4 (0x4), region = 95 }
  0xc9   :  { %458 = vsyncpa [#allocation3], 1 }
  0xca   :  { %460 = vsyncpa [#allocation3 + $0x1], 1 }

// kernel: generator_forward.10
= control target key start
LH: loop header
LB: loop body
LE: loop exit
PB: predicated region body
PF: predicated region fallthrough
CT: control target
= control target key end

     0   :  { %s411_s12 = smov 0   ;;  %s413_s13 = smov 0   ;;  %s447_s0 = inlined_call_operand.vmem [shape: bf16[4,16,128], index: 0, kind: input, shape index: {}]   ;;  %s448_s1 = inlined_call_operand.vmem [shape: f32[1,1,128], index: 1, kind: input, shape index: {}]   ;;  %s449_s2 = inlined_call_operand.vmem [shape: f32[1,1,128], index: 2, kind: input, shape index: {}]   ;;  %s450_s3 = inlined_call_operand.vmem [shape: bf16[4,16,128], index: 3, kind: output, shape index: {}]  }
   0x1   :  { %s415_s14 = smov 0  }
   0x2 LB: > { %s25_s15 = sadd.s32 1, %s385_s13  ;;  %p323_p0 = scmp.ge.s32.totalorder %s389_s14, 1  ;;  %s389_s14 = sphi %s415_s14, %s13_s14   ;;  %s385_s13 = sphi %s413_s13, %s452_s13   ;;  %s381_s12 = sphi %s411_s12, %s451_s12  }
   0x3   : > { %p27_p1 = scmp.ge.s32.totalorder %s25_s15, 4  ;;  %p158_p2 = scmp.lt.s32.totalorder %s389_s14, 5 }
   0x5   : > { %s454_s15 = smov (%p27_p1, %s25_s15), 0  ;;  %p159_p3 = pnand %p323_p0, %p158_p2 }
   0x6   : > { %p191_p4 = scmp.lt.s32.totalorder (!%p159_p3), %s381_s12, 3 }
   0x7   : > { %162 = sbr.rel (%p159_p3) target bundleno = 27 (0x1b), region = 32 }
   0xc   : > { %s456_s12 = smov (!%p191_p4, %s381_s12), 3  ;;  %v365_v0 = vld [vmem:[%s448_s1] ss:$0 sm:$0xff] }
   0xd   : > { %s330_s16 = sshll.u32 %s456_s12, 3  ;;  %v366_v4 = vld [vmem:[%s449_s2] ss:$0 sm:$0xff] }
   0xe   : > { %s198_s19 = scalar_lea.vmem %s447_s0, %s330_s16  ;;  %s208_s26 = scalar_lea.vmem %s450_s3, %s330_s16 }
   0xf   : > { %v333_v1 = vld [vmem:[%s198_s19] sm:$0xff]  }
  0x10   : > { %v334_v2 = vunpack.c.l.bf16 %v333_v1  ;;  %v335_v3 = vunpack.c.h.bf16 %v333_v1 }
  0x12   : > { %v218_v5 = vmul.f32 %v365_v0, %v334_v2  ;;  %v219_v6 = vmul.f32 %v365_v0, %v335_v3 }
  0x14   : > { %v224_v7 = vadd.f32 %v366_v4, %v218_v5  ;;  %v225_v8 = vadd.f32 %v366_v4, %v219_v6 }
  0x16   : > { %v226_v9 = vmax.f32 %v224_v7, 0.0  ;;  %v227_v10 = vmax.f32 %v225_v8, 0.0 }
  0x18   : > { %v339_v11 = vpack.c.bf16 %v227_v10, %v226_v9 }
  0x1a   : > { %340 = vst [vmem:[%s208_s26] sm:$0xff] %v339_v11  }
  0x1b PF: > { %s13_s14 = sadd.s32 1, %s389_s14   ;;  %s451_s12 = smov %s385_s13 }
  0x1c   : > { %p10_p5 = scmp.ge.s32.totalorder %s13_s14, 6   ;;  %s452_s13 = smov %s454_s15 }
  0x1e   :  { %12 = sbr.rel (!%p10_p5) target bundleno = 2 (0x2), region = 62 }

// kernel: generator_forward.11
= control target key start
LH: loop header
LB: loop body
LE: loop exit
PB: predicated region body
PF: predicated region fallthrough
CT: control target
= control target key end

     0   :  { %10 = vsyncpa [#allocation3], 0  ;;  %s1460_s0 = inlined_call_operand.vmem [shape: bf16[4,32,512], index: 0, kind: input, shape index: {}]   ;;  %s1461_s1 = inlined_call_operand.hbm [shape: bf16[4,512,128], index: 1, kind: input, shape index: {}]   ;;  %s1462_s2 = inlined_call_operand.vmem [shape: bf16[4,32,128], index: 2, kind: output, shape index: {0}]   ;;  %s1463_s3 = inlined_call_operand.vmem [shape: f32[4,1,1,128], index: 3, kind: output, shape index: {1}]   ;;  %s1464_s4 = inlined_call_operand.vmem [shape: f32[4,1,1,128], index: 4, kind: output, shape index: {2}]  }
   0x1   :  { %12 = vsyncpa [#allocation3 + $0x1], 0  ;;  %s1305_s15 = smov 0   ;;  %s1307_s16 = smov 0  }
   0x2   :  { %s1309_s17 = smov 0   ;;  %s1311_s18 = smov 0  }
   0x3   :  { %s1313_s19 = smov 0   ;;  %s1315_s20 = smov 0  }
   0x4 LB: > { %s910_s21 = sadd.s32 4294967295, %s1276_s20   ;;  %s30_s22 = sadd.s32 1, %s1272_s19  ;;  %s1276_s20 = sphi %s1315_s20, %s18_s20   ;;  %s1272_s19 = sphi %s1313_s19, %s1471_s19   ;;  %s1268_s18 = sphi %s1311_s18, %s1470_s18   ;;  %s1264_s17 = sphi %s1309_s17, %s1469_s17   ;;  %s1260_s16 = sphi %s1307_s16, %s1468_s16   ;;  %s1256_s15 = sphi %s1305_s15, %s1467_s15  }
   0x5   : > { %p32_p0 = scmp.ge.s32.totalorder %s30_s22, 4  ;;  %s65_s23 = sadd.s32 1, %s1264_s17 }
   0x6   : > { %p72_p1 = scmp.ne.s32.totalorder %s1264_s17, %s1260_s16  ;;  %p73_p2 = scmp.eq.s32.totalorder %s1276_s20, 0 }
   0x7   : > { %s1473_s22 = smov (%p32_p0, %s30_s22), 0  ;;  %p78_p4 = scmp.ne.s32.totalorder %s1260_s16, %s1256_s15 }
   0x8   : > { %p1341_p3 = por %p73_p2, %p72_p1  ;;  %s62_s25 = ssub.s32 %s1272_s19, %s1473_s22 }
   0x9   : > { %p79_p5 = scmp.eq.s32.totalorder %s910_s21, 0  ;;  %p63_p6 = scmp.eq.s32.totalorder %s62_s25, 0 }
   0xa   : > { %p1145_p8 = scmp.lt.s32.totalorder %s1276_s20, 4  ;;  %s200_s28 = sand.u32 1, %s1264_s17  }
   0xb   : > { %p1348_p7 = por %p79_p5, %p78_p4  ;;  %s1085_s29 = sshll.u32 %s1272_s19, 8 }
   0xc   : > { %s1354_s27 = scalar_select %p63_p6, %s1264_s17, %s65_s23  }
   0xd   : > { %s914_s30 = sshll.u32 %s200_s28, 8  ;;  %s209_s7 = scalar_lea.hbm %s1461_s1, %s1085_s29 }
   0xe   : > { %s210_s8 = sshll.u32 %s209_s7, 4  ;;  %s204_s9 = scalar_lea.vmem [#allocation2], %s914_s30  ;;  %s211_s8 = int_to_ptr.hbm [resolvable:$true] %s210_s8 }
   0xf   : > { %s212_s10 = sshll.u32 %s204_s9, 4  ;;  %p1142_p9 = pnand %p1145_p8, %p1341_p3  ;;  %s213_s10 = int_to_ptr.vmem [resolvable:$true] %s212_s10 }
  0x10   : > { %p917_p10 = scmp.ge.s32.totalorder %s1276_s20, 1  ;;  %p220_p11 = scmp.lt.s32.totalorder %s1276_s20, 5 }
  0x11   : > { %s201_s11 = scalar_lea.sflag [#allocation3], %s200_s28  ;;  %s1278_s12 = smov 64  }
  0x12   : > { %s1279_s13 = smov 4   ;;  %p221_p12 = pnand %p917_p10, %p220_p11 }
  0x13   : > { %1144 = dma.hbm_to_vmem [thread:$0]  (!%p1142_p9), %s211_s8, 4096, %s213_s10, %s201_s11, %s1278_s12, %s1278_s12, %s1279_s13  }
  0x14   : > { %224 = sbr.rel (%p221_p12) target bundleno = 237 (0xed), region = 28  ;;  %s226_s14 = sand.u32 (!%p221_p12), 1, %s1260_s16  }
  0x15   : > { %s918_s15 = sshll.u32 (!%p221_p12), %s226_s14, 8  ;;  %s227_s21 = scalar_lea.sflag (!%p221_p12), [#allocation3], %s226_s14 }
  0x16   : > { %s1366_s23 = scalar_lea.vmem (!%p221_p12), [#allocation2], %s918_s15 }
  0x19   : > { %1251 = dma.done.wait (%p1348_p7), %s227_s21, 4096  }
  0x1a   : > { %1253 = vsyncadd (%p1348_p7), %s227_s21, 4294963200  ;;  %v1103_v0 = vld [vmem:[%s1366_s23 + $0x38] sm:$0xff]  ;;  %v1102_v4 = vld [vmem:[%s1366_s23 + $0x30] sm:$0xff]  ;;  %p283_p13 = scmp.lt.s32.totalorder %s1268_s18, 3 }
  0x1b   : > { %v1111_v1 = vld [vmem:[%s1366_s23 + $0x78] sm:$0xff]  ;;  %619 = vmatpush.bf16.msra.mxu0 %v1103_v0  ;;  %v1110_v5 = vld [vmem:[%s1366_s23 + $0x70] sm:$0xff]  ;;  %v1101_v8 = vld [vmem:[%s1366_s23 + $0x28] sm:$0xff] }
  0x1c   : > { %v1119_v2 = vld [vmem:[%s1366_s23 + $0xb8] sm:$0xff]  ;;  %638 = vmatpush.bf16.msra.mxu1 %v1111_v1  ;;  %v1118_v6 = vld [vmem:[%s1366_s23 + $0xb0] sm:$0xff]  ;;  %v1109_v9 = vld [vmem:[%s1366_s23 + $0x68] sm:$0xff]  ;;  %s1475_s18 = smov (!%p283_p13, %s1268_s18), 3 }
  0x1d   : > { %v1127_v3 = vld [vmem:[%s1366_s23 + $0xf8] sm:$0xff]  ;;  %657 = vmatpush.bf16.msra.mxu2 %v1119_v2  ;;  %v1126_v7 = vld [vmem:[%s1366_s23 + $0xf0] sm:$0xff]  ;;  %v1117_v10 = vld [vmem:[%s1366_s23 + $0xa8] sm:$0xff]  ;;  %s1086_s24 = sshll.u32 %s1475_s18, 6  ;;  %s1087_s29 = sshll.u32 %s1475_s18, 4 }
  0x1e   : > { %676 = vmatpush.bf16.msra.mxu3 %v1127_v3  ;;  %v1125_v11 = vld [vmem:[%s1366_s23 + $0xe8] sm:$0xff]  ;;  %v1100_v12 = vld [vmem:[%s1366_s23 + $0x20] sm:$0xff]  ;;  %v1099_v16 = vld [vmem:[%s1366_s23 + $0x18] sm:$0xff]  ;;  %s1406_s28 = scalar_lea.vmem %s1460_s0, %s1086_s24  ;;  %s301_s6 = scalar_lea.vmem %s1462_s2, %s1087_s29 }
  0x1f   : > { %620 = vmatpush.bf16.msra.mxu0 %v1102_v4  ;;  %v1108_v13 = vld [vmem:[%s1366_s23 + $0x60] sm:$0xff]  ;;  %v1107_v17 = vld [vmem:[%s1366_s23 + $0x58] sm:$0xff]  ;;  %v1098_v20 = vld [vmem:[%s1366_s23 + $0x10] sm:$0xff]  ;;  %s308_s9 = scalar_lea.vmem %s1463_s3, %s1475_s18  ;;  %s314_s12 = scalar_lea.vmem %s1464_s4, %s1475_s18 }
  0x20   : > { %639 = vmatpush.bf16.msra.mxu1 %v1110_v5  ;;  %v1116_v14 = vld [vmem:[%s1366_s23 + $0xa0] sm:$0xff]  ;;  %v1115_v18 = vld [vmem:[%s1366_s23 + $0x98] sm:$0xff]  ;;  %v1106_v21 = vld [vmem:[%s1366_s23 + $0x50] sm:$0xff] }
  0x21   : > { %658 = vmatpush.bf16.msra.mxu2 %v1118_v6  ;;  %v1124_v15 = vld [vmem:[%s1366_s23 + $0xe0] sm:$0xff]  ;;  %v1123_v19 = vld [vmem:[%s1366_s23 + $0xd8] sm:$0xff]  ;;  %v1114_v22 = vld [vmem:[%s1366_s23 + $0x90] sm:$0xff] }
  0x22   : > { %677 = vmatpush.bf16.msra.mxu3 %v1126_v7  ;;  %v1122_v23 = vld [vmem:[%s1366_s23 + $0xd0] sm:$0xff]  ;;  %v1097_v24 = vld [vmem:[%s1366_s23 + $0x8] sm:$0xff]  ;;  %v1096_v28 = vld [vmem:[%s1366_s23] sm:$0xff] }
  0x23   : > { %621 = vmatpush.bf16.msra.mxu0 %v1101_v8  ;;  %v1105_v25 = vld [vmem:[%s1366_s23 + $0x48] sm:$0xff]  ;;  %v1104_v29 = vld [vmem:[%s1366_s23 + $0x40] sm:$0xff]  ;;  %v1090_v33 = vld [vmem:[%s1406_s28 + $0xc] sm:$0xf0] }
  0x24   : > { %640 = vmatpush.bf16.msra.mxu1 %v1109_v9  ;;  %v1113_v26 = vld [vmem:[%s1366_s23 + $0x88] sm:$0xff]  ;;  %v1112_v30 = vld [vmem:[%s1366_s23 + $0x80] sm:$0xff]  ;;  %v927_v35 = vld [vmem:[%s1406_s28 + $0x10] sm:$0xf0] }
  0x25   : > { %659 = vmatpush.bf16.msra.mxu2 %v1117_v10  ;;  %v1121_v27 = vld [vmem:[%s1366_s23 + $0xc8] sm:$0xff]  ;;  %v1120_v31 = vld [vmem:[%s1366_s23 + $0xc0] sm:$0xff]  ;;  %v1091_v37 = vld [vmem:[%s1406_s28 + $0x14] sm:$0xf0] }
  0x26   : > { %678 = vmatpush.bf16.msra.mxu3 %v1125_v11  ;;  %v925_v32 = vld [vmem:[%s1406_s28] sm:$0xf]  ;;  %v1088_v34 = vld [vmem:[%s1406_s28 + $0x4] sm:$0xf]  ;;  %v933_v36 = vld [vmem:[%s1406_s28 + $0x8] sm:$0xf] }
  0x27   : > { %622 = vmatpush.bf16.msra.mxu0 %v1100_v12  ;;  %v1089_v38 = vld [vmem:[%s1406_s28 + $0xc] sm:$0xf]  ;;  %v935_v39 = vld [vmem:[%s1406_s28 + $0x18] sm:$0xf0]  ;;  %v926_v40 = vor.u32 %v1090_v33, %v925_v32  ;;  %v930_v41 = vor.u32 %v1088_v34, %v927_v35  ;;  %v934_v42 = vor.u32 %v1091_v37, %v933_v36  ;;  %v941_v44 = vld [vmem:[%s1406_s28 + $0x20] sm:$0xf] }
  0x28   : > { %641 = vmatpush.bf16.msra.mxu1 %v1108_v13  ;;  %v938_v43 = vor.u32 %v1089_v38, %v935_v39  ;;  %v1094_v45 = vld [vmem:[%s1406_s28 + $0x2c] sm:$0xf0]  ;;  %v1092_v46 = vld [vmem:[%s1406_s28 + $0x24] sm:$0xf]  ;;  %v943_v47 = vld [vmem:[%s1406_s28 + $0x30] sm:$0xf0] }
  0x29   : > { %660 = vmatpush.bf16.msra.mxu2 %v1116_v14  ;;  %v949_v48 = vld [vmem:[%s1406_s28 + $0x28] sm:$0xf]  ;;  %v1095_v49 = vld [vmem:[%s1406_s28 + $0x34] sm:$0xf0]  ;;  %v1093_v50 = vld [vmem:[%s1406_s28 + $0x2c] sm:$0xf]  ;;  %v942_v52 = vor.u32 %v1094_v45, %v941_v44  ;;  %v946_v53 = vor.u32 %v1092_v46, %v943_v47 }
  0x2a   : > { %679 = vmatpush.bf16.msra.mxu3 %v1124_v15  ;;  %v951_v51 = vld [vmem:[%s1406_s28 + $0x38] sm:$0xf0]  ;;  %v950_v54 = vor.u32 %v1095_v49, %v949_v48 }
  0x2b   : > { %623 = vmatpush.bf16.msra.mxu0 %v1099_v16  ;;  %v954_v55 = vor.u32 %v1093_v50, %v951_v51 }
  0x2c   : > { %642 = vmatpush.bf16.msra.mxu1 %v1107_v17 }
  0x2d   : > { %661 = vmatpush.bf16.msra.mxu2 %v1115_v18 }
  0x2e   : > { %680 = vmatpush.bf16.msra.mxu3 %v1123_v19 }
  0x2f   : > { %624 = vmatpush.bf16.msra.mxu0 %v1098_v20 }
  0x30   : > { %643 = vmatpush.bf16.msra.mxu1 %v1106_v21 }
  0x31   : > { %662 = vmatpush.bf16.msra.mxu2 %v1114_v22 }
  0x32   : > { %681 = vmatpush.bf16.msra.mxu3 %v1122_v23 }
  0x33   : > { %625 = vmatpush.bf16.msra.mxu0 %v1097_v24 }
  0x34   : > { %644 = vmatpush.bf16.msra.mxu1 %v1105_v25 }
  0x35   : > { %663 = vmatpush.bf16.msra.mxu2 %v1113_v26 }
  0x36   : > { %682 = vmatpush.bf16.msra.mxu3 %v1121_v27 }
  0x37   : > { %626 = vmatpush.bf16.msra.mxu0 %v1096_v28 }
  0x38   : > { %645 = vmatpush.bf16.msra.mxu1 %v1104_v29 }
  0x39   : > { %664 = vmatpush.bf16.msra.mxu2 %v1112_v30 }
  0x3a   : > { %683 = vmatpush.bf16.msra.mxu3 %v1120_v31  ;;  %627 = vmatmul.bf16.vlgmr.msra.gmra.mxu0 %v926_v40 }
  0x3b   : > { %646 = vmatmul.bf16.vlgmr.msra.gmra.mxu1 %v930_v41 }
  0x3c   : > { %665 = vmatmul.bf16.vlgmr.msra.gmra.mxu2 %v934_v42 }
  0x3d   : > { %684 = vmatmul.bf16.vlgmr.msra.gmra.mxu3 %v938_v43 }
  0x4a   : > { %632 = vmatmul.bf16.gmra.mxu0 %v942_v52 }
  0x4b   : > { %651 = vmatmul.bf16.gmra.mxu1 %v946_v53 }
  0x4c   : > { %670 = vmatmul.bf16.gmra.mxu2 %v950_v54 }
  0x4d   : > { %689 = vmatmul.bf16.gmra.mxu3 %v954_v55 }
  0xb7   : > { %v628_v56 = vpop.f32.mrf.mxu0 }
  0xb8   : > { %v647_v57 = vpop.f32.mrf.mxu1 }
  0xb9   : > { %v648_v62 = vadd.f32 %v647_v57, %v628_v56 }
  0xbf   : > { %v666_v58 = vpop.f32.mrf.mxu2  ;;  %v630_v60 = vpop.f32.mrf.mxu0 }
  0xc0   : > { %v685_v59 = vpop.f32.mrf.mxu3  ;;  %v649_v61 = vpop.f32.mrf.mxu1  ;;  %v667_v63 = vadd.f32 %v666_v58, %v648_v62 }
  0xc1   : > { %v650_v0 = vadd.f32 %v649_v61, %v630_v60 }
  0xc2   : > { %v686_v6 = vadd.f32 %v685_v59, %v667_v63 }
  0xc4   : > { %v713_v19 = vmul.f32 %v686_v6, %v686_v6 }
  0xc7   : > { %v668_v1 = vpop.f32.mrf.mxu2  ;;  %v633_v4 = vpop.f32.mrf.mxu0 }
  0xc8   : > { %v687_v2 = vpop.f32.mrf.mxu3  ;;  %v669_v3 = vadd.f32 %v668_v1, %v650_v0  ;;  %v652_v5 = vpop.f32.mrf.mxu1 }
  0xc9   : > { %v653_v9 = vadd.f32 %v652_v5, %v633_v4 }
  0xca   : > { %v688_v7 = vadd.f32 %v687_v2, %v669_v3 }
  0xcc   : > { %v1131_v8 = vpack.c.bf16 %v688_v7, %v686_v6  ;;  %v714_v16 = vmul.f32 %v688_v7, %v688_v7  ;;  %v703_v20 = vadd.f32 %v688_v7, %v686_v6 }
  0xce   : > { %1132 = vst [vmem:[%s301_s6] sm:$0xff] %v1131_v8   ;;  %v717_v24 = vadd.f32 %v714_v16, %v713_v19 }
  0xcf   : > { %v671_v10 = vpop.f32.mrf.mxu2  ;;  %v635_v13 = vpop.f32.mrf.mxu0 }
  0xd0   : > { %v690_v11 = vpop.f32.mrf.mxu3  ;;  %v672_v12 = vadd.f32 %v671_v10, %v653_v9  ;;  %v654_v14 = vpop.f32.mrf.mxu1 }
  0xd1   : > { %v655_v17 = vadd.f32 %v654_v14, %v635_v13 }
  0xd2   : > { %v691_v15 = vadd.f32 %v690_v11, %v672_v12 }
  0xd4   : > { %v715_v21 = vmul.f32 %v691_v15, %v691_v15  ;;  %v704_v25 = vadd.f32 %v703_v20, %v691_v15 }
  0xd6   : > { %v718_v27 = vadd.f32 %v717_v24, %v715_v21 }
  0xd7   : > { %v673_v18 = vpop.f32.mrf.mxu2 }
  0xd8   : > { %v674_v22 = vadd.f32 %v673_v18, %v655_v17  ;;  %v692_v23 = vpop.f32.mrf.mxu3 }
  0xda   : > { %v693_v26 = vadd.f32 %v692_v23, %v674_v22 }
  0xdc   : > { %v1136_v28 = vpack.c.bf16 %v693_v26, %v691_v15  ;;  %v705_v29 = vadd.f32 %v704_v25, %v693_v26  ;;  %v716_v30 = vmul.f32 %v693_v26, %v693_v26 }
  0xde   : > { %1138 = vst [vmem:[%s301_s6 + $0x8] sm:$0xff] %v1136_v28   ;;  %v706_v31 = vrot.slane %v705_v29, 4  ;;  %v719_v32 = vadd.f32 %v718_v27, %v716_v30 }
  0xe0   : > { %v707_v33 = vadd.f32 %v706_v31, %v705_v29  ;;  %v720_v34 = vrot.slane %v719_v32, 4 }
  0xe2   : > { %v708_v35 = vrot.slane %v707_v33, 2  ;;  %v721_v36 = vadd.f32 %v720_v34, %v719_v32 }
  0xe4   : > { %v709_v37 = vadd.f32 %v708_v35, %v707_v33  ;;  %v722_v38 = vrot.slane %v721_v36, 2 }
  0xe6   : > { %v710_v39 = vrot.slane %v709_v37, 1  ;;  %v723_v40 = vadd.f32 %v722_v38, %v721_v36 }
  0xe8   : > { %v711_v41 = vadd.f32 %v710_v39, %v709_v37  ;;  %v724_v42 = vrot.slane %v723_v40, 1 }
  0xea   : > { %712 = vst [vmem:[%s308_s9] sm:$0x1] %v711_v41  ;;  %v725_v43 = vadd.f32 %v724_v42, %v723_v40 }
  0xec   : > { %726 = vst [vmem:[%s314_s12] sm:$0x1] %v725_v43 }
  0xed PF: > { %s18_s20 = sadd.s32 1, %s1276_s20   ;;  %s1467_s15 = smov %s1260_s16 }
  0xee   : > { %p15_p0 = scmp.ge.s32.totalorder %s18_s20, 6   ;;  %s1468_s16 = smov %s1264_s17 }
  0xef   : > { %s1469_s17 = smov %s1354_s27  ;;  %s1470_s18 = smov %s1272_s19 }
  0xf0   : > { %s1471_s19 = smov %s1473_s22  ;;  %17 = sbr.rel (!%p15_p0) target bundleno = 4 (0x4), region = 95 }
  0xf5   :  { %793 = vsyncpa [#allocation3], 1 }
  0xf6   :  { %795 = vsyncpa [#allocation3 + $0x1], 1 }

// kernel: generator_forward.12
= control target key start
LH: loop header
LB: loop body
LE: loop exit
PB: predicated region body
PF: predicated region fallthrough
CT: control target
= control target key end

     0   :  { %s436_s12 = smov 0   ;;  %s438_s13 = smov 0   ;;  %s475_s0 = inlined_call_operand.vmem [shape: bf16[4,32,128], index: 0, kind: input, shape index: {}]   ;;  %s476_s1 = inlined_call_operand.vmem [shape: f32[1,1,128], index: 1, kind: input, shape index: {}]   ;;  %s477_s2 = inlined_call_operand.vmem [shape: f32[1,1,128], index: 2, kind: input, shape index: {}]   ;;  %s478_s3 = inlined_call_operand.vmem [shape: bf16[4,32,128], index: 3, kind: output, shape index: {}]  }
   0x1   :  { %s440_s14 = smov 0  }
   0x2 LB: > { %s25_s15 = sadd.s32 1, %s410_s13  ;;  %p337_p0 = scmp.ge.s32.totalorder %s414_s14, 1  ;;  %s414_s14 = sphi %s440_s14, %s13_s14   ;;  %s410_s13 = sphi %s438_s13, %s480_s13   ;;  %s406_s12 = sphi %s436_s12, %s479_s12  }
   0x3   : > { %p27_p1 = scmp.ge.s32.totalorder %s25_s15, 4  ;;  %p158_p2 = scmp.lt.s32.totalorder %s414_s14, 5 }
   0x5   : > { %s482_s15 = smov (%p27_p1, %s25_s15), 0  ;;  %p159_p3 = pnand %p337_p0, %p158_p2 }
   0x6   : > { %p191_p4 = scmp.lt.s32.totalorder (!%p159_p3), %s406_s12, 3 }
   0x7   : > { %162 = sbr.rel (%p159_p3) target bundleno = 28 (0x1c), region = 32 }
   0xc   : > { %s484_s12 = smov (!%p191_p4, %s406_s12), 3  ;;  %v390_v0 = vld [vmem:[%s476_s1] ss:$0 sm:$0xff] }
   0xd   : > { %s344_s16 = sshll.u32 %s484_s12, 4  ;;  %v391_v7 = vld [vmem:[%s477_s2] ss:$0 sm:$0xff] }
   0xe   : > { %s198_s19 = scalar_lea.vmem %s475_s0, %s344_s16  ;;  %s208_s26 = scalar_lea.vmem %s478_s3, %s344_s16 }
   0xf   : > { %v347_v1 = vld [vmem:[%s198_s19] sm:$0xff]   ;;  %v364_v2 = vld [vmem:[%s198_s19 + $0x8] sm:$0xff]  }
  0x10   : > { %v348_v3 = vunpack.c.l.bf16 %v347_v1  ;;  %v349_v4 = vunpack.c.h.bf16 %v347_v1  ;;  %v352_v5 = vunpack.c.l.bf16 %v364_v2  ;;  %v353_v6 = vunpack.c.h.bf16 %v364_v2 }
  0x12   : > { %v222_v8 = vmul.f32 %v390_v0, %v348_v3  ;;  %v223_v9 = vmul.f32 %v390_v0, %v349_v4  ;;  %v224_v10 = vmul.f32 %v390_v0, %v352_v5  ;;  %v225_v11 = vmul.f32 %v390_v0, %v353_v6 }
  0x14   : > { %v230_v12 = vadd.f32 %v391_v7, %v222_v8  ;;  %v231_v13 = vadd.f32 %v391_v7, %v223_v9  ;;  %v232_v14 = vadd.f32 %v391_v7, %v224_v10  ;;  %v233_v15 = vadd.f32 %v391_v7, %v225_v11 }
  0x16   : > { %v234_v16 = vmax.f32 %v230_v12, 0.0  ;;  %v235_v17 = vmax.f32 %v231_v13, 0.0  ;;  %v236_v18 = vmax.f32 %v232_v14, 0.0  ;;  %v237_v19 = vmax.f32 %v233_v15, 0.0 }
  0x18   : > { %v357_v20 = vpack.c.bf16 %v235_v17, %v234_v16  ;;  %v362_v21 = vpack.c.bf16 %v237_v19, %v236_v18 }
  0x1a   : > { %358 = vst [vmem:[%s208_s26] sm:$0xff] %v357_v20  }
  0x1b   : > { %365 = vst [vmem:[%s208_s26 + $0x8] sm:$0xff] %v362_v21  }
  0x1c PF: > { %s13_s14 = sadd.s32 1, %s414_s14   ;;  %s479_s12 = smov %s410_s13 }
  0x1d   : > { %p10_p5 = scmp.ge.s32.totalorder %s13_s14, 6   ;;  %s480_s13 = smov %s482_s15 }
  0x1f   :  { %12 = sbr.rel (!%p10_p5) target bundleno = 2 (0x2), region = 62 }

// kernel: generator_forward.14
= control target key start
LH: loop header
LB: loop body
LE: loop exit
PB: predicated region body
PF: predicated region fallthrough
CT: control target
= control target key end

     0   :  { %s586_s12 = smov 0   ;;  %s588_s13 = smov 0   ;;  %s688_s0 = inlined_call_operand.vmem [shape: bf16[4,128,128], index: 0, kind: input, shape index: {}]   ;;  %s689_s1 = inlined_call_operand.vmem [shape: f32[1,1,128], index: 1, kind: input, shape index: {}]   ;;  %s690_s2 = inlined_call_operand.vmem [shape: f32[1,1,128], index: 2, kind: input, shape index: {}]   ;;  %s691_s3 = inlined_call_operand.vmem [shape: bf16[4,128,128], index: 3, kind: output, shape index: {}]  }
   0x1   :  { %s590_s14 = smov 0  }
   0x2 LB: > { %s25_s15 = sadd.s32 1, %s560_s13  ;;  %p421_p0 = scmp.ge.s32.totalorder %s564_s14, 1  ;;  %s564_s14 = sphi %s590_s14, %s13_s14   ;;  %s560_s13 = sphi %s588_s13, %s693_s13   ;;  %s556_s12 = sphi %s586_s12, %s692_s12  }
   0x3   : > { %p27_p1 = scmp.ge.s32.totalorder %s25_s15, 4  ;;  %p158_p2 = scmp.lt.s32.totalorder %s564_s14, 5 }
   0x5   : > { %s695_s15 = smov (%p27_p1, %s25_s15), 0  ;;  %p159_p3 = pnand %p421_p0, %p158_p2 }
   0x6   : > { %p191_p4 = scmp.lt.s32.totalorder (!%p159_p3), %s556_s12, 3 }
   0x7   : > { %162 = sbr.rel (%p159_p3) target bundleno = 38 (0x26), region = 32 }
   0xc   : > { %s697_s12 = smov (!%p191_p4, %s556_s12), 3  ;;  %v617_v0 = vld [vmem:[%s689_s1] ss:$0 sm:$0xff] }
   0xd   : > { %s428_s16 = sshll.u32 %s697_s12, 6  ;;  %v625_v6 = vld [vmem:[%s690_s2] ss:$0 sm:$0xff] }
   0xe   : > { %s612_s19 = scalar_lea.vmem %s688_s0, %s428_s16  ;;  %s651_s26 = scalar_lea.vmem %s691_s3, %s428_s16 }
   0xf   : > { %v431_v1 = vld [vmem:[%s612_s19] sm:$0xff]   ;;  %v502_v2 = vld [vmem:[%s612_s19 + $0x8] sm:$0xff]   ;;  %v503_v3 = vld [vmem:[%s612_s19 + $0x10] sm:$0xff]  }
  0x10   : > { %v432_v4 = vunpack.c.l.bf16 %v431_v1  ;;  %v433_v5 = vunpack.c.h.bf16 %v431_v1  ;;  %v436_v7 = vunpack.c.l.bf16 %v502_v2  ;;  %v437_v8 = vunpack.c.h.bf16 %v502_v2  ;;  %v504_v9 = vld [vmem:[%s612_s19 + $0x18] sm:$0xff]   ;;  %v505_v30 = vld [vmem:[%s612_s19 + $0x20] sm:$0xff]   ;;  %v506_v35 = vld [vmem:[%s612_s19 + $0x28] sm:$0xff]  }
  0x11   : > { %v440_v10 = vunpack.c.l.bf16 %v503_v3  ;;  %v441_v11 = vunpack.c.h.bf16 %v503_v3  ;;  %v444_v12 = vunpack.c.l.bf16 %v504_v9  ;;  %v445_v13 = vunpack.c.h.bf16 %v504_v9  ;;  %v507_v40 = vld [vmem:[%s612_s19 + $0x30] sm:$0xff]   ;;  %v508_v45 = vld [vmem:[%s612_s19 + $0x38] sm:$0xff]  }
  0x12   : > { %v246_v14 = vmul.f32 %v617_v0, %v432_v4  ;;  %v247_v15 = vmul.f32 %v617_v0, %v433_v5  ;;  %v248_v16 = vmul.f32 %v617_v0, %v436_v7  ;;  %v249_v17 = vmul.f32 %v617_v0, %v437_v8 }
  0x13   : > { %v250_v18 = vmul.f32 %v617_v0, %v440_v10  ;;  %v251_v19 = vmul.f32 %v617_v0, %v441_v11  ;;  %v252_v20 = vmul.f32 %v617_v0, %v444_v12  ;;  %v253_v21 = vmul.f32 %v617_v0, %v445_v13 }
  0x14   : > { %v266_v22 = vadd.f32 %v625_v6, %v246_v14  ;;  %v267_v23 = vadd.f32 %v625_v6, %v247_v15  ;;  %v268_v24 = vadd.f32 %v625_v6, %v248_v16  ;;  %v269_v25 = vadd.f32 %v625_v6, %v249_v17 }
  0x15   : > { %v270_v26 = vadd.f32 %v625_v6, %v250_v18  ;;  %v271_v27 = vadd.f32 %v625_v6, %v251_v19  ;;  %v272_v28 = vadd.f32 %v625_v6, %v252_v20  ;;  %v273_v29 = vadd.f32 %v625_v6, %v253_v21 }
  0x16   : > { %v282_v31 = vmax.f32 %v266_v22, 0.0  ;;  %v283_v32 = vmax.f32 %v267_v23, 0.0  ;;  %v284_v33 = vmax.f32 %v268_v24, 0.0  ;;  %v285_v34 = vmax.f32 %v269_v25, 0.0 }
  0x17   : > { %v286_v36 = vmax.f32 %v270_v26, 0.0  ;;  %v287_v37 = vmax.f32 %v271_v27, 0.0  ;;  %v288_v38 = vmax.f32 %v272_v28, 0.0  ;;  %v289_v39 = vmax.f32 %v273_v29, 0.0 }
  0x18   : > { %v465_v41 = vpack.c.bf16 %v283_v32, %v282_v31  ;;  %v470_v42 = vpack.c.bf16 %v285_v34, %v284_v33  ;;  %v448_v43 = vunpack.c.l.bf16 %v505_v30  ;;  %v449_v44 = vunpack.c.h.bf16 %v505_v30 }
  0x19   : > { %v475_v46 = vpack.c.bf16 %v287_v37, %v286_v36  ;;  %v480_v47 = vpack.c.bf16 %v289_v39, %v288_v38  ;;  %v452_v48 = vunpack.c.l.bf16 %v506_v35  ;;  %v453_v49 = vunpack.c.h.bf16 %v506_v35 }
  0x1a   : > { %466 = vst [vmem:[%s651_s26] sm:$0xff] %v465_v41   ;;  %v254_v50 = vmul.f32 %v617_v0, %v448_v43  ;;  %v255_v51 = vmul.f32 %v617_v0, %v449_v44  ;;  %v456_v52 = vunpack.c.l.bf16 %v507_v40  ;;  %v457_v53 = vunpack.c.h.bf16 %v507_v40 }
  0x1b   : > { %509 = vst [vmem:[%s651_s26 + $0x8] sm:$0xff] %v470_v42   ;;  %v256_v54 = vmul.f32 %v617_v0, %v452_v48  ;;  %v257_v55 = vmul.f32 %v617_v0, %v453_v49  ;;  %v460_v56 = vunpack.c.l.bf16 %v508_v45  ;;  %v461_v57 = vunpack.c.h.bf16 %v508_v45 }
  0x1c   : > { %510 = vst [vmem:[%s651_s26 + $0x10] sm:$0xff] %v475_v46   ;;  %v274_v58 = vadd.f32 %v625_v6, %v254_v50  ;;  %v275_v59 = vadd.f32 %v625_v6, %v255_v51  ;;  %v258_v60 = vmul.f32 %v617_v0, %v456_v52  ;;  %v259_v61 = vmul.f32 %v617_v0, %v457_v53 }
  0x1d   : > { %511 = vst [vmem:[%s651_s26 + $0x18] sm:$0xff] %v480_v47   ;;  %v276_v62 = vadd.f32 %v625_v6, %v256_v54  ;;  %v277_v63 = vadd.f32 %v625_v6, %v257_v55  ;;  %v260_v1 = vmul.f32 %v617_v0, %v460_v56  ;;  %v261_v2 = vmul.f32 %v617_v0, %v461_v57 }
  0x1e   : > { %v290_v3 = vmax.f32 %v274_v58, 0.0  ;;  %v291_v4 = vmax.f32 %v275_v59, 0.0  ;;  %v278_v5 = vadd.f32 %v625_v6, %v258_v60  ;;  %v279_v7 = vadd.f32 %v625_v6, %v259_v61 }
  0x1f   : > { %v292_v8 = vmax.f32 %v276_v62, 0.0  ;;  %v293_v9 = vmax.f32 %v277_v63, 0.0  ;;  %v280_v10 = vadd.f32 %v625_v6, %v260_v1  ;;  %v281_v11 = vadd.f32 %v625_v6, %v261_v2 }
  0x20   : > { %v485_v12 = vpack.c.bf16 %v291_v4, %v290_v3  ;;  %v294_v13 = vmax.f32 %v278_v5, 0.0  ;;  %v295_v14 = vmax.f32 %v279_v7, 0.0 }
  0x21   : > { %v490_v15 = vpack.c.bf16 %v293_v9, %v292_v8  ;;  %v296_v0 = vmax.f32 %v280_v10, 0.0  ;;  %v297_v16 = vmax.f32 %v281_v11, 0.0 }
  0x22   : > { %512 = vst [vmem:[%s651_s26 + $0x20] sm:$0xff] %v485_v12   ;;  %v495_v17 = vpack.c.bf16 %v295_v14, %v294_v13 }
  0x23   : > { %513 = vst [vmem:[%s651_s26 + $0x28] sm:$0xff] %v490_v15   ;;  %v500_v18 = vpack.c.bf16 %v297_v16, %v296_v0 }
  0x24   : > { %514 = vst [vmem:[%s651_s26 + $0x30] sm:$0xff] %v495_v17  }
  0x25   : > { %515 = vst [vmem:[%s651_s26 + $0x38] sm:$0xff] %v500_v18  }
  0x26 PF: > { %s13_s14 = sadd.s32 1, %s564_s14   ;;  %s692_s12 = smov %s560_s13 }
  0x27   : > { %p10_p5 = scmp.ge.s32.totalorder %s13_s14, 6   ;;  %s693_s13 = smov %s695_s15 }
  0x29   :  { %12 = sbr.rel (!%p10_p5) target bundleno = 2 (0x2), region = 62 }

// kernel: generator_forward.13
= control target key start
LH: loop header
LB: loop body
LE: loop exit
PB: predicated region body
PF: predicated region fallthrough
CT: control target
= control target key end

     0   :  { %10 = vsyncpa [#allocation3], 0  ;;  %s1508_s0 = inlined_call_operand.vmem [shape: bf16[4,128,256], index: 0, kind: input, shape index: {}]   ;;  %s1509_s1 = inlined_call_operand.hbm [shape: bf16[4,256,128], index: 1, kind: input, shape index: {}]   ;;  %s1510_s2 = inlined_call_operand.vmem [shape: bf16[4,128,128], index: 2, kind: output, shape index: {0}]   ;;  %s1511_s3 = inlined_call_operand.vmem [shape: f32[4,1,1,128], index: 3, kind: output, shape index: {1}]   ;;  %s1512_s4 = inlined_call_operand.vmem [shape: f32[4,1,1,128], index: 4, kind: output, shape index: {2}]  }
   0x1   :  { %12 = vsyncpa [#allocation3 + $0x1], 0  ;;  %s1319_s15 = smov 0   ;;  %s1321_s16 = smov 0  }
   0x2   :  { %s1323_s17 = smov 0   ;;  %s1325_s18 = smov 0  }
   0x3   :  { %s1327_s19 = smov 0   ;;  %s1329_s20 = smov 0  }
   0x4 LB: > { %s912_s21 = sadd.s32 4294967295, %s1290_s20   ;;  %s30_s22 = sadd.s32 1, %s1286_s19  ;;  %s1290_s20 = sphi %s1329_s20, %s18_s20   ;;  %s1286_s19 = sphi %s1327_s19, %s1519_s19   ;;  %s1282_s18 = sphi %s1325_s18, %s1518_s18   ;;  %s1278_s17 = sphi %s1323_s17, %s1517_s17   ;;  %s1274_s16 = sphi %s1321_s16, %s1516_s16   ;;  %s1270_s15 = sphi %s1319_s15, %s1515_s15  }
   0x5   : > { %p32_p0 = scmp.ge.s32.totalorder %s30_s22, 4  ;;  %s65_s23 = sadd.s32 1, %s1278_s17 }
   0x6   : > { %p72_p1 = scmp.ne.s32.totalorder %s1278_s17, %s1274_s16  ;;  %p73_p2 = scmp.eq.s32.totalorder %s1290_s20, 0 }
   0x7   : > { %s1521_s22 = smov (%p32_p0, %s30_s22), 0  ;;  %p78_p4 = scmp.ne.s32.totalorder %s1274_s16, %s1270_s15 }
   0x8   : > { %p1355_p3 = por %p73_p2, %p72_p1  ;;  %s62_s25 = ssub.s32 %s1286_s19, %s1521_s22 }
   0x9   : > { %p79_p5 = scmp.eq.s32.totalorder %s912_s21, 0  ;;  %p63_p6 = scmp.eq.s32.totalorder %s62_s25, 0 }
   0xa   : > { %p1159_p8 = scmp.lt.s32.totalorder %s1290_s20, 4  ;;  %s200_s28 = sand.u32 1, %s1278_s17  }
   0xb   : > { %p1362_p7 = por %p79_p5, %p78_p4  ;;  %s1055_s29 = sshll.u32 %s1286_s19, 7 }
   0xc   : > { %s1368_s27 = scalar_select %p63_p6, %s1278_s17, %s65_s23  }
   0xd   : > { %s916_s30 = sshll.u32 %s200_s28, 7  ;;  %s209_s7 = scalar_lea.hbm %s1509_s1, %s1055_s29 }
   0xe   : > { %s210_s8 = sshll.u32 %s209_s7, 4  ;;  %s204_s9 = scalar_lea.vmem [#allocation2], %s916_s30  ;;  %s211_s8 = int_to_ptr.hbm [resolvable:$true] %s210_s8 }
   0xf   : > { %s212_s10 = sshll.u32 %s204_s9, 4  ;;  %p1156_p9 = pnand %p1159_p8, %p1355_p3  ;;  %s213_s10 = int_to_ptr.vmem [resolvable:$true] %s212_s10 }
  0x10   : > { %p919_p10 = scmp.ge.s32.totalorder %s1290_s20, 1  ;;  %p220_p11 = scmp.lt.s32.totalorder %s1290_s20, 5 }
  0x11   : > { %s201_s11 = scalar_lea.sflag [#allocation3], %s200_s28  ;;  %s1292_s12 = smov 64  }
  0x12   : > { %s1293_s13 = smov 4   ;;  %p221_p12 = pnand %p919_p10, %p220_p11 }
  0x13   : > { %1158 = dma.hbm_to_vmem [thread:$0]  (!%p1156_p9), %s211_s8, 2048, %s213_s10, %s201_s11, %s1292_s12, %s1292_s12, %s1293_s13  }
  0x14   : > { %224 = sbr.rel (%p221_p12) target bundleno = 276 (0x114), region = 28  ;;  %s226_s14 = sand.u32 (!%p221_p12), 1, %s1274_s16  }
  0x15   : > { %s920_s15 = sshll.u32 (!%p221_p12), %s226_s14, 7  ;;  %s227_s21 = scalar_lea.sflag (!%p221_p12), [#allocation3], %s226_s14 }
  0x16   : > { %s1380_s23 = scalar_lea.vmem (!%p221_p12), [#allocation2], %s920_s15 }
  0x19   : > { %1265 = dma.done.wait (%p1362_p7), %s227_s21, 2048  }
  0x1a   : > { %1267 = vsyncadd (%p1362_p7), %s227_s21, 4294965248  ;;  %v1081_v0 = vld [vmem:[%s1380_s23 + $0x38] sm:$0xff]  ;;  %v1080_v2 = vld [vmem:[%s1380_s23 + $0x30] sm:$0xff]  ;;  %p283_p13 = scmp.lt.s32.totalorder %s1282_s18, 3 }
  0x1b   : > { %v1089_v1 = vld [vmem:[%s1380_s23 + $0x78] sm:$0xff]  ;;  %539 = vmatpush.bf16.msra.mxu0 %v1081_v0  ;;  %v1088_v3 = vld [vmem:[%s1380_s23 + $0x70] sm:$0xff]  ;;  %1137 = vmatpush.bf16.msra.mxu2 %v1081_v0  ;;  %v1079_v4 = vld [vmem:[%s1380_s23 + $0x28] sm:$0xff] }
  0x1c   : > { %588 = vmatpush.bf16.msra.mxu1 %v1089_v1  ;;  %1145 = vmatpush.bf16.msra.mxu3 %v1089_v1  ;;  %v1087_v5 = vld [vmem:[%s1380_s23 + $0x68] sm:$0xff]  ;;  %v1078_v6 = vld [vmem:[%s1380_s23 + $0x20] sm:$0xff]  ;;  %v1077_v8 = vld [vmem:[%s1380_s23 + $0x18] sm:$0xff]  ;;  %s1523_s18 = smov (!%p283_p13, %s1282_s18), 3 }
  0x1d   : > { %v1086_v7 = vld [vmem:[%s1380_s23 + $0x60] sm:$0xff]  ;;  %v1085_v9 = vld [vmem:[%s1380_s23 + $0x58] sm:$0xff]  ;;  %v1076_v10 = vld [vmem:[%s1380_s23 + $0x10] sm:$0xff]  ;;  %s1056_s24 = sshll.u32 %s1523_s18, 7  ;;  %s1057_s29 = sshll.u32 %s1523_s18, 6 }
  0x1e   : > { %v1084_v11 = vld [vmem:[%s1380_s23 + $0x50] sm:$0xff]  ;;  %v1075_v12 = vld [vmem:[%s1380_s23 + $0x8] sm:$0xff]  ;;  %s1408_s28 = scalar_lea.vmem %s1508_s0, %s1056_s24  ;;  %v1074_v14 = vld [vmem:[%s1380_s23] sm:$0xff]  ;;  %s1448_s6 = scalar_lea.vmem %s1510_s2, %s1057_s29 }
  0x1f   : > { %540 = vmatpush.bf16.msra.mxu0 %v1080_v2  ;;  %1138 = vmatpush.bf16.msra.mxu2 %v1080_v2  ;;  %v1083_v13 = vld [vmem:[%s1380_s23 + $0x48] sm:$0xff]  ;;  %v1082_v15 = vld [vmem:[%s1380_s23 + $0x40] sm:$0xff]  ;;  %v935_v28 = vld [vmem:[%s1408_s28 + $0x10] sm:$0xf]  ;;  %s308_s9 = scalar_lea.vmem %s1511_s3, %s1523_s18  ;;  %s314_s12 = scalar_lea.vmem %s1512_s4, %s1523_s18 }
  0x20   : > { %589 = vmatpush.bf16.msra.mxu1 %v1088_v3  ;;  %1146 = vmatpush.bf16.msra.mxu3 %v1088_v3  ;;  %v927_v16 = vld [vmem:[%s1408_s28] sm:$0xf]  ;;  %v1059_v17 = vld [vmem:[%s1408_s28 + $0x4] sm:$0xf0]  ;;  %v1058_v18 = vld [vmem:[%s1408_s28 + $0x4] sm:$0xf] }
  0x21   : > { %v929_v19 = vld [vmem:[%s1408_s28 + $0x8] sm:$0xf0]  ;;  %v959_v20 = vld [vmem:[%s1408_s28 + $0x40] sm:$0xf]  ;;  %v1067_v21 = vld [vmem:[%s1408_s28 + $0x44] sm:$0xf0]  ;;  %v928_v24 = vor.u32 %v1059_v17, %v927_v16 }
  0x22   : > { %v1066_v22 = vld [vmem:[%s1408_s28 + $0x44] sm:$0xf]  ;;  %v961_v23 = vld [vmem:[%s1408_s28 + $0x48] sm:$0xf0]  ;;  %v932_v25 = vor.u32 %v1058_v18, %v929_v19  ;;  %v960_v26 = vor.u32 %v1067_v21, %v959_v20  ;;  %v1061_v29 = vld [vmem:[%s1408_s28 + $0x14] sm:$0xf0] }
  0x23   : > { %541 = vmatpush.bf16.msra.mxu0 %v1079_v4  ;;  %1139 = vmatpush.bf16.msra.mxu2 %v1079_v4  ;;  %v964_v27 = vor.u32 %v1066_v22, %v961_v23  ;;  %v1060_v30 = vld [vmem:[%s1408_s28 + $0x14] sm:$0xf]  ;;  %v937_v31 = vld [vmem:[%s1408_s28 + $0x18] sm:$0xf0]  ;;  %v967_v32 = vld [vmem:[%s1408_s28 + $0x50] sm:$0xf]  ;;  %v936_v36 = vor.u32 %v1061_v29, %v935_v28 }
  0x24   : > { %590 = vmatpush.bf16.msra.mxu1 %v1087_v5  ;;  %1147 = vmatpush.bf16.msra.mxu3 %v1087_v5  ;;  %v1069_v33 = vld [vmem:[%s1408_s28 + $0x54] sm:$0xf0]  ;;  %v1068_v34 = vld [vmem:[%s1408_s28 + $0x54] sm:$0xf]  ;;  %v969_v35 = vld [vmem:[%s1408_s28 + $0x58] sm:$0xf0]  ;;  %v940_v37 = vor.u32 %v1060_v30, %v937_v31 }
  0x25   : > { %v968_v38 = vor.u32 %v1069_v33, %v967_v32  ;;  %v972_v39 = vor.u32 %v1068_v34, %v969_v35  ;;  %v943_v40 = vld [vmem:[%s1408_s28 + $0x20] sm:$0xf]  ;;  %v1063_v41 = vld [vmem:[%s1408_s28 + $0x24] sm:$0xf0]  ;;  %v1062_v42 = vld [vmem:[%s1408_s28 + $0x24] sm:$0xf] }
  0x26   : > { %v945_v43 = vld [vmem:[%s1408_s28 + $0x28] sm:$0xf0]  ;;  %v975_v44 = vld [vmem:[%s1408_s28 + $0x60] sm:$0xf]  ;;  %v1071_v45 = vld [vmem:[%s1408_s28 + $0x64] sm:$0xf0]  ;;  %v944_v48 = vor.u32 %v1063_v41, %v943_v40 }
  0x27   : > { %542 = vmatpush.bf16.msra.mxu0 %v1078_v6  ;;  %1140 = vmatpush.bf16.msra.mxu2 %v1078_v6  ;;  %v1070_v46 = vld [vmem:[%s1408_s28 + $0x64] sm:$0xf]  ;;  %v977_v47 = vld [vmem:[%s1408_s28 + $0x68] sm:$0xf0]  ;;  %v948_v49 = vor.u32 %v1062_v42, %v945_v43  ;;  %v976_v50 = vor.u32 %v1071_v45, %v975_v44  ;;  %v951_v52 = vld [vmem:[%s1408_s28 + $0x30] sm:$0xf] }
  0x28   : > { %591 = vmatpush.bf16.msra.mxu1 %v1086_v7  ;;  %1148 = vmatpush.bf16.msra.mxu3 %v1086_v7  ;;  %v980_v51 = vor.u32 %v1070_v46, %v977_v47  ;;  %v1065_v53 = vld [vmem:[%s1408_s28 + $0x34] sm:$0xf0]  ;;  %v1064_v54 = vld [vmem:[%s1408_s28 + $0x34] sm:$0xf]  ;;  %v953_v55 = vld [vmem:[%s1408_s28 + $0x38] sm:$0xf0] }
  0x29   : > { %v983_v56 = vld [vmem:[%s1408_s28 + $0x70] sm:$0xf]  ;;  %v1073_v57 = vld [vmem:[%s1408_s28 + $0x74] sm:$0xf0]  ;;  %v1072_v58 = vld [vmem:[%s1408_s28 + $0x74] sm:$0xf]  ;;  %v952_v60 = vor.u32 %v1065_v53, %v951_v52  ;;  %v956_v61 = vor.u32 %v1064_v54, %v953_v55 }
  0x2a   : > { %v985_v59 = vld [vmem:[%s1408_s28 + $0x78] sm:$0xf0]  ;;  %v984_v62 = vor.u32 %v1073_v57, %v983_v56 }
  0x2b   : > { %543 = vmatpush.bf16.msra.mxu0 %v1077_v8  ;;  %1141 = vmatpush.bf16.msra.mxu2 %v1077_v8  ;;  %v988_v63 = vor.u32 %v1072_v58, %v985_v59 }
  0x2c   : > { %592 = vmatpush.bf16.msra.mxu1 %v1085_v9  ;;  %1149 = vmatpush.bf16.msra.mxu3 %v1085_v9 }
  0x2f   : > { %544 = vmatpush.bf16.msra.mxu0 %v1076_v10  ;;  %1142 = vmatpush.bf16.msra.mxu2 %v1076_v10 }
  0x30   : > { %593 = vmatpush.bf16.msra.mxu1 %v1084_v11  ;;  %1150 = vmatpush.bf16.msra.mxu3 %v1084_v11 }
  0x33   : > { %545 = vmatpush.bf16.msra.mxu0 %v1075_v12  ;;  %1143 = vmatpush.bf16.msra.mxu2 %v1075_v12 }
  0x34   : > { %594 = vmatpush.bf16.msra.mxu1 %v1083_v13  ;;  %1151 = vmatpush.bf16.msra.mxu3 %v1083_v13 }
  0x37   : > { %546 = vmatpush.bf16.msra.mxu0 %v1074_v14  ;;  %1144 = vmatpush.bf16.msra.mxu2 %v1074_v14 }
  0x38   : > { %595 = vmatpush.bf16.msra.mxu1 %v1082_v15  ;;  %1152 = vmatpush.bf16.msra.mxu3 %v1082_v15 }
  0x3a   : > { %547 = vmatmul.bf16.vlgmr.msra.gmra.mxu0 %v928_v24  ;;  %567 = vmatmul.bf16.vlgmr.msra.gmra.mxu2 %v960_v26 }
  0x3b   : > { %596 = vmatmul.bf16.vlgmr.msra.gmra.mxu1 %v932_v25  ;;  %616 = vmatmul.bf16.vlgmr.msra.gmra.mxu3 %v964_v27 }
  0x4a   : > { %552 = vmatmul.bf16.gmra.mxu0 %v936_v36  ;;  %572 = vmatmul.bf16.gmra.mxu2 %v968_v38 }
  0x4b   : > { %601 = vmatmul.bf16.gmra.mxu1 %v940_v37  ;;  %621 = vmatmul.bf16.gmra.mxu3 %v972_v39 }
  0x5a   : > { %557 = vmatmul.bf16.gmra.mxu0 %v944_v48  ;;  %577 = vmatmul.bf16.gmra.mxu2 %v976_v50 }
  0x5b   : > { %606 = vmatmul.bf16.gmra.mxu1 %v948_v49  ;;  %626 = vmatmul.bf16.gmra.mxu3 %v980_v51 }
  0x6a   : > { %562 = vmatmul.bf16.gmra.mxu0 %v952_v60  ;;  %582 = vmatmul.bf16.gmra.mxu2 %v984_v62 }
  0x6b   : > { %611 = vmatmul.bf16.gmra.mxu1 %v956_v61  ;;  %631 = vmatmul.bf16.gmra.mxu3 %v988_v63 }
  0xb7   : > { %v548_v0 = vpop.f32.mrf.mxu0 }
  0xb8   : > { %v597_v1 = vpop.f32.mrf.mxu1 }
  0xb9   : > { %v598_v6 = vadd.f32 %v597_v1, %v548_v0 }
  0xbb   : > { %v691_v39 = vmul.f32 %v598_v6, %v598_v6 }
  0xbd   : > { %v568_v2 = vpop.f32.mrf.mxu2 }
  0xbe   : > { %v617_v3 = vpop.f32.mrf.mxu3 }
  0xbf   : > { %v550_v4 = vpop.f32.mrf.mxu0  ;;  %v1451_v9 = vadd.f32 %v617_v3, %v568_v2 }
  0xc0   : > { %v599_v5 = vpop.f32.mrf.mxu1 }
  0xc1   : > { %v600_v7 = vadd.f32 %v599_v5, %v550_v4 }
  0xc3   : > { %v1093_v8 = vpack.c.bf16 %v600_v7, %v598_v6  ;;  %v692_v37 = vmul.f32 %v600_v7, %v600_v7  ;;  %v669_v40 = vadd.f32 %v600_v7, %v598_v6 }
  0xc5   : > { %1094 = vst [vmem:[%s1448_s6] sm:$0xff] %v1093_v8   ;;  %v570_v10 = vpop.f32.mrf.mxu2  ;;  %v707_v47 = vadd.f32 %v692_v37, %v691_v39  ;;  %v699_v8 = vmul.f32 %v1451_v9, %v1451_v9 }
  0xc6   : > { %v619_v11 = vpop.f32.mrf.mxu3 }
  0xc7   : > { %v553_v12 = vpop.f32.mrf.mxu0  ;;  %v1453_v14 = vadd.f32 %v619_v11, %v570_v10 }
  0xc8   : > { %v602_v13 = vpop.f32.mrf.mxu1 }
  0xc9   : > { %v1113_v15 = vpack.c.bf16 %v1453_v14, %v1451_v9  ;;  %v603_v20 = vadd.f32 %v602_v13, %v553_v12  ;;  %v700_v13 = vmul.f32 %v1453_v14, %v1453_v14 }
  0xcb   : > { %1133 = vst [vmem:[%s1448_s6 + $0x20] sm:$0xff] %v1113_v15   ;;  %v693_v41 = vmul.f32 %v603_v20, %v603_v20  ;;  %v670_v48 = vadd.f32 %v669_v40, %v603_v20 }
  0xcd   : > { %v573_v16 = vpop.f32.mrf.mxu2  ;;  %v708_v51 = vadd.f32 %v707_v47, %v693_v41 }
  0xce   : > { %v622_v17 = vpop.f32.mrf.mxu3 }
  0xcf   : > { %v555_v18 = vpop.f32.mrf.mxu0  ;;  %v1459_v23 = vadd.f32 %v622_v17, %v573_v16 }
  0xd0   : > { %v604_v19 = vpop.f32.mrf.mxu1 }
  0xd1   : > { %v605_v21 = vadd.f32 %v604_v19, %v555_v18 }
  0xd3   : > { %v1098_v22 = vpack.c.bf16 %v605_v21, %v603_v20  ;;  %v694_v49 = vmul.f32 %v605_v21, %v605_v21  ;;  %v671_v52 = vadd.f32 %v670_v48, %v605_v21  ;;  %v701_v20 = vmul.f32 %v1459_v23, %v1459_v23 }
  0xd5   : > { %1130 = vst [vmem:[%s1448_s6 + $0x8] sm:$0xff] %v1098_v22   ;;  %v575_v24 = vpop.f32.mrf.mxu2  ;;  %v709_v55 = vadd.f32 %v708_v51, %v694_v49 }
  0xd6   : > { %v624_v25 = vpop.f32.mrf.mxu3 }
  0xd7   : > { %v558_v26 = vpop.f32.mrf.mxu0  ;;  %v1461_v28 = vadd.f32 %v624_v25, %v575_v24 }
  0xd8   : > { %v607_v27 = vpop.f32.mrf.mxu1 }
  0xd9   : > { %v1118_v29 = vpack.c.bf16 %v1461_v28, %v1459_v23  ;;  %v608_v34 = vadd.f32 %v607_v27, %v558_v26 }
  0xdb   : > { %1134 = vst [vmem:[%s1448_s6 + $0x28] sm:$0xff] %v1118_v29   ;;  %v695_v53 = vmul.f32 %v608_v34, %v608_v34  ;;  %v672_v56 = vadd.f32 %v671_v52, %v608_v34 }
  0xdd   : > { %v578_v30 = vpop.f32.mrf.mxu2  ;;  %v710_v58 = vadd.f32 %v709_v55, %v695_v53 }
  0xde   : > { %v627_v31 = vpop.f32.mrf.mxu3 }
  0xdf   : > { %v560_v32 = vpop.f32.mrf.mxu0  ;;  %v628_v38 = vadd.f32 %v627_v31, %v578_v30 }
  0xe0   : > { %v609_v33 = vpop.f32.mrf.mxu1 }
  0xe1   : > { %v610_v35 = vadd.f32 %v609_v33, %v560_v32  ;;  %v703_v27 = vmul.f32 %v628_v38, %v628_v38 }
  0xe3   : > { %v1103_v36 = vpack.c.bf16 %v610_v35, %v608_v34  ;;  %v696_v57 = vmul.f32 %v610_v35, %v610_v35  ;;  %v673_v59 = vadd.f32 %v672_v56, %v610_v35 }
  0xe5   : > { %1131 = vst [vmem:[%s1448_s6 + $0x10] sm:$0xff] %v1103_v36   ;;  %v580_v42 = vpop.f32.mrf.mxu2  ;;  %v711_v1 = vadd.f32 %v710_v58, %v696_v57 }
  0xe6   : > { %v629_v43 = vpop.f32.mrf.mxu3 }
  0xe7   : > { %v563_v44 = vpop.f32.mrf.mxu0  ;;  %v630_v46 = vadd.f32 %v629_v43, %v580_v42 }
  0xe8   : > { %v612_v45 = vpop.f32.mrf.mxu1 }
  0xe9   : > { %v1123_v50 = vpack.c.bf16 %v630_v46, %v628_v38  ;;  %v613_v54 = vadd.f32 %v612_v45, %v563_v44  ;;  %v704_v30 = vmul.f32 %v630_v46, %v630_v46 }
  0xeb   : > { %1135 = vst [vmem:[%s1448_s6 + $0x30] sm:$0xff] %v1123_v50   ;;  %v697_v60 = vmul.f32 %v613_v54, %v613_v54  ;;  %v674_v2 = vadd.f32 %v673_v59, %v613_v54 }
  0xed   : > { %v583_v61 = vpop.f32.mrf.mxu2  ;;  %v712_v4 = vadd.f32 %v711_v1, %v697_v60 }
  0xee   : > { %v632_v62 = vpop.f32.mrf.mxu3 }
  0xef   : > { %v565_v63 = vpop.f32.mrf.mxu0  ;;  %v633_v12 = vadd.f32 %v632_v62, %v583_v61 }
  0xf0   : > { %v614_v0 = vpop.f32.mrf.mxu1 }
  0xf1   : > { %v615_v3 = vadd.f32 %v614_v0, %v565_v63  ;;  %v705_v34 = vmul.f32 %v633_v12, %v633_v12 }
  0xf3   : > { %v1108_v5 = vpack.c.bf16 %v615_v3, %v613_v54  ;;  %v675_v6 = vadd.f32 %v674_v2, %v615_v3  ;;  %v698_v7 = vmul.f32 %v615_v3, %v615_v3 }
  0xf5   : > { %1132 = vst [vmem:[%s1448_s6 + $0x18] sm:$0xff] %v1108_v5   ;;  %v676_v10 = vadd.f32 %v675_v6, %v1451_v9  ;;  %v713_v11 = vadd.f32 %v712_v4, %v698_v7  ;;  %v585_v17 = vpop.f32.mrf.mxu2  ;;  %v702_v9 = vmul.f32 %v1461_v28, %v1461_v28 }
  0xf6   : > { %v634_v18 = vpop.f32.mrf.mxu3 }
  0xf7   : > { %v677_v15 = vadd.f32 %v676_v10, %v1453_v14  ;;  %v714_v16 = vadd.f32 %v713_v11, %v699_v8  ;;  %v635_v19 = vadd.f32 %v634_v18, %v585_v17 }
  0xf9   : > { %v678_v21 = vadd.f32 %v677_v15, %v1459_v23  ;;  %v715_v22 = vadd.f32 %v714_v16, %v700_v13  ;;  %v1128_v24 = vpack.c.bf16 %v635_v19, %v633_v12  ;;  %v706_v37 = vmul.f32 %v635_v19, %v635_v19 }
  0xfb   : > { %v716_v25 = vadd.f32 %v715_v22, %v701_v20  ;;  %v679_v26 = vadd.f32 %v678_v21, %v1461_v28  ;;  %1136 = vst [vmem:[%s1448_s6 + $0x38] sm:$0xff] %v1128_v24  }
  0xfd   : > { %v680_v14 = vadd.f32 %v679_v26, %v628_v38  ;;  %v717_v29 = vadd.f32 %v716_v25, %v702_v9 }
  0xff   : > { %v681_v31 = vadd.f32 %v680_v14, %v630_v46  ;;  %v718_v32 = vadd.f32 %v717_v29, %v703_v27 }
 0x101   : > { %v682_v33 = vadd.f32 %v681_v31, %v633_v12  ;;  %v719_v35 = vadd.f32 %v718_v32, %v704_v30 }
 0x103   : > { %v720_v23 = vadd.f32 %v719_v35, %v705_v34  ;;  %v683_v36 = vadd.f32 %v682_v33, %v635_v19 }
 0x105   : > { %v684_v39 = vrot.slane %v683_v36, 4  ;;  %v721_v40 = vadd.f32 %v720_v23, %v706_v37 }
 0x107   : > { %v685_v41 = vadd.f32 %v684_v39, %v683_v36  ;;  %v722_v42 = vrot.slane %v721_v40, 4 }
 0x109   : > { %v686_v28 = vrot.slane %v685_v41, 2  ;;  %v723_v43 = vadd.f32 %v722_v42, %v721_v40 }
 0x10b   : > { %v687_v44 = vadd.f32 %v686_v28, %v685_v41  ;;  %v724_v38 = vrot.slane %v723_v43, 2 }
 0x10d   : > { %v688_v45 = vrot.slane %v687_v44, 1  ;;  %v725_v47 = vadd.f32 %v724_v38, %v723_v43 }
 0x10f   : > { %v689_v46 = vadd.f32 %v688_v45, %v687_v44  ;;  %v726_v48 = vrot.slane %v725_v47, 1 }
 0x111   : > { %690 = vst [vmem:[%s308_s9] sm:$0x1] %v689_v46  ;;  %v727_v49 = vadd.f32 %v726_v48, %v725_v47 }
 0x113   : > { %728 = vst [vmem:[%s314_s12] sm:$0x1] %v727_v49 }
 0x114 PF: > { %s18_s20 = sadd.s32 1, %s1290_s20   ;;  %s1515_s15 = smov %s1274_s16 }
 0x115   : > { %p15_p0 = scmp.ge.s32.totalorder %s18_s20, 6   ;;  %s1516_s16 = smov %s1278_s17 }
 0x116   : > { %s1517_s17 = smov %s1368_s27  ;;  %s1518_s18 = smov %s1286_s19 }
 0x117   : > { %s1519_s19 = smov %s1521_s22  ;;  %17 = sbr.rel (!%p15_p0) target bundleno = 4 (0x4), region = 95 }
 0x11c   :  { %795 = vsyncpa [#allocation3], 1 }
 0x11d   :  { %797 = vsyncpa [#allocation3 + $0x1], 1 }

// kernel: generator_forward.15
= control target key start
LH: loop header
LB: loop body
LE: loop exit
PB: predicated region body
PF: predicated region fallthrough
CT: control target
= control target key end

     0   :  { %s1784_s15 = smov 0   ;;  %s1786_s16 = smov 0   ;;  %s2202_s0 = inlined_call_operand.vmem [shape: bf16[4,512,128], index: 0, kind: input, shape index: {}]   ;;  %s2203_s1 = inlined_call_operand.vmem [shape: bf16[4,128,128], index: 1, kind: input, shape index: {}]   ;;  %s2204_s2 = inlined_call_operand.vmem [shape: bf16[4,512,128], index: 2, kind: output, shape index: {0}]   ;;  %s2205_s3 = inlined_call_operand.vmem [shape: f32[4,1,1,128], index: 3, kind: output, shape index: {1}]   ;;  %s2206_s4 = inlined_call_operand.vmem [shape: f32[4,1,1,128], index: 4, kind: output, shape index: {2}]  }
   0x1   :  { %s1788_s17 = smov 0  }
   0x2 LB: > { %s27_s18 = sadd.s32 1, %s1753_s16  ;;  %p1284_p0 = scmp.ge.s32.totalorder %s1757_s17, 1  ;;  %s1757_s17 = sphi %s1788_s17, %s15_s17   ;;  %s1753_s16 = sphi %s1786_s16, %s2208_s16   ;;  %s1749_s15 = sphi %s1784_s15, %s2207_s15  }
   0x3   : > { %p29_p1 = scmp.ge.s32.totalorder %s27_s18, 4  ;;  %p202_p2 = scmp.lt.s32.totalorder %s1757_s17, 5 }
   0x5   : > { %s2210_s18 = smov (%p29_p1, %s27_s18), 0  ;;  %p203_p3 = pnand %p1284_p0, %p202_p2 }
   0x6   : > { %p254_p4 = scmp.lt.s32.totalorder (!%p203_p3), %s1749_s15, 3 }
   0x7   : > { %206 = sbr.rel (%p203_p3) target bundleno = 406 (0x196), region = 28 }
   0xc   : > { %s2212_s15 = smov (!%p254_p4, %s1749_s15), 3 }
   0xd   : > { %s1454_s19 = sshll.u32 %s2212_s15, 6  ;;  %s1453_s23 = sshll.u32 %s2212_s15, 8 }
   0xe   : > { %s1808_s22 = scalar_lea.vmem %s2203_s1, %s1454_s19  ;;  %s1823_s26 = scalar_lea.vmem %s2202_s0, %s1453_s23 }
   0xf   : > { %v1495_v0 = vld [vmem:[%s1808_s22 + $0x38] sm:$0xff]  ;;  %v1494_v1 = vld [vmem:[%s1808_s22 + $0x30] sm:$0xff]  ;;  %v1493_v2 = vld [vmem:[%s1808_s22 + $0x28] sm:$0xff]  ;;  %s1863_s29 = scalar_lea.vmem %s2204_s2, %s1453_s23  ;;  %s283_s6 = scalar_lea.vmem %s2205_s3, %s2212_s15 }
  0x10   : > { %610 = vmatpush.bf16.msra.mxu0 %v1495_v0  ;;  %1687 = vmatpush.bf16.msra.mxu1 %v1495_v0  ;;  %v1492_v3 = vld [vmem:[%s1808_s22 + $0x20] sm:$0xff]  ;;  %v1491_v4 = vld [vmem:[%s1808_s22 + $0x18] sm:$0xff]  ;;  %v1490_v5 = vld [vmem:[%s1808_s22 + $0x10] sm:$0xff]  ;;  %s289_s9 = scalar_lea.vmem %s2206_s4, %s2212_s15 }
  0x11   : > { %1688 = vmatpush.bf16.msra.mxu2 %v1495_v0  ;;  %1689 = vmatpush.bf16.msra.mxu3 %v1495_v0  ;;  %v1489_v6 = vld [vmem:[%s1808_s22 + $0x8] sm:$0xff]  ;;  %v1488_v7 = vld [vmem:[%s1808_s22] sm:$0xff]  ;;  %v1458_v13 = vld [vmem:[%s1823_s26 + $0x10] sm:$0xff] }
  0x12   : > { %v1456_v8 = vld [vmem:[%s1823_s26] sm:$0xff]  ;;  %v1457_v10 = vld [vmem:[%s1823_s26 + $0x8] sm:$0xff]  ;;  %v1466_v14 = vld [vmem:[%s1823_s26 + $0x50] sm:$0xff] }
  0x13   : > { %v1464_v9 = vld [vmem:[%s1823_s26 + $0x40] sm:$0xff]  ;;  %v1465_v11 = vld [vmem:[%s1823_s26 + $0x48] sm:$0xff]  ;;  %v1459_v16 = vld [vmem:[%s1823_s26 + $0x18] sm:$0xff] }
  0x14   : > { %611 = vmatpush.bf16.msra.mxu0 %v1494_v1  ;;  %1690 = vmatpush.bf16.msra.mxu1 %v1494_v1  ;;  %v1472_v12 = vld [vmem:[%s1823_s26 + $0x80] sm:$0xff]  ;;  %v1473_v15 = vld [vmem:[%s1823_s26 + $0x88] sm:$0xff]  ;;  %v1467_v17 = vld [vmem:[%s1823_s26 + $0x58] sm:$0xff] }
  0x15   : > { %1691 = vmatpush.bf16.msra.mxu2 %v1494_v1  ;;  %1692 = vmatpush.bf16.msra.mxu3 %v1494_v1  ;;  %v1474_v18 = vld [vmem:[%s1823_s26 + $0x90] sm:$0xff]  ;;  %v1480_v19 = vld [vmem:[%s1823_s26 + $0xc0] sm:$0xff]  ;;  %v1475_v22 = vld [vmem:[%s1823_s26 + $0x98] sm:$0xff] }
  0x16   : > { %v1460_v20 = vld [vmem:[%s1823_s26 + $0x20] sm:$0xff]  ;;  %v1481_v23 = vld [vmem:[%s1823_s26 + $0xc8] sm:$0xff]  ;;  %v1482_v27 = vld [vmem:[%s1823_s26 + $0xd0] sm:$0xff] }
  0x17   : > { %v1468_v21 = vld [vmem:[%s1823_s26 + $0x60] sm:$0xff]  ;;  %v1461_v24 = vld [vmem:[%s1823_s26 + $0x28] sm:$0xff]  ;;  %v1462_v28 = vld [vmem:[%s1823_s26 + $0x30] sm:$0xff] }
  0x18   : > { %612 = vmatpush.bf16.msra.mxu0 %v1493_v2  ;;  %1693 = vmatpush.bf16.msra.mxu1 %v1493_v2  ;;  %v1469_v25 = vld [vmem:[%s1823_s26 + $0x68] sm:$0xff]  ;;  %v1476_v26 = vld [vmem:[%s1823_s26 + $0xa0] sm:$0xff]  ;;  %v1470_v29 = vld [vmem:[%s1823_s26 + $0x70] sm:$0xff] }
  0x19   : > { %1694 = vmatpush.bf16.msra.mxu2 %v1493_v2  ;;  %1695 = vmatpush.bf16.msra.mxu3 %v1493_v2  ;;  %v1477_v30 = vld [vmem:[%s1823_s26 + $0xa8] sm:$0xff]  ;;  %v1483_v31 = vld [vmem:[%s1823_s26 + $0xd8] sm:$0xff]  ;;  %v1478_v34 = vld [vmem:[%s1823_s26 + $0xb0] sm:$0xff] }
  0x1a   : > { %v1463_v32 = vld [vmem:[%s1823_s26 + $0x38] sm:$0xff]  ;;  %v1484_v35 = vld [vmem:[%s1823_s26 + $0xe0] sm:$0xff]  ;;  %v1485_v39 = vld [vmem:[%s1823_s26 + $0xe8] sm:$0xff] }
  0x1b   : > { %v1471_v33 = vld [vmem:[%s1823_s26 + $0x78] sm:$0xff]  ;;  %v1486_v53 = vld [vmem:[%s1823_s26 + $0xf0] sm:$0xff] }
  0x1c   : > { %613 = vmatpush.bf16.msra.mxu0 %v1492_v3  ;;  %1696 = vmatpush.bf16.msra.mxu1 %v1492_v3  ;;  %v1479_v38 = vld [vmem:[%s1823_s26 + $0xb8] sm:$0xff] }
  0x1d   : > { %1697 = vmatpush.bf16.msra.mxu2 %v1492_v3  ;;  %1698 = vmatpush.bf16.msra.mxu3 %v1492_v3 }
  0x20   : > { %614 = vmatpush.bf16.msra.mxu0 %v1491_v4  ;;  %1699 = vmatpush.bf16.msra.mxu1 %v1491_v4 }
  0x21   : > { %1700 = vmatpush.bf16.msra.mxu2 %v1491_v4  ;;  %1701 = vmatpush.bf16.msra.mxu3 %v1491_v4 }
  0x24   : > { %615 = vmatpush.bf16.msra.mxu0 %v1490_v5  ;;  %1702 = vmatpush.bf16.msra.mxu1 %v1490_v5 }
  0x25   : > { %1703 = vmatpush.bf16.msra.mxu2 %v1490_v5  ;;  %1704 = vmatpush.bf16.msra.mxu3 %v1490_v5  ;;  %v1487_v5 = vld [vmem:[%s1823_s26 + $0xf8] sm:$0xff] }
  0x28   : > { %616 = vmatpush.bf16.msra.mxu0 %v1489_v6  ;;  %1705 = vmatpush.bf16.msra.mxu1 %v1489_v6 }
  0x29   : > { %1706 = vmatpush.bf16.msra.mxu2 %v1489_v6  ;;  %1707 = vmatpush.bf16.msra.mxu3 %v1489_v6 }
  0x2c   : > { %617 = vmatpush.bf16.msra.mxu0 %v1488_v7  ;;  %1708 = vmatpush.bf16.msra.mxu1 %v1488_v7 }
  0x2d   : > { %1709 = vmatpush.bf16.msra.mxu2 %v1488_v7  ;;  %1710 = vmatpush.bf16.msra.mxu3 %v1488_v7 }
  0x2f   : > { %618 = vmatmul.bf16.vlgmr.msra.gmra.mxu0 %v1456_v8  ;;  %658 = vmatmul.bf16.vlgmr.msra.gmra.mxu1 %v1464_v9 }
  0x30   : > { %698 = vmatmul.bf16.vlgmr.msra.gmra.mxu2 %v1472_v12  ;;  %738 = vmatmul.bf16.vlgmr.msra.gmra.mxu3 %v1480_v19 }
  0x3f   : > { %623 = vmatmul.bf16.gmra.mxu0 %v1457_v10  ;;  %663 = vmatmul.bf16.gmra.mxu1 %v1465_v11 }
  0x40   : > { %703 = vmatmul.bf16.gmra.mxu2 %v1473_v15  ;;  %743 = vmatmul.bf16.gmra.mxu3 %v1481_v23 }
  0x4f   : > { %628 = vmatmul.bf16.gmra.mxu0 %v1458_v13  ;;  %668 = vmatmul.bf16.gmra.mxu1 %v1466_v14 }
  0x50   : > { %708 = vmatmul.bf16.gmra.mxu2 %v1474_v18  ;;  %748 = vmatmul.bf16.gmra.mxu3 %v1482_v27 }
  0x5f   : > { %633 = vmatmul.bf16.gmra.mxu0 %v1459_v16  ;;  %673 = vmatmul.bf16.gmra.mxu1 %v1467_v17 }
  0x60   : > { %713 = vmatmul.bf16.gmra.mxu2 %v1475_v22  ;;  %753 = vmatmul.bf16.gmra.mxu3 %v1483_v31 }
  0x6f   : > { %638 = vmatmul.bf16.gmra.mxu0 %v1460_v20  ;;  %678 = vmatmul.bf16.gmra.mxu1 %v1468_v21 }
  0x70   : > { %718 = vmatmul.bf16.gmra.mxu2 %v1476_v26  ;;  %758 = vmatmul.bf16.gmra.mxu3 %v1484_v35 }
  0x7f   : > { %643 = vmatmul.bf16.gmra.mxu0 %v1461_v24  ;;  %683 = vmatmul.bf16.gmra.mxu1 %v1469_v25 }
  0x80   : > { %723 = vmatmul.bf16.gmra.mxu2 %v1477_v30  ;;  %763 = vmatmul.bf16.gmra.mxu3 %v1485_v39 }
  0x8f   : > { %648 = vmatmul.bf16.gmra.mxu0 %v1462_v28  ;;  %688 = vmatmul.bf16.gmra.mxu1 %v1470_v29 }
  0x90   : > { %728 = vmatmul.bf16.gmra.mxu2 %v1478_v34  ;;  %768 = vmatmul.bf16.gmra.mxu3 %v1486_v53 }
  0x9f   : > { %653 = vmatmul.bf16.gmra.mxu0 %v1463_v32  ;;  %693 = vmatmul.bf16.gmra.mxu1 %v1471_v33 }
  0xa0   : > { %733 = vmatmul.bf16.gmra.mxu2 %v1479_v38  ;;  %773 = vmatmul.bf16.gmra.mxu3 %v1487_v5 }
  0xac   : > { %v619_v36 = vpop.f32.mrf.mxu0  ;;  %v1854_v37 = vpop.f32.mrf.mxu1 }
  0xad   : > { %v977_v40 = vmul.f32 %v619_v36, %v619_v36 }
  0xb3   : > { %v1878_v60 = vpop.f32.mrf.mxu2  ;;  %v1915_v20 = vpop.f32.mrf.mxu3 }
  0xb4   : > { %v621_v41 = vpop.f32.mrf.mxu0  ;;  %v1865_v42 = vpop.f32.mrf.mxu1 }
  0xb5   : > { %v1499_v43 = vpack.c.bf16 %v621_v41, %v619_v36  ;;  %v907_v44 = vadd.f32 %v621_v41, %v619_v36  ;;  %v978_v45 = vmul.f32 %v621_v41, %v621_v41  ;;  %v1539_v46 = vpack.c.bf16 %v1865_v42, %v1854_v37 }
  0xb7   : > { %1500 = vst [vmem:[%s1863_s29] sm:$0xff] %v1499_v43   ;;  %v1041_v47 = vadd.f32 %v978_v45, %v977_v40 }
  0xb8   : > { %1663 = vst [vmem:[%s1863_s29 + $0x40] sm:$0xff] %v1539_v46  }
  0xbb   : > { %v1886_v2 = vpop.f32.mrf.mxu2  ;;  %v1923_v24 = vpop.f32.mrf.mxu3 }
  0xbc   : > { %v624_v48 = vpop.f32.mrf.mxu0  ;;  %v1871_v49 = vpop.f32.mrf.mxu1  ;;  %v1579_v3 = vpack.c.bf16 %v1886_v2, %v1878_v60  ;;  %v1619_v26 = vpack.c.bf16 %v1923_v24, %v1915_v20 }
  0xbd   : > { %v908_v50 = vadd.f32 %v907_v44, %v624_v48  ;;  %v979_v51 = vmul.f32 %v624_v48, %v624_v48 }
  0xbe   : > { %1671 = vst [vmem:[%s1863_s29 + $0x80] sm:$0xff] %v1579_v3  }
  0xbf   : > { %v1042_v52 = vadd.f32 %v1041_v47, %v979_v51  ;;  %1679 = vst [vmem:[%s1863_s29 + $0xc0] sm:$0xff] %v1619_v26  }
  0xc3   : > { %v1898_v10 = vpop.f32.mrf.mxu2  ;;  %v1937_v32 = vpop.f32.mrf.mxu3 }
  0xc4   : > { %v626_v54 = vpop.f32.mrf.mxu0  ;;  %v1874_v55 = vpop.f32.mrf.mxu1 }
  0xc5   : > { %v1504_v56 = vpack.c.bf16 %v626_v54, %v624_v48  ;;  %v909_v57 = vadd.f32 %v908_v50, %v626_v54  ;;  %v980_v58 = vmul.f32 %v626_v54, %v626_v54  ;;  %v1544_v59 = vpack.c.bf16 %v1874_v55, %v1871_v49 }
  0xc7   : > { %1656 = vst [vmem:[%s1863_s29 + $0x8] sm:$0xff] %v1504_v56   ;;  %v1043_v61 = vadd.f32 %v1042_v52, %v980_v58 }
  0xc8   : > { %1664 = vst [vmem:[%s1863_s29 + $0x48] sm:$0xff] %v1544_v59  }
  0xcb   : > { %v1904_v13 = vpop.f32.mrf.mxu2  ;;  %v1945_v36 = vpop.f32.mrf.mxu3 }
  0xcc   : > { %v629_v62 = vpop.f32.mrf.mxu0  ;;  %v1882_v63 = vpop.f32.mrf.mxu1  ;;  %v1584_v14 = vpack.c.bf16 %v1904_v13, %v1898_v10  ;;  %v1624_v39 = vpack.c.bf16 %v1945_v36, %v1937_v32 }
  0xcd   : > { %v1884_v0 = vadd.f32 %v909_v57, %v629_v62  ;;  %v981_v1 = vmul.f32 %v629_v62, %v629_v62 }
  0xce   : > { %1672 = vst [vmem:[%s1863_s29 + $0x88] sm:$0xff] %v1584_v14  }
  0xcf   : > { %v1890_v4 = vadd.f32 %v1043_v61, %v981_v1  ;;  %1680 = vst [vmem:[%s1863_s29 + $0xc8] sm:$0xff] %v1624_v39  }
  0xd3   : > { %v1913_v19 = vpop.f32.mrf.mxu2  ;;  %v1959_v46 = vpop.f32.mrf.mxu3 }
  0xd4   : > { %v631_v6 = vpop.f32.mrf.mxu0  ;;  %v1894_v7 = vpop.f32.mrf.mxu1 }
  0xd5   : > { %v1509_v8 = vpack.c.bf16 %v631_v6, %v629_v62  ;;  %v1549_v9 = vpack.c.bf16 %v1894_v7, %v1882_v63  ;;  %v982_v52 = vmul.f32 %v631_v6, %v631_v6  ;;  %v911_v57 = vadd.f32 %v1884_v0, %v631_v6 }
  0xd7   : > { %1657 = vst [vmem:[%s1863_s29 + $0x10] sm:$0xff] %v1509_v8   ;;  %v1045_v58 = vadd.f32 %v1890_v4, %v982_v52 }
  0xd8   : > { %1665 = vst [vmem:[%s1863_s29 + $0x50] sm:$0xff] %v1549_v9  }
  0xdb   : > { %v1921_v23 = vpop.f32.mrf.mxu2  ;;  %v1967_v51 = vpop.f32.mrf.mxu3 }
  0xdc   : > { %v634_v11 = vpop.f32.mrf.mxu0  ;;  %v1902_v12 = vpop.f32.mrf.mxu1  ;;  %v1589_v25 = vpack.c.bf16 %v1921_v23, %v1913_v19  ;;  %v1629_v54 = vpack.c.bf16 %v1967_v51, %v1959_v46 }
  0xdd   : > { %v983_v56 = vmul.f32 %v634_v11, %v634_v11  ;;  %v912_v61 = vadd.f32 %v911_v57, %v634_v11 }
  0xde   : > { %1673 = vst [vmem:[%s1863_s29 + $0x90] sm:$0xff] %v1589_v25  }
  0xdf   : > { %1681 = vst [vmem:[%s1863_s29 + $0xd0] sm:$0xff] %v1629_v54   ;;  %v1046_v62 = vadd.f32 %v1045_v58, %v983_v56 }
  0xe3   : > { %v1935_v31 = vpop.f32.mrf.mxu2  ;;  %v1983_v0 = vpop.f32.mrf.mxu3 }
  0xe4   : > { %v636_v15 = vpop.f32.mrf.mxu0  ;;  %v1909_v16 = vpop.f32.mrf.mxu1 }
  0xe5   : > { %v1514_v17 = vpack.c.bf16 %v636_v15, %v634_v11  ;;  %v1554_v18 = vpack.c.bf16 %v1909_v16, %v1902_v12  ;;  %v984_v59 = vmul.f32 %v636_v15, %v636_v15  ;;  %v913_v8 = vadd.f32 %v912_v61, %v636_v15 }
  0xe7   : > { %1658 = vst [vmem:[%s1863_s29 + $0x18] sm:$0xff] %v1514_v17   ;;  %v1047_v6 = vadd.f32 %v1046_v62, %v984_v59 }
  0xe8   : > { %1666 = vst [vmem:[%s1863_s29 + $0x58] sm:$0xff] %v1554_v18  }
  0xeb   : > { %v1943_v35 = vpop.f32.mrf.mxu2  ;;  %v1991_v54 = vpop.f32.mrf.mxu3 }
  0xec   : > { %v639_v21 = vpop.f32.mrf.mxu0  ;;  %v1919_v22 = vpop.f32.mrf.mxu1  ;;  %v1594_v38 = vpack.c.bf16 %v1943_v35, %v1935_v31  ;;  %v1634_v57 = vpack.c.bf16 %v1991_v54, %v1983_v0 }
  0xed   : > { %v985_v1 = vmul.f32 %v639_v21, %v639_v21  ;;  %v914_v4 = vadd.f32 %v913_v8, %v639_v21 }
  0xee   : > { %1674 = vst [vmem:[%s1863_s29 + $0x98] sm:$0xff] %v1594_v38  }
  0xef   : > { %v1048_v11 = vadd.f32 %v1047_v6, %v985_v1  ;;  %1682 = vst [vmem:[%s1863_s29 + $0xd8] sm:$0xff] %v1634_v57  }
  0xf3   : > { %v1957_v45 = vpop.f32.mrf.mxu2 }
  0xf4   : > { %v641_v27 = vpop.f32.mrf.mxu0  ;;  %v1931_v28 = vpop.f32.mrf.mxu1 }
  0xf5   : > { %v1519_v29 = vpack.c.bf16 %v641_v27, %v639_v21  ;;  %v1559_v30 = vpack.c.bf16 %v1931_v28, %v1919_v22  ;;  %v986_v18 = vmul.f32 %v641_v27, %v641_v27  ;;  %v915_v26 = vadd.f32 %v914_v4, %v641_v27 }
  0xf7   : > { %1659 = vst [vmem:[%s1863_s29 + $0x20] sm:$0xff] %v1519_v29   ;;  %v1049_v29 = vadd.f32 %v1048_v11, %v986_v18  ;;  %v2005_v11 = vpop.f32.mrf.mxu3 }
  0xf8   : > { %1667 = vst [vmem:[%s1863_s29 + $0x60] sm:$0xff] %v1559_v30  }
  0xfb   : > { %v1965_v50 = vpop.f32.mrf.mxu2 }
  0xfc   : > { %v644_v33 = vpop.f32.mrf.mxu0  ;;  %v1941_v34 = vpop.f32.mrf.mxu1  ;;  %v1599_v53 = vpack.c.bf16 %v1965_v50, %v1957_v45 }
  0xfd   : > { %v987_v25 = vmul.f32 %v644_v33, %v644_v33  ;;  %v916_v15 = vadd.f32 %v915_v26, %v644_v33 }
  0xfe   : > { %1675 = vst [vmem:[%s1863_s29 + $0xa0] sm:$0xff] %v1599_v53  }
  0xff   : > { %v1050_v38 = vadd.f32 %v1049_v29, %v987_v25  ;;  %v994_v29 = vmul.f32 %v1865_v42, %v1865_v42 }
 0x103   : > { %v1981_v17 = vpop.f32.mrf.mxu2 }
 0x104   : > { %v646_v40 = vpop.f32.mrf.mxu0  ;;  %v1953_v41 = vpop.f32.mrf.mxu1 }
 0x105   : > { %v1524_v43 = vpack.c.bf16 %v646_v40, %v644_v33  ;;  %v1564_v44 = vpack.c.bf16 %v1953_v41, %v1941_v34  ;;  %v988_v30 = vmul.f32 %v646_v40, %v646_v40  ;;  %v917_v52 = vadd.f32 %v916_v15, %v646_v40 }
 0x107   : > { %1660 = vst [vmem:[%s1863_s29 + $0x28] sm:$0xff] %v1524_v43   ;;  %v1051_v21 = vadd.f32 %v1050_v38, %v988_v30  ;;  %v995_v38 = vmul.f32 %v1871_v49, %v1871_v49 }
 0x108   : > { %1668 = vst [vmem:[%s1863_s29 + $0x68] sm:$0xff] %v1564_v44  }
 0x10b   : > { %v1989_v53 = vpop.f32.mrf.mxu2 }
 0x10c   : > { %v649_v47 = vpop.f32.mrf.mxu0  ;;  %v1963_v48 = vpop.f32.mrf.mxu1  ;;  %v1604_v27 = vpack.c.bf16 %v1989_v53, %v1981_v17 }
 0x10d   : > { %v989_v39 = vmul.f32 %v649_v47, %v649_v47  ;;  %v918_v33 = vadd.f32 %v917_v52, %v649_v47  ;;  %v996_v52 = vmul.f32 %v1874_v55, %v1874_v55 }
 0x10e   : > { %1676 = vst [vmem:[%s1863_s29 + $0xa8] sm:$0xff] %v1604_v27   ;;  %v2023_v27 = vpop.f32.mrf.mxu3 }
 0x10f   : > { %v1052_v58 = vadd.f32 %v1051_v21, %v989_v39  ;;  %v1639_v57 = vpack.c.bf16 %v2023_v27, %v2005_v11 }
 0x111   : > { %1683 = vst [vmem:[%s1863_s29 + $0xe0] sm:$0xff] %v1639_v57  }
 0x114   : > { %v651_v3 = vpop.f32.mrf.mxu0  ;;  %v1977_v5 = vpop.f32.mrf.mxu1 }
 0x115   : > { %v1529_v9 = vpack.c.bf16 %v651_v3, %v649_v47  ;;  %v1569_v14 = vpack.c.bf16 %v1977_v5, %v1963_v48  ;;  %v990_v56 = vmul.f32 %v651_v3, %v651_v3  ;;  %v919_v61 = vadd.f32 %v918_v33, %v651_v3  ;;  %v2003_v47 = vpop.f32.mrf.mxu2 }
 0x116   : > { %v993_v3 = vmul.f32 %v1854_v37, %v1854_v37  ;;  %v1006_v57 = vmul.f32 %v1977_v5, %v1977_v5 }
 0x117   : > { %1661 = vst [vmem:[%s1863_s29 + $0x30] sm:$0xff] %v1529_v9   ;;  %v1053_v40 = vadd.f32 %v1052_v58, %v990_v56 }
 0x118   : > { %1669 = vst [vmem:[%s1863_s29 + $0x70] sm:$0xff] %v1569_v14  }
 0x11c   : > { %v654_v43 = vpop.f32.mrf.mxu0  ;;  %v1987_v44 = vpop.f32.mrf.mxu1 }
 0x11d   : > { %v991_v59 = vmul.f32 %v654_v43, %v654_v43  ;;  %v920_v62 = vadd.f32 %v919_v61, %v654_v43  ;;  %v2021_v56 = vpop.f32.mrf.mxu2 }
 0x11f   : > { %v1054_v1 = vadd.f32 %v1053_v40, %v991_v59  ;;  %v999_v40 = vmul.f32 %v1902_v12, %v1902_v12 }
 0x124   : > { %v656_v8 = vpop.f32.mrf.mxu0  ;;  %v1999_v9 = vpop.f32.mrf.mxu1 }
 0x125   : > { %v1534_v14 = vpack.c.bf16 %v656_v8, %v654_v43  ;;  %v921_v6 = vadd.f32 %v920_v62, %v656_v8  ;;  %v992_v18 = vmul.f32 %v656_v8, %v656_v8  ;;  %v1574_v4 = vpack.c.bf16 %v1999_v9, %v1987_v44 }
 0x126   : > { %v1000_v8 = vmul.f32 %v1909_v16, %v1909_v16 }
 0x127   : > { %1662 = vst [vmem:[%s1863_s29 + $0x38] sm:$0xff] %v1534_v14   ;;  %v922_v25 = vadd.f32 %v921_v6, %v1854_v37  ;;  %v1055_v26 = vadd.f32 %v1054_v1, %v992_v18  ;;  %v2043_v6 = vpop.f32.mrf.mxu2  ;;  %v2045_v18 = vpop.f32.mrf.mxu3 }
 0x128   : > { %1670 = vst [vmem:[%s1863_s29 + $0x78] sm:$0xff] %v1574_v4  }
 0x129   : > { %v923_v30 = vadd.f32 %v922_v25, %v1865_v42  ;;  %v1056_v15 = vadd.f32 %v1055_v26, %v993_v3  ;;  %v1609_v42 = vpack.c.bf16 %v2021_v56, %v2003_v47  ;;  %v1002_v25 = vmul.f32 %v1931_v28, %v1931_v28 }
 0x12b   : > { %v924_v39 = vadd.f32 %v923_v30, %v1871_v49  ;;  %v1057_v43 = vadd.f32 %v1056_v15, %v994_v29  ;;  %v997_v49 = vmul.f32 %v1882_v63, %v1882_v63  ;;  %1677 = vst [vmem:[%s1863_s29 + $0xb0] sm:$0xff] %v1609_v42   ;;  %v1004_v15 = vmul.f32 %v1953_v41, %v1953_v41 }
 0x12d   : > { %v925_v37 = vadd.f32 %v924_v39, %v1874_v55  ;;  %v1058_v21 = vadd.f32 %v1057_v43, %v995_v38  ;;  %v998_v55 = vmul.f32 %v1894_v7, %v1894_v7 }
 0x12f   : > { %v926_v33 = vadd.f32 %v925_v37, %v1882_v63  ;;  %v1059_v58 = vadd.f32 %v1058_v21, %v996_v52  ;;  %v2059_v39 = vpop.f32.mrf.mxu2  ;;  %v2061_v43 = vpop.f32.mrf.mxu3  ;;  %v1005_v37 = vmul.f32 %v1963_v48, %v1963_v48 }
 0x130   : > { %v1644_v52 = vpack.c.bf16 %v2061_v43, %v2045_v18 }
 0x131   : > { %v927_v59 = vadd.f32 %v926_v33, %v1894_v7  ;;  %v1060_v61 = vadd.f32 %v1059_v58, %v997_v49  ;;  %v1001_v7 = vmul.f32 %v1919_v22, %v1919_v22  ;;  %v1007_v58 = vmul.f32 %v1987_v44, %v1987_v44 }
 0x132   : > { %1684 = vst [vmem:[%s1863_s29 + $0xe8] sm:$0xff] %v1644_v52   ;;  %v1017_v52 = vmul.f32 %v1957_v45, %v1957_v45 }
 0x133   : > { %v1061_v62 = vadd.f32 %v1060_v61, %v998_v55  ;;  %v928_v1 = vadd.f32 %v927_v59, %v1902_v12 }
 0x135   : > { %v929_v63 = vadd.f32 %v928_v1, %v1909_v16  ;;  %v1062_v14 = vadd.f32 %v1061_v62, %v999_v40  ;;  %v1003_v16 = vmul.f32 %v1941_v34, %v1941_v34  ;;  %v1009_v40 = vmul.f32 %v1878_v60, %v1878_v60 }
 0x136   : > { %v1010_v1 = vmul.f32 %v1886_v2, %v1886_v2 }
 0x137   : > { %v930_v4 = vadd.f32 %v929_v63, %v1919_v22  ;;  %v1063_v3 = vadd.f32 %v1062_v14, %v1000_v8  ;;  %v2081_v61 = vpop.f32.mrf.mxu3  ;;  %v1011_v63 = vmul.f32 %v1898_v10, %v1898_v10 }
 0x139   : > { %v931_v12 = vadd.f32 %v930_v4, %v1931_v28  ;;  %v1064_v26 = vadd.f32 %v1063_v3, %v1001_v7  ;;  %v1614_v28 = vpack.c.bf16 %v2059_v39, %v2043_v6  ;;  %v1012_v7 = vmul.f32 %v1904_v13, %v1904_v13 }
 0x13b   : > { %v932_v29 = vadd.f32 %v931_v12, %v1941_v34  ;;  %v1065_v30 = vadd.f32 %v1064_v26, %v1002_v25  ;;  %1678 = vst [vmem:[%s1863_s29 + $0xb8] sm:$0xff] %v1614_v28  }
 0x13d   : > { %v933_v22 = vadd.f32 %v932_v29, %v1953_v41  ;;  %v1066_v38 = vadd.f32 %v1065_v30, %v1003_v16 }
 0x13f   : > { %v934_v34 = vadd.f32 %v933_v22, %v1963_v48  ;;  %v1067_v21 = vadd.f32 %v1066_v38, %v1004_v15  ;;  %v1008_v48 = vmul.f32 %v1999_v9, %v1999_v9  ;;  %v2095_v3 = vpop.f32.mrf.mxu3  ;;  %v1016_v22 = vmul.f32 %v1943_v35, %v1943_v35 }
 0x140   : > { %v1649_v25 = vpack.c.bf16 %v2095_v3, %v2081_v61 }
 0x141   : > { %v1068_v42 = vadd.f32 %v1067_v21, %v1005_v37  ;;  %v935_v41 = vadd.f32 %v934_v34, %v1977_v5  ;;  %v1018_v37 = vmul.f32 %v1965_v50, %v1965_v50 }
 0x142   : > { %1685 = vst [vmem:[%s1863_s29 + $0xf0] sm:$0xff] %v1649_v25  }
 0x143   : > { %v1069_v49 = vadd.f32 %v1068_v42, %v1006_v57  ;;  %v936_v33 = vadd.f32 %v935_v41, %v1987_v44  ;;  %v1019_v42 = vmul.f32 %v1981_v17, %v1981_v17 }
 0x145   : > { %v1070_v55 = vadd.f32 %v1069_v49, %v1007_v58  ;;  %v937_v59 = vadd.f32 %v936_v33, %v1999_v9  ;;  %v1020_v49 = vmul.f32 %v1989_v53, %v1989_v53 }
 0x147   : > { %v938_v5 = vadd.f32 %v937_v59, %v1878_v60  ;;  %v1071_v62 = vadd.f32 %v1070_v55, %v1008_v48  ;;  %v2112_v28 = vpop.f32.mrf.mxu3 }
 0x149   : > { %v939_v44 = vadd.f32 %v938_v5, %v1886_v2  ;;  %v1072_v8 = vadd.f32 %v1071_v62, %v1009_v40  ;;  %v1013_v2 = vmul.f32 %v1913_v19, %v1913_v19  ;;  %v1022_v40 = vmul.f32 %v2021_v56, %v2021_v56 }
 0x14a   : > { %v1023_v62 = vmul.f32 %v2043_v6, %v2043_v6 }
 0x14b   : > { %v940_v9 = vadd.f32 %v939_v44, %v1898_v10  ;;  %v1073_v14 = vadd.f32 %v1072_v8, %v1010_v1  ;;  %v1014_v10 = vmul.f32 %v1921_v23, %v1921_v23  ;;  %v1024_v8 = vmul.f32 %v2059_v39, %v2059_v39 }
 0x14d   : > { %v941_v4 = vadd.f32 %v940_v9, %v1904_v13  ;;  %v1074_v60 = vadd.f32 %v1073_v14, %v1011_v63  ;;  %v1015_v13 = vmul.f32 %v1935_v31, %v1935_v31 }
 0x14f   : > { %v942_v12 = vadd.f32 %v941_v4, %v1913_v19  ;;  %v1075_v26 = vadd.f32 %v1074_v60, %v1012_v7  ;;  %v776_v33 = vpop.f32.mrf.mxu3 }
 0x150   : > { %v1654_v58 = vpack.c.bf16 %v776_v33, %v2112_v28 }
 0x151   : > { %v943_v16 = vadd.f32 %v942_v12, %v1921_v23  ;;  %v1076_v29 = vadd.f32 %v1075_v26, %v1013_v2 }
 0x152   : > { %1686 = vst [vmem:[%s1863_s29 + $0xf8] sm:$0xff] %v1654_v58   ;;  %v1040_v58 = vmul.f32 %v776_v33, %v776_v33 }
 0x153   : > { %v1077_v30 = vadd.f32 %v1076_v29, %v1014_v10  ;;  %v944_v15 = vadd.f32 %v943_v16, %v1935_v31 }
 0x155   : > { %v945_v38 = vadd.f32 %v944_v15, %v1943_v35  ;;  %v1078_v19 = vadd.f32 %v1077_v30, %v1015_v13 }
 0x157   : > { %v946_v23 = vadd.f32 %v945_v38, %v1957_v45  ;;  %v1079_v34 = vadd.f32 %v1078_v19, %v1016_v22 }
 0x159   : > { %v947_v31 = vadd.f32 %v946_v23, %v1965_v50  ;;  %v1080_v21 = vadd.f32 %v1079_v34, %v1017_v52  ;;  %v1021_v50 = vmul.f32 %v2003_v47, %v2003_v47 }
 0x15b   : > { %v948_v35 = vadd.f32 %v947_v31, %v1981_v17  ;;  %v1081_v41 = vadd.f32 %v1080_v21, %v1018_v37  ;;  %v1036_v37 = vmul.f32 %v2061_v43, %v2061_v43 }
 0x15d   : > { %v949_v57 = vadd.f32 %v948_v35, %v1989_v53  ;;  %v1082_v45 = vadd.f32 %v1081_v41, %v1019_v42  ;;  %v1037_v42 = vmul.f32 %v2081_v61, %v2081_v61  ;;  %v1038_v41 = vmul.f32 %v2095_v3, %v2095_v3 }
 0x15f   : > { %v1083_v55 = vadd.f32 %v1082_v45, %v1020_v49  ;;  %v950_v59 = vadd.f32 %v949_v57, %v2003_v47  ;;  %v1025_v47 = vmul.f32 %v1915_v20, %v1915_v20 }
 0x161   : > { %v1084_v48 = vadd.f32 %v1083_v55, %v1021_v50  ;;  %v951_v17 = vadd.f32 %v950_v59, %v2021_v56  ;;  %v1026_v56 = vmul.f32 %v1923_v24, %v1923_v24 }
 0x163   : > { %v1085_v5 = vadd.f32 %v1084_v48, %v1022_v40  ;;  %v952_v53 = vadd.f32 %v951_v17, %v2043_v6  ;;  %v1027_v6 = vmul.f32 %v1937_v32, %v1937_v32 }
 0x165   : > { %v1086_v1 = vadd.f32 %v1085_v5, %v1023_v62  ;;  %v953_v44 = vadd.f32 %v952_v53, %v2059_v39  ;;  %v1028_v39 = vmul.f32 %v1945_v36, %v1945_v36 }
 0x167   : > { %v954_v63 = vadd.f32 %v953_v44, %v1915_v20  ;;  %v1087_v9 = vadd.f32 %v1086_v1, %v1024_v8  ;;  %v1029_v20 = vmul.f32 %v1959_v46, %v1959_v46 }
 0x169   : > { %v955_v14 = vadd.f32 %v954_v63, %v1923_v24  ;;  %v1088_v7 = vadd.f32 %v1087_v9, %v1025_v47  ;;  %v1030_v24 = vmul.f32 %v1967_v51, %v1967_v51 }
 0x16b   : > { %v956_v4 = vadd.f32 %v955_v14, %v1937_v32  ;;  %v1089_v60 = vadd.f32 %v1088_v7, %v1026_v56  ;;  %v1031_v32 = vmul.f32 %v1983_v0, %v1983_v0 }
 0x16d   : > { %v957_v25 = vadd.f32 %v956_v4, %v1945_v36  ;;  %v1090_v2 = vadd.f32 %v1089_v60, %v1027_v6  ;;  %v1032_v36 = vmul.f32 %v1991_v54, %v1991_v54 }
 0x16f   : > { %v958_v12 = vadd.f32 %v957_v25, %v1959_v46  ;;  %v1091_v26 = vadd.f32 %v1090_v2, %v1028_v39  ;;  %v1033_v46 = vmul.f32 %v2005_v11, %v2005_v11 }
 0x171   : > { %v959_v10 = vadd.f32 %v958_v12, %v1967_v51  ;;  %v1092_v16 = vadd.f32 %v1091_v26, %v1029_v20  ;;  %v1034_v51 = vmul.f32 %v2023_v27, %v2023_v27 }
 0x173   : > { %v1093_v29 = vadd.f32 %v1092_v16, %v1030_v24  ;;  %v960_v13 = vadd.f32 %v959_v10, %v1983_v0  ;;  %v1035_v0 = vmul.f32 %v2045_v18, %v2045_v18 }
 0x175   : > { %v961_v30 = vadd.f32 %v960_v13, %v1991_v54  ;;  %v1094_v15 = vadd.f32 %v1093_v29, %v1031_v32 }
 0x177   : > { %v962_v22 = vadd.f32 %v961_v30, %v2005_v11  ;;  %v1095_v38 = vadd.f32 %v1094_v15, %v1032_v36 }
 0x179   : > { %v963_v19 = vadd.f32 %v962_v22, %v2023_v27  ;;  %v1096_v52 = vadd.f32 %v1095_v38, %v1033_v46 }
 0x17b   : > { %v964_v23 = vadd.f32 %v963_v19, %v2045_v18  ;;  %v1097_v34 = vadd.f32 %v1096_v52, %v1034_v51 }
 0x17d   : > { %v965_v54 = vadd.f32 %v964_v23, %v2061_v43  ;;  %v1098_v31 = vadd.f32 %v1097_v34, %v1035_v0  ;;  %v1039_v43 = vmul.f32 %v2112_v28, %v2112_v28 }
 0x17f   : > { %v1099_v11 = vadd.f32 %v1098_v31, %v1036_v37  ;;  %v966_v21 = vadd.f32 %v965_v54, %v2081_v61 }
 0x181   : > { %v1100_v27 = vadd.f32 %v1099_v11, %v1037_v42  ;;  %v967_v35 = vadd.f32 %v966_v21, %v2095_v3 }
 0x183   : > { %v1101_v18 = vadd.f32 %v1100_v27, %v1038_v41  ;;  %v968_v57 = vadd.f32 %v967_v35, %v2112_v28 }
 0x185   : > { %v1102_v49 = vadd.f32 %v1101_v18, %v1039_v43  ;;  %v969_v45 = vadd.f32 %v968_v57, %v776_v33 }
 0x187   : > { %v970_v55 = vrot.slane %v969_v45, 4  ;;  %v1103_v59 = vadd.f32 %v1102_v49, %v1040_v58 }
 0x189   : > { %v971_v61 = vadd.f32 %v970_v55, %v969_v45  ;;  %v1104_v50 = vrot.slane %v1103_v59, 4 }
 0x18b   : > { %v972_v48 = vrot.slane %v971_v61, 2  ;;  %v1105_v17 = vadd.f32 %v1104_v50, %v1103_v59 }
 0x18d   : > { %v973_v40 = vadd.f32 %v972_v48, %v971_v61  ;;  %v1106_v5 = vrot.slane %v1105_v17, 2 }
 0x18f   : > { %v974_v3 = vrot.slane %v973_v40, 1  ;;  %v1107_v53 = vadd.f32 %v1106_v5, %v1105_v17 }
 0x191   : > { %v975_v62 = vadd.f32 %v974_v3, %v973_v40  ;;  %v1108_v28 = vrot.slane %v1107_v53, 1 }
 0x193   : > { %976 = vst [vmem:[%s283_s6] sm:$0x1] %v975_v62  ;;  %v1109_v33 = vadd.f32 %v1108_v28, %v1107_v53 }
 0x195   : > { %1110 = vst [vmem:[%s289_s9] sm:$0x1] %v1109_v33 }
 0x196 PF: > { %s15_s17 = sadd.s32 1, %s1757_s17   ;;  %s2207_s15 = smov %s1753_s16 }
 0x197   : > { %p12_p5 = scmp.ge.s32.totalorder %s15_s17, 6   ;;  %s2208_s16 = smov %s2210_s18 }
 0x199   :  { %14 = sbr.rel (!%p12_p5) target bundleno = 2 (0x2), region = 85 }

// kernel: generator_forward.16
= control target key start
LH: loop header
LB: loop body
LE: loop exit
PB: predicated region body
PF: predicated region fallthrough
CT: control target
= control target key end

     0   :  { %s1186_s12 = smov 0   ;;  %s1188_s13 = smov 0   ;;  %s1432_s0 = inlined_call_operand.vmem [shape: bf16[4,512,128], index: 0, kind: input, shape index: {}]   ;;  %s1433_s1 = inlined_call_operand.vmem [shape: f32[1,1,128], index: 1, kind: input, shape index: {}]   ;;  %s1434_s2 = inlined_call_operand.vmem [shape: f32[1,1,128], index: 2, kind: input, shape index: {}]   ;;  %s1435_s3 = inlined_call_operand.vmem [shape: bf16[4,512,128], index: 3, kind: output, shape index: {}]  }
   0x1   :  { %s1190_s14 = smov 0  }
   0x2 LB: > { %s25_s15 = sadd.s32 1, %s1160_s13  ;;  %p757_p0 = scmp.ge.s32.totalorder %s1164_s14, 1  ;;  %s1164_s14 = sphi %s1190_s14, %s13_s14   ;;  %s1160_s13 = sphi %s1188_s13, %s1437_s13   ;;  %s1156_s12 = sphi %s1186_s12, %s1436_s12  }
   0x3   : > { %p27_p1 = scmp.ge.s32.totalorder %s25_s15, 4  ;;  %p158_p2 = scmp.lt.s32.totalorder %s1164_s14, 5 }
   0x5   : > { %s1439_s15 = smov (%p27_p1, %s25_s15), 0  ;;  %p159_p3 = pnand %p757_p0, %p158_p2 }
   0x6   : > { %p191_p4 = scmp.lt.s32.totalorder (!%p159_p3), %s1156_s12, 3 }
   0x7   : > { %162 = sbr.rel (%p159_p3) target bundleno = 94 (0x5e), region = 32 }
   0xc   : > { %s1441_s12 = smov (!%p191_p4, %s1156_s12), 3  ;;  %v1217_v0 = vld [vmem:[%s1433_s1] ss:$0 sm:$0xff] }
   0xd   : > { %s764_s16 = sshll.u32 %s1441_s12, 8  ;;  %v1225_v6 = vld [vmem:[%s1434_s2] ss:$0 sm:$0xff] }
   0xe   : > { %s1212_s19 = scalar_lea.vmem %s1432_s0, %s764_s16  ;;  %s1251_s26 = scalar_lea.vmem %s1435_s3, %s764_s16 }
   0xf   : > { %v767_v1 = vld [vmem:[%s1212_s19] sm:$0xff]   ;;  %v1054_v2 = vld [vmem:[%s1212_s19 + $0x8] sm:$0xff]   ;;  %v1055_v3 = vld [vmem:[%s1212_s19 + $0x10] sm:$0xff]  }
  0x10   : > { %v768_v4 = vunpack.c.l.bf16 %v767_v1  ;;  %v769_v5 = vunpack.c.h.bf16 %v767_v1  ;;  %v772_v7 = vunpack.c.l.bf16 %v1054_v2  ;;  %v773_v8 = vunpack.c.h.bf16 %v1054_v2  ;;  %v1056_v9 = vld [vmem:[%s1212_s19 + $0x18] sm:$0xff]   ;;  %v1057_v30 = vld [vmem:[%s1212_s19 + $0x20] sm:$0xff]   ;;  %v1058_v35 = vld [vmem:[%s1212_s19 + $0x28] sm:$0xff]  }
  0x11   : > { %v776_v10 = vunpack.c.l.bf16 %v1055_v3  ;;  %v777_v11 = vunpack.c.h.bf16 %v1055_v3  ;;  %v780_v12 = vunpack.c.l.bf16 %v1056_v9  ;;  %v781_v13 = vunpack.c.h.bf16 %v1056_v9  ;;  %v1059_v40 = vld [vmem:[%s1212_s19 + $0x30] sm:$0xff]   ;;  %v1060_v45 = vld [vmem:[%s1212_s19 + $0x38] sm:$0xff]   ;;  %v1061_v3 = vld [vmem:[%s1212_s19 + $0x40] sm:$0xff]  }
  0x12   : > { %v342_v14 = vmul.f32 %v1217_v0, %v768_v4  ;;  %v343_v15 = vmul.f32 %v1217_v0, %v769_v5  ;;  %v344_v16 = vmul.f32 %v1217_v0, %v772_v7  ;;  %v345_v17 = vmul.f32 %v1217_v0, %v773_v8 }
  0x13   : > { %v346_v18 = vmul.f32 %v1217_v0, %v776_v10  ;;  %v347_v19 = vmul.f32 %v1217_v0, %v777_v11  ;;  %v348_v20 = vmul.f32 %v1217_v0, %v780_v12  ;;  %v349_v21 = vmul.f32 %v1217_v0, %v781_v13  ;;  %v1062_v13 = vld [vmem:[%s1212_s19 + $0x48] sm:$0xff]  }
  0x14   : > { %v410_v22 = vadd.f32 %v1225_v6, %v342_v14  ;;  %v411_v23 = vadd.f32 %v1225_v6, %v343_v15  ;;  %v412_v24 = vadd.f32 %v1225_v6, %v344_v16  ;;  %v413_v25 = vadd.f32 %v1225_v6, %v345_v17 }
  0x15   : > { %v414_v26 = vadd.f32 %v1225_v6, %v346_v18  ;;  %v415_v27 = vadd.f32 %v1225_v6, %v347_v19  ;;  %v416_v28 = vadd.f32 %v1225_v6, %v348_v20  ;;  %v417_v29 = vadd.f32 %v1225_v6, %v349_v21  ;;  %v1063_v18 = vld [vmem:[%s1212_s19 + $0x50] sm:$0xff]  }
  0x16   : > { %v474_v31 = vmax.f32 %v410_v22, 0.0  ;;  %v475_v32 = vmax.f32 %v411_v23, 0.0  ;;  %v476_v33 = vmax.f32 %v412_v24, 0.0  ;;  %v477_v34 = vmax.f32 %v413_v25, 0.0  ;;  %v1064_v23 = vld [vmem:[%s1212_s19 + $0x58] sm:$0xff]  }
  0x17   : > { %v478_v36 = vmax.f32 %v414_v26, 0.0  ;;  %v479_v37 = vmax.f32 %v415_v27, 0.0  ;;  %v480_v38 = vmax.f32 %v416_v28, 0.0  ;;  %v481_v39 = vmax.f32 %v417_v29, 0.0 }
  0x18   : > { %v897_v41 = vpack.c.bf16 %v475_v32, %v474_v31  ;;  %v902_v42 = vpack.c.bf16 %v477_v34, %v476_v33  ;;  %v784_v43 = vunpack.c.l.bf16 %v1057_v30  ;;  %v785_v44 = vunpack.c.h.bf16 %v1057_v30 }
  0x19   : > { %v907_v46 = vpack.c.bf16 %v479_v37, %v478_v36  ;;  %v912_v47 = vpack.c.bf16 %v481_v39, %v480_v38  ;;  %v788_v48 = vunpack.c.l.bf16 %v1058_v35  ;;  %v789_v49 = vunpack.c.h.bf16 %v1058_v35 }
  0x1a   : > { %898 = vst [vmem:[%s1251_s26] sm:$0xff] %v897_v41   ;;  %v350_v50 = vmul.f32 %v1217_v0, %v784_v43  ;;  %v351_v51 = vmul.f32 %v1217_v0, %v785_v44  ;;  %v792_v52 = vunpack.c.l.bf16 %v1059_v40  ;;  %v793_v53 = vunpack.c.h.bf16 %v1059_v40  ;;  %v1065_v40 = vld [vmem:[%s1212_s19 + $0x60] sm:$0xff]  }
  0x1b   : > { %1085 = vst [vmem:[%s1251_s26 + $0x8] sm:$0xff] %v902_v42   ;;  %v352_v54 = vmul.f32 %v1217_v0, %v788_v48  ;;  %v353_v55 = vmul.f32 %v1217_v0, %v789_v49  ;;  %v796_v56 = vunpack.c.l.bf16 %v1060_v45  ;;  %v797_v57 = vunpack.c.h.bf16 %v1060_v45 }
  0x1c   : > { %1086 = vst [vmem:[%s1251_s26 + $0x10] sm:$0xff] %v907_v46   ;;  %v418_v58 = vadd.f32 %v1225_v6, %v350_v50  ;;  %v419_v59 = vadd.f32 %v1225_v6, %v351_v51  ;;  %v354_v60 = vmul.f32 %v1217_v0, %v792_v52  ;;  %v355_v61 = vmul.f32 %v1217_v0, %v793_v53  ;;  %v1066_v53 = vld [vmem:[%s1212_s19 + $0x68] sm:$0xff]  }
  0x1d   : > { %1087 = vst [vmem:[%s1251_s26 + $0x18] sm:$0xff] %v912_v47   ;;  %v420_v62 = vadd.f32 %v1225_v6, %v352_v54  ;;  %v421_v63 = vadd.f32 %v1225_v6, %v353_v55  ;;  %v356_v1 = vmul.f32 %v1217_v0, %v796_v56  ;;  %v357_v2 = vmul.f32 %v1217_v0, %v797_v57 }
  0x1e   : > { %v482_v4 = vmax.f32 %v418_v58, 0.0  ;;  %v483_v5 = vmax.f32 %v419_v59, 0.0  ;;  %v422_v7 = vadd.f32 %v1225_v6, %v354_v60  ;;  %v423_v8 = vadd.f32 %v1225_v6, %v355_v61  ;;  %v1067_v58 = vld [vmem:[%s1212_s19 + $0x70] sm:$0xff]  }
  0x1f   : > { %v484_v9 = vmax.f32 %v420_v62, 0.0  ;;  %v485_v10 = vmax.f32 %v421_v63, 0.0  ;;  %v424_v11 = vadd.f32 %v1225_v6, %v356_v1  ;;  %v425_v12 = vadd.f32 %v1225_v6, %v357_v2  ;;  %v1068_v63 = vld [vmem:[%s1212_s19 + $0x78] sm:$0xff]  }
  0x20   : > { %v917_v14 = vpack.c.bf16 %v483_v5, %v482_v4  ;;  %v486_v15 = vmax.f32 %v422_v7, 0.0  ;;  %v487_v16 = vmax.f32 %v423_v8, 0.0  ;;  %v800_v17 = vunpack.c.l.bf16 %v1061_v3 }
  0x21   : > { %v922_v19 = vpack.c.bf16 %v485_v10, %v484_v9  ;;  %v488_v20 = vmax.f32 %v424_v11, 0.0  ;;  %v489_v21 = vmax.f32 %v425_v12, 0.0  ;;  %v801_v22 = vunpack.c.h.bf16 %v1061_v3 }
  0x22   : > { %1088 = vst [vmem:[%s1251_s26 + $0x20] sm:$0xff] %v917_v14   ;;  %v927_v24 = vpack.c.bf16 %v487_v16, %v486_v15  ;;  %v358_v25 = vmul.f32 %v1217_v0, %v800_v17  ;;  %v804_v26 = vunpack.c.l.bf16 %v1062_v13  ;;  %v805_v27 = vunpack.c.h.bf16 %v1062_v13  ;;  %v1069_v14 = vld [vmem:[%s1212_s19 + $0x80] sm:$0xff]  }
  0x23   : > { %1089 = vst [vmem:[%s1251_s26 + $0x28] sm:$0xff] %v922_v19   ;;  %v932_v28 = vpack.c.bf16 %v489_v21, %v488_v20  ;;  %v359_v29 = vmul.f32 %v1217_v0, %v801_v22  ;;  %v808_v30 = vunpack.c.l.bf16 %v1063_v18  ;;  %v809_v31 = vunpack.c.h.bf16 %v1063_v18 }
  0x24   : > { %1090 = vst [vmem:[%s1251_s26 + $0x30] sm:$0xff] %v927_v24   ;;  %v426_v32 = vadd.f32 %v1225_v6, %v358_v25  ;;  %v360_v33 = vmul.f32 %v1217_v0, %v804_v26  ;;  %v361_v34 = vmul.f32 %v1217_v0, %v805_v27  ;;  %v812_v35 = vunpack.c.l.bf16 %v1064_v23 }
  0x25   : > { %1091 = vst [vmem:[%s1251_s26 + $0x38] sm:$0xff] %v932_v28   ;;  %v427_v36 = vadd.f32 %v1225_v6, %v359_v29  ;;  %v362_v37 = vmul.f32 %v1217_v0, %v808_v30  ;;  %v363_v38 = vmul.f32 %v1217_v0, %v809_v31  ;;  %v813_v39 = vunpack.c.h.bf16 %v1064_v23  ;;  %v1070_v31 = vld [vmem:[%s1212_s19 + $0x88] sm:$0xff]  }
  0x26   : > { %v490_v41 = vmax.f32 %v426_v32, 0.0  ;;  %v428_v42 = vadd.f32 %v1225_v6, %v360_v33  ;;  %v429_v43 = vadd.f32 %v1225_v6, %v361_v34  ;;  %v364_v44 = vmul.f32 %v1217_v0, %v812_v35 }
  0x27   : > { %v491_v45 = vmax.f32 %v427_v36, 0.0  ;;  %v430_v46 = vadd.f32 %v1225_v6, %v362_v37  ;;  %v431_v47 = vadd.f32 %v1225_v6, %v363_v38  ;;  %v365_v48 = vmul.f32 %v1217_v0, %v813_v39  ;;  %v1071_v36 = vld [vmem:[%s1212_s19 + $0x90] sm:$0xff]  }
  0x28   : > { %v492_v49 = vmax.f32 %v428_v42, 0.0  ;;  %v493_v50 = vmax.f32 %v429_v43, 0.0  ;;  %v432_v51 = vadd.f32 %v1225_v6, %v364_v44  ;;  %v816_v52 = vunpack.c.l.bf16 %v1065_v40 }
  0x29   : > { %v937_v54 = vpack.c.bf16 %v491_v45, %v490_v41  ;;  %v494_v55 = vmax.f32 %v430_v46, 0.0  ;;  %v495_v56 = vmax.f32 %v431_v47, 0.0  ;;  %v433_v57 = vadd.f32 %v1225_v6, %v365_v48  ;;  %v1072_v41 = vld [vmem:[%s1212_s19 + $0x98] sm:$0xff]  }
  0x2a   : > { %v942_v59 = vpack.c.bf16 %v493_v50, %v492_v49  ;;  %v496_v60 = vmax.f32 %v432_v51, 0.0  ;;  %v817_v61 = vunpack.c.h.bf16 %v1065_v40  ;;  %v366_v62 = vmul.f32 %v1217_v0, %v816_v52 }
  0x2b   : > { %1092 = vst [vmem:[%s1251_s26 + $0x40] sm:$0xff] %v937_v54   ;;  %v947_v1 = vpack.c.bf16 %v495_v56, %v494_v55  ;;  %v497_v2 = vmax.f32 %v433_v57, 0.0  ;;  %v820_v3 = vunpack.c.l.bf16 %v1066_v53  ;;  %v821_v4 = vunpack.c.h.bf16 %v1066_v53  ;;  %v1073_v54 = vld [vmem:[%s1212_s19 + $0xa0] sm:$0xff]  }
  0x2c   : > { %1093 = vst [vmem:[%s1251_s26 + $0x48] sm:$0xff] %v942_v59   ;;  %v367_v5 = vmul.f32 %v1217_v0, %v817_v61  ;;  %v434_v7 = vadd.f32 %v1225_v6, %v366_v62  ;;  %v824_v8 = vunpack.c.l.bf16 %v1067_v58  ;;  %v825_v9 = vunpack.c.h.bf16 %v1067_v58 }
  0x2d   : > { %1094 = vst [vmem:[%s1251_s26 + $0x50] sm:$0xff] %v947_v1   ;;  %v952_v10 = vpack.c.bf16 %v497_v2, %v496_v60  ;;  %v368_v11 = vmul.f32 %v1217_v0, %v820_v3  ;;  %v369_v12 = vmul.f32 %v1217_v0, %v821_v4  ;;  %v828_v13 = vunpack.c.l.bf16 %v1068_v63  ;;  %v1074_v4 = vld [vmem:[%s1212_s19 + $0xa8] sm:$0xff]  }
  0x2e   : > { %v435_v15 = vadd.f32 %v1225_v6, %v367_v5  ;;  %v498_v16 = vmax.f32 %v434_v7, 0.0  ;;  %v370_v17 = vmul.f32 %v1217_v0, %v824_v8  ;;  %v371_v18 = vmul.f32 %v1217_v0, %v825_v9 }
  0x2f   : > { %1095 = vst [vmem:[%s1251_s26 + $0x58] sm:$0xff] %v952_v10   ;;  %v436_v19 = vadd.f32 %v1225_v6, %v368_v11  ;;  %v437_v20 = vadd.f32 %v1225_v6, %v369_v12  ;;  %v829_v21 = vunpack.c.h.bf16 %v1068_v63  ;;  %v372_v22 = vmul.f32 %v1217_v0, %v828_v13 }
  0x30   : > { %v499_v23 = vmax.f32 %v435_v15, 0.0  ;;  %v438_v24 = vadd.f32 %v1225_v6, %v370_v17  ;;  %v439_v25 = vadd.f32 %v1225_v6, %v371_v18  ;;  %v832_v26 = vunpack.c.l.bf16 %v1069_v14 }
  0x31   : > { %v500_v27 = vmax.f32 %v436_v19, 0.0  ;;  %v501_v28 = vmax.f32 %v437_v20, 0.0  ;;  %v373_v29 = vmul.f32 %v1217_v0, %v829_v21  ;;  %v440_v30 = vadd.f32 %v1225_v6, %v372_v22  ;;  %v1076_v19 = vld [vmem:[%s1212_s19 + $0xb8] sm:$0xff]  }
  0x32   : > { %v957_v32 = vpack.c.bf16 %v499_v23, %v498_v16  ;;  %v502_v33 = vmax.f32 %v438_v24, 0.0  ;;  %v503_v34 = vmax.f32 %v439_v25, 0.0  ;;  %v833_v35 = vunpack.c.h.bf16 %v1069_v14  ;;  %v1075_v14 = vld [vmem:[%s1212_s19 + $0xb0] sm:$0xff]  }
  0x33   : > { %v962_v37 = vpack.c.bf16 %v501_v28, %v500_v27  ;;  %v441_v38 = vadd.f32 %v1225_v6, %v373_v29  ;;  %v504_v39 = vmax.f32 %v440_v30, 0.0  ;;  %v374_v40 = vmul.f32 %v1217_v0, %v832_v26 }
  0x34   : > { %1096 = vst [vmem:[%s1251_s26 + $0x60] sm:$0xff] %v957_v32   ;;  %v967_v42 = vpack.c.bf16 %v503_v34, %v502_v33  ;;  %v375_v43 = vmul.f32 %v1217_v0, %v833_v35  ;;  %v836_v44 = vunpack.c.l.bf16 %v1070_v31  ;;  %v837_v45 = vunpack.c.h.bf16 %v1070_v31  ;;  %v1077_v32 = vld [vmem:[%s1212_s19 + $0xc0] sm:$0xff]  }
  0x35   : > { %1097 = vst [vmem:[%s1251_s26 + $0x68] sm:$0xff] %v962_v37   ;;  %v505_v46 = vmax.f32 %v441_v38, 0.0  ;;  %v442_v47 = vadd.f32 %v1225_v6, %v374_v40  ;;  %v840_v48 = vunpack.c.l.bf16 %v1071_v36  ;;  %v841_v49 = vunpack.c.h.bf16 %v1071_v36 }
  0x36   : > { %1098 = vst [vmem:[%s1251_s26 + $0x70] sm:$0xff] %v967_v42   ;;  %v443_v50 = vadd.f32 %v1225_v6, %v375_v43  ;;  %v376_v51 = vmul.f32 %v1217_v0, %v836_v44  ;;  %v377_v52 = vmul.f32 %v1217_v0, %v837_v45  ;;  %v844_v53 = vunpack.c.l.bf16 %v1072_v41  ;;  %v1078_v45 = vld [vmem:[%s1212_s19 + $0xc8] sm:$0xff]  }
  0x37   : > { %v972_v55 = vpack.c.bf16 %v505_v46, %v504_v39  ;;  %v506_v56 = vmax.f32 %v442_v47, 0.0  ;;  %v378_v57 = vmul.f32 %v1217_v0, %v840_v48  ;;  %v379_v58 = vmul.f32 %v1217_v0, %v841_v49 }
  0x38   : > { %v507_v59 = vmax.f32 %v443_v50, 0.0  ;;  %v444_v60 = vadd.f32 %v1225_v6, %v376_v51  ;;  %v445_v61 = vadd.f32 %v1225_v6, %v377_v52  ;;  %v845_v62 = vunpack.c.h.bf16 %v1072_v41 }
  0x39   : > { %1099 = vst [vmem:[%s1251_s26 + $0x78] sm:$0xff] %v972_v55   ;;  %v446_v63 = vadd.f32 %v1225_v6, %v378_v57  ;;  %v447_v1 = vadd.f32 %v1225_v6, %v379_v58  ;;  %v380_v2 = vmul.f32 %v1217_v0, %v844_v53  ;;  %v848_v3 = vunpack.c.l.bf16 %v1073_v54 }
  0x3a   : > { %v977_v5 = vpack.c.bf16 %v507_v59, %v506_v56  ;;  %v508_v7 = vmax.f32 %v444_v60, 0.0  ;;  %v509_v8 = vmax.f32 %v445_v61, 0.0  ;;  %v381_v9 = vmul.f32 %v1217_v0, %v845_v62 }
  0x3b   : > { %v510_v10 = vmax.f32 %v446_v63, 0.0  ;;  %v511_v11 = vmax.f32 %v447_v1, 0.0  ;;  %v448_v12 = vadd.f32 %v1225_v6, %v380_v2  ;;  %v849_v13 = vunpack.c.h.bf16 %v1073_v54  ;;  %v1079_v54 = vld [vmem:[%s1212_s19 + $0xd0] sm:$0xff]   ;;  %v1080_v63 = vld [vmem:[%s1212_s19 + $0xd8] sm:$0xff]  }
  0x3c   : > { %1100 = vst [vmem:[%s1251_s26 + $0x80] sm:$0xff] %v977_v5   ;;  %v982_v15 = vpack.c.bf16 %v509_v8, %v508_v7  ;;  %v449_v16 = vadd.f32 %v1225_v6, %v381_v9  ;;  %v382_v17 = vmul.f32 %v1217_v0, %v848_v3  ;;  %v852_v18 = vunpack.c.l.bf16 %v1074_v4 }
  0x3d   : > { %v987_v20 = vpack.c.bf16 %v511_v11, %v510_v10  ;;  %v512_v21 = vmax.f32 %v448_v12, 0.0  ;;  %v383_v22 = vmul.f32 %v1217_v0, %v849_v13  ;;  %v853_v23 = vunpack.c.h.bf16 %v1074_v4  ;;  %v1081_v10 = vld [vmem:[%s1212_s19 + $0xe0] sm:$0xff]  }
  0x3e   : > { %1101 = vst [vmem:[%s1251_s26 + $0x88] sm:$0xff] %v982_v15   ;;  %v513_v24 = vmax.f32 %v449_v16, 0.0  ;;  %v450_v25 = vadd.f32 %v1225_v6, %v382_v17  ;;  %v384_v26 = vmul.f32 %v1217_v0, %v852_v18  ;;  %v856_v27 = vunpack.c.l.bf16 %v1075_v14 }
  0x3f   : > { %1102 = vst [vmem:[%s1251_s26 + $0x90] sm:$0xff] %v987_v20   ;;  %v451_v28 = vadd.f32 %v1225_v6, %v383_v22  ;;  %v385_v29 = vmul.f32 %v1217_v0, %v853_v23  ;;  %v857_v30 = vunpack.c.h.bf16 %v1075_v14  ;;  %v860_v31 = vunpack.c.l.bf16 %v1076_v19  ;;  %v1082_v23 = vld [vmem:[%s1212_s19 + $0xe8] sm:$0xff]  }
  0x40   : > { %v992_v33 = vpack.c.bf16 %v513_v24, %v512_v21  ;;  %v514_v34 = vmax.f32 %v450_v25, 0.0  ;;  %v452_v35 = vadd.f32 %v1225_v6, %v384_v26  ;;  %v386_v36 = vmul.f32 %v1217_v0, %v856_v27 }
  0x41   : > { %v515_v37 = vmax.f32 %v451_v28, 0.0  ;;  %v453_v38 = vadd.f32 %v1225_v6, %v385_v29  ;;  %v387_v39 = vmul.f32 %v1217_v0, %v857_v30  ;;  %v861_v40 = vunpack.c.h.bf16 %v1076_v19 }
  0x42   : > { %1103 = vst [vmem:[%s1251_s26 + $0x98] sm:$0xff] %v992_v33   ;;  %v516_v41 = vmax.f32 %v452_v35, 0.0  ;;  %v454_v42 = vadd.f32 %v1225_v6, %v386_v36  ;;  %v388_v43 = vmul.f32 %v1217_v0, %v860_v31  ;;  %v864_v44 = vunpack.c.l.bf16 %v1077_v32 }
  0x43   : > { %v997_v46 = vpack.c.bf16 %v515_v37, %v514_v34  ;;  %v517_v47 = vmax.f32 %v453_v38, 0.0  ;;  %v455_v48 = vadd.f32 %v1225_v6, %v387_v39  ;;  %v389_v49 = vmul.f32 %v1217_v0, %v861_v40 }
  0x44   : > { %v518_v50 = vmax.f32 %v454_v42, 0.0  ;;  %v456_v51 = vadd.f32 %v1225_v6, %v388_v43  ;;  %v865_v52 = vunpack.c.h.bf16 %v1077_v32  ;;  %v390_v53 = vmul.f32 %v1217_v0, %v864_v44  ;;  %v1083_v32 = vld [vmem:[%s1212_s19 + $0xf0] sm:$0xff]  }
  0x45   : > { %1104 = vst [vmem:[%s1251_s26 + $0xa0] sm:$0xff] %v997_v46   ;;  %v1002_v55 = vpack.c.bf16 %v517_v47, %v516_v41  ;;  %v519_v56 = vmax.f32 %v455_v48, 0.0  ;;  %v457_v57 = vadd.f32 %v1225_v6, %v389_v49  ;;  %v868_v58 = vunpack.c.l.bf16 %v1078_v45  ;;  %v1084_v41 = vld [vmem:[%s1212_s19 + $0xf8] sm:$0xff]  }
  0x46   : > { %v520_v59 = vmax.f32 %v456_v51, 0.0  ;;  %v391_v60 = vmul.f32 %v1217_v0, %v865_v52  ;;  %v458_v61 = vadd.f32 %v1225_v6, %v390_v53  ;;  %v869_v62 = vunpack.c.h.bf16 %v1078_v45 }
  0x47   : > { %1105 = vst [vmem:[%s1251_s26 + $0xa8] sm:$0xff] %v1002_v55   ;;  %v1007_v1 = vpack.c.bf16 %v519_v56, %v518_v50  ;;  %v521_v2 = vmax.f32 %v457_v57, 0.0  ;;  %v392_v3 = vmul.f32 %v1217_v0, %v868_v58  ;;  %v872_v4 = vunpack.c.l.bf16 %v1079_v54 }
  0x48   : > { %v459_v5 = vadd.f32 %v1225_v6, %v391_v60  ;;  %v522_v7 = vmax.f32 %v458_v61, 0.0  ;;  %v393_v8 = vmul.f32 %v1217_v0, %v869_v62  ;;  %v873_v9 = vunpack.c.h.bf16 %v1079_v54 }
  0x49   : > { %1106 = vst [vmem:[%s1251_s26 + $0xb0] sm:$0xff] %v1007_v1   ;;  %v1012_v11 = vpack.c.bf16 %v521_v2, %v520_v59  ;;  %v460_v12 = vadd.f32 %v1225_v6, %v392_v3  ;;  %v394_v13 = vmul.f32 %v1217_v0, %v872_v4  ;;  %v876_v14 = vunpack.c.l.bf16 %v1080_v63 }
  0x4a   : > { %v523_v15 = vmax.f32 %v459_v5, 0.0  ;;  %v461_v16 = vadd.f32 %v1225_v6, %v393_v8  ;;  %v395_v17 = vmul.f32 %v1217_v0, %v873_v9  ;;  %v877_v18 = vunpack.c.h.bf16 %v1080_v63 }
  0x4b   : > { %1107 = vst [vmem:[%s1251_s26 + $0xb8] sm:$0xff] %v1012_v11   ;;  %v524_v19 = vmax.f32 %v460_v12, 0.0  ;;  %v462_v20 = vadd.f32 %v1225_v6, %v394_v13  ;;  %v396_v21 = vmul.f32 %v1217_v0, %v876_v14  ;;  %v880_v22 = vunpack.c.l.bf16 %v1081_v10 }
  0x4c   : > { %v1017_v24 = vpack.c.bf16 %v523_v15, %v522_v7  ;;  %v525_v25 = vmax.f32 %v461_v16, 0.0  ;;  %v463_v26 = vadd.f32 %v1225_v6, %v395_v17  ;;  %v397_v27 = vmul.f32 %v1217_v0, %v877_v18 }
  0x4d   : > { %v526_v28 = vmax.f32 %v462_v20, 0.0  ;;  %v464_v29 = vadd.f32 %v1225_v6, %v396_v21  ;;  %v881_v30 = vunpack.c.h.bf16 %v1081_v10  ;;  %v398_v31 = vmul.f32 %v1217_v0, %v880_v22 }
  0x4e   : > { %1108 = vst [vmem:[%s1251_s26 + $0xc0] sm:$0xff] %v1017_v24   ;;  %v1022_v33 = vpack.c.bf16 %v525_v25, %v524_v19  ;;  %v527_v34 = vmax.f32 %v463_v26, 0.0  ;;  %v465_v35 = vadd.f32 %v1225_v6, %v397_v27  ;;  %v884_v36 = vunpack.c.l.bf16 %v1082_v23 }
  0x4f   : > { %v528_v37 = vmax.f32 %v464_v29, 0.0  ;;  %v399_v38 = vmul.f32 %v1217_v0, %v881_v30  ;;  %v466_v39 = vadd.f32 %v1225_v6, %v398_v31  ;;  %v885_v40 = vunpack.c.h.bf16 %v1082_v23 }
  0x50   : > { %1109 = vst [vmem:[%s1251_s26 + $0xc8] sm:$0xff] %v1022_v33   ;;  %v1027_v42 = vpack.c.bf16 %v527_v34, %v526_v28  ;;  %v529_v43 = vmax.f32 %v465_v35, 0.0  ;;  %v400_v44 = vmul.f32 %v1217_v0, %v884_v36  ;;  %v888_v45 = vunpack.c.l.bf16 %v1083_v32 }
  0x51   : > { %v467_v46 = vadd.f32 %v1225_v6, %v399_v38  ;;  %v530_v47 = vmax.f32 %v466_v39, 0.0  ;;  %v401_v48 = vmul.f32 %v1217_v0, %v885_v40  ;;  %v889_v49 = vunpack.c.h.bf16 %v1083_v32 }
  0x52   : > { %1110 = vst [vmem:[%s1251_s26 + $0xd0] sm:$0xff] %v1027_v42   ;;  %v1032_v50 = vpack.c.bf16 %v529_v43, %v528_v37  ;;  %v468_v51 = vadd.f32 %v1225_v6, %v400_v44  ;;  %v402_v52 = vmul.f32 %v1217_v0, %v888_v45  ;;  %v892_v53 = vunpack.c.l.bf16 %v1084_v41 }
  0x53   : > { %v531_v54 = vmax.f32 %v467_v46, 0.0  ;;  %v469_v55 = vadd.f32 %v1225_v6, %v401_v48  ;;  %v403_v56 = vmul.f32 %v1217_v0, %v889_v49  ;;  %v893_v57 = vunpack.c.h.bf16 %v1084_v41 }
  0x54   : > { %1111 = vst [vmem:[%s1251_s26 + $0xd8] sm:$0xff] %v1032_v50   ;;  %v532_v58 = vmax.f32 %v468_v51, 0.0  ;;  %v470_v59 = vadd.f32 %v1225_v6, %v402_v52  ;;  %v404_v60 = vmul.f32 %v1217_v0, %v892_v53 }
  0x55   : > { %v1037_v61 = vpack.c.bf16 %v531_v54, %v530_v47  ;;  %v533_v62 = vmax.f32 %v469_v55, 0.0  ;;  %v471_v63 = vadd.f32 %v1225_v6, %v403_v56  ;;  %v405_v1 = vmul.f32 %v1217_v0, %v893_v57 }
  0x56   : > { %v534_v2 = vmax.f32 %v470_v59, 0.0  ;;  %v472_v3 = vadd.f32 %v1225_v6, %v404_v60 }
  0x57   : > { %1112 = vst [vmem:[%s1251_s26 + $0xe0] sm:$0xff] %v1037_v61   ;;  %v1042_v4 = vpack.c.bf16 %v533_v62, %v532_v58  ;;  %v535_v5 = vmax.f32 %v471_v63, 0.0  ;;  %v473_v7 = vadd.f32 %v1225_v6, %v405_v1 }
  0x58   : > { %v536_v8 = vmax.f32 %v472_v3, 0.0 }
  0x59   : > { %1113 = vst [vmem:[%s1251_s26 + $0xe8] sm:$0xff] %v1042_v4   ;;  %v1047_v9 = vpack.c.bf16 %v535_v5, %v534_v2  ;;  %v537_v10 = vmax.f32 %v473_v7, 0.0 }
  0x5b   : > { %1114 = vst [vmem:[%s1251_s26 + $0xf0] sm:$0xff] %v1047_v9   ;;  %v1052_v11 = vpack.c.bf16 %v537_v10, %v536_v8 }
  0x5d   : > { %1115 = vst [vmem:[%s1251_s26 + $0xf8] sm:$0xff] %v1052_v11  }
  0x5e PF: > { %s13_s14 = sadd.s32 1, %s1164_s14   ;;  %s1436_s12 = smov %s1160_s13 }
  0x5f   : > { %p10_p5 = scmp.ge.s32.totalorder %s13_s14, 6   ;;  %s1437_s13 = smov %s1439_s15 }
  0x61   :  { %12 = sbr.rel (!%p10_p5) target bundleno = 2 (0x2), region = 62 }

// kernel: generator_forward.17
= control target key start
LH: loop header
LB: loop body
LE: loop exit
PB: predicated region body
PF: predicated region fallthrough
CT: control target
= control target key end

     0   :  { %s5230_s12 = smov 0   ;;  %s5232_s13 = smov 0   ;;  %s5933_s0 = inlined_call_operand.vmem [shape: bf16[4,2048,64], index: 0, kind: input, shape index: {}]   ;;  %s5934_s1 = inlined_call_operand.vmem [shape: bf16[4,64,128], index: 1, kind: input, shape index: {}]   ;;  %s5935_s2 = inlined_call_operand.vmem [shape: f32[1,1,128], index: 2, kind: input, shape index: {}]   ;;  %s5936_s3 = inlined_call_operand.vmem [shape: bf16[4,2048,128], index: 3, kind: output, shape index: {}]  }
   0x1   :  { %s5234_s14 = smov 0  }
   0x2 LB: > { %s25_s15 = sadd.s32 1, %s5204_s13  ;;  %p3068_p0 = scmp.ge.s32.totalorder %s5208_s14, 1  ;;  %s5208_s14 = sphi %s5234_s14, %s13_s14   ;;  %s5204_s13 = sphi %s5232_s13, %s5938_s13   ;;  %s5200_s12 = sphi %s5230_s12, %s5937_s12  }
   0x3   : > { %p27_p1 = scmp.ge.s32.totalorder %s25_s15, 4  ;;  %p168_p2 = scmp.lt.s32.totalorder %s5208_s14, 5 }
   0x5   : > { %s5940_s15 = smov (%p27_p1, %s25_s15), 0  ;;  %p169_p3 = pnand %p3068_p0, %p168_p2 }
   0x6   : > { %p206_p4 = scmp.lt.s32.totalorder (!%p169_p3), %s5200_s12, 3 }
   0x7   : > { %172 = sbr.rel (%p169_p3) target bundleno = 681 (0x2a9), region = 32 }
   0xc   : > { %s5942_s12 = smov (!%p206_p4, %s5200_s12), 3  ;;  %vm1163_vm0 = vcmask 523264   ;;  %v5333_v42 = vld [vmem:[%s5935_s2] ss:$0 sm:$0xff] }
   0xd   : > { %s3734_s16 = sshll.u32 %s5942_s12, 5  ;;  %s3733_s20 = sshll.u32 %s5942_s12, 10 }
   0xe   : > { %s219_s19 = scalar_lea.vmem %s5934_s1, %s3734_s16  ;;  %s5260_s23 = scalar_lea.vmem %s5933_s0, %s3733_s20 }
   0xf   : > { %v3867_v0 = vld [vmem:[%s219_s19 + $0x18] sm:$0xff]  ;;  %v3866_v1 = vld [vmem:[%s219_s19 + $0x10] sm:$0xff]  ;;  %v3865_v2 = vld [vmem:[%s219_s19 + $0x8] sm:$0xff]  ;;  %s5356_s28 = scalar_lea.vmem %s5936_s3, %s3733_s20 }
  0x10   : > { %1552 = vmatpush.bf16.msra.mxu0 %v3867_v0  ;;  %4635 = vmatpush.bf16.msra.mxu1 %v3867_v0  ;;  %v3864_v3 = vld [vmem:[%s219_s19] sm:$0xff]  ;;  %v3737_v8 = vld [vmem:[%s5260_s23 + $0x8] sm:$0xff]  ;;  %v3738_v12 = vld [vmem:[%s5260_s23 + $0x10] sm:$0xff] }
  0x11   : > { %4636 = vmatpush.bf16.msra.mxu2 %v3867_v0  ;;  %4637 = vmatpush.bf16.msra.mxu3 %v3867_v0  ;;  %v3736_v4 = vld [vmem:[%s5260_s23] sm:$0xff]  ;;  %v3769_v9 = vld [vmem:[%s5260_s23 + $0x108] sm:$0xff]  ;;  %v3770_v13 = vld [vmem:[%s5260_s23 + $0x110] sm:$0xff] }
  0x12   : > { %v3768_v5 = vld [vmem:[%s5260_s23 + $0x100] sm:$0xff]  ;;  %v3801_v10 = vld [vmem:[%s5260_s23 + $0x208] sm:$0xff]  ;;  %v3802_v14 = vld [vmem:[%s5260_s23 + $0x210] sm:$0xff] }
  0x13   : > { %v3800_v6 = vld [vmem:[%s5260_s23 + $0x200] sm:$0xff]  ;;  %v3833_v11 = vld [vmem:[%s5260_s23 + $0x308] sm:$0xff]  ;;  %v3834_v15 = vld [vmem:[%s5260_s23 + $0x310] sm:$0xff] }
  0x14   : > { %1553 = vmatpush.bf16.msra.mxu0 %v3866_v1  ;;  %4638 = vmatpush.bf16.msra.mxu1 %v3866_v1  ;;  %v3832_v7 = vld [vmem:[%s5260_s23 + $0x300] sm:$0xff]  ;;  %v3739_v16 = vld [vmem:[%s5260_s23 + $0x18] sm:$0xff]  ;;  %v3741_v24 = vld [vmem:[%s5260_s23 + $0x28] sm:$0xff] }
  0x15   : > { %4639 = vmatpush.bf16.msra.mxu2 %v3866_v1  ;;  %4640 = vmatpush.bf16.msra.mxu3 %v3866_v1  ;;  %v3771_v17 = vld [vmem:[%s5260_s23 + $0x118] sm:$0xff]  ;;  %v3740_v20 = vld [vmem:[%s5260_s23 + $0x20] sm:$0xff]  ;;  %v3773_v25 = vld [vmem:[%s5260_s23 + $0x128] sm:$0xff] }
  0x16   : > { %v3803_v18 = vld [vmem:[%s5260_s23 + $0x218] sm:$0xff]  ;;  %v3772_v21 = vld [vmem:[%s5260_s23 + $0x120] sm:$0xff]  ;;  %v3805_v26 = vld [vmem:[%s5260_s23 + $0x228] sm:$0xff] }
  0x17   : > { %v3835_v19 = vld [vmem:[%s5260_s23 + $0x318] sm:$0xff]  ;;  %v3804_v22 = vld [vmem:[%s5260_s23 + $0x220] sm:$0xff]  ;;  %v3837_v27 = vld [vmem:[%s5260_s23 + $0x328] sm:$0xff] }
  0x18   : > { %1554 = vmatpush.bf16.msra.mxu0 %v3865_v2  ;;  %4641 = vmatpush.bf16.msra.mxu1 %v3865_v2  ;;  %v3836_v23 = vld [vmem:[%s5260_s23 + $0x320] sm:$0xff]  ;;  %v3742_v28 = vld [vmem:[%s5260_s23 + $0x30] sm:$0xff]  ;;  %v3743_v32 = vld [vmem:[%s5260_s23 + $0x38] sm:$0xff] }
  0x19   : > { %4642 = vmatpush.bf16.msra.mxu2 %v3865_v2  ;;  %4643 = vmatpush.bf16.msra.mxu3 %v3865_v2  ;;  %v3774_v29 = vld [vmem:[%s5260_s23 + $0x130] sm:$0xff]  ;;  %v3775_v33 = vld [vmem:[%s5260_s23 + $0x138] sm:$0xff]  ;;  %v3744_v36 = vld [vmem:[%s5260_s23 + $0x40] sm:$0xff] }
  0x1a   : > { %v3806_v30 = vld [vmem:[%s5260_s23 + $0x230] sm:$0xff]  ;;  %v3807_v34 = vld [vmem:[%s5260_s23 + $0x238] sm:$0xff]  ;;  %v3776_v37 = vld [vmem:[%s5260_s23 + $0x140] sm:$0xff] }
  0x1b   : > { %v3838_v31 = vld [vmem:[%s5260_s23 + $0x330] sm:$0xff]  ;;  %v3839_v35 = vld [vmem:[%s5260_s23 + $0x338] sm:$0xff]  ;;  %v3808_v40 = vld [vmem:[%s5260_s23 + $0x240] sm:$0xff] }
  0x1c   : > { %1555 = vmatpush.bf16.msra.mxu0 %v3864_v3  ;;  %4644 = vmatpush.bf16.msra.mxu1 %v3864_v3  ;;  %v3840_v41 = vld [vmem:[%s5260_s23 + $0x340] sm:$0xff]  ;;  %v3745_v55 = vld [vmem:[%s5260_s23 + $0x48] sm:$0xff] }
  0x1d   : > { %4645 = vmatpush.bf16.msra.mxu2 %v3864_v3  ;;  %4646 = vmatpush.bf16.msra.mxu3 %v3864_v3  ;;  %v3777_v56 = vld [vmem:[%s5260_s23 + $0x148] sm:$0xff] }
  0x1e   : > { %v3809_v62 = vld [vmem:[%s5260_s23 + $0x248] sm:$0xff] }
  0x1f   : > { %3603 = vmatmul.msk.bf16.vlgmr.msra.gmra.mxu0 %vm1163_vm0, %v3736_v4  ;;  %3635 = vmatmul.msk.bf16.vlgmr.msra.gmra.mxu1 %vm1163_vm0, %v3768_v5  ;;  %v3841_v63 = vld [vmem:[%s5260_s23 + $0x348] sm:$0xff] }
  0x20   : > { %3667 = vmatmul.msk.bf16.vlgmr.msra.gmra.mxu2 %vm1163_vm0, %v3800_v6  ;;  %3699 = vmatmul.msk.bf16.vlgmr.msra.gmra.mxu3 %vm1163_vm0, %v3832_v7 }
  0x2f   : > { %3604 = vmatmul.msk.bf16.gmra.mxu0 %vm1163_vm0, %v3737_v8  ;;  %3636 = vmatmul.msk.bf16.gmra.mxu1 %vm1163_vm0, %v3769_v9 }
  0x30   : > { %3668 = vmatmul.msk.bf16.gmra.mxu2 %vm1163_vm0, %v3801_v10  ;;  %3700 = vmatmul.msk.bf16.gmra.mxu3 %vm1163_vm0, %v3833_v11 }
  0x3f   : > { %3605 = vmatmul.msk.bf16.gmra.mxu0 %vm1163_vm0, %v3738_v12  ;;  %3637 = vmatmul.msk.bf16.gmra.mxu1 %vm1163_vm0, %v3770_v13 }
  0x40   : > { %3669 = vmatmul.msk.bf16.gmra.mxu2 %vm1163_vm0, %v3802_v14  ;;  %3701 = vmatmul.msk.bf16.gmra.mxu3 %vm1163_vm0, %v3834_v15 }
  0x4f   : > { %3606 = vmatmul.msk.bf16.gmra.mxu0 %vm1163_vm0, %v3739_v16  ;;  %3638 = vmatmul.msk.bf16.gmra.mxu1 %vm1163_vm0, %v3771_v17 }
  0x50   : > { %3670 = vmatmul.msk.bf16.gmra.mxu2 %vm1163_vm0, %v3803_v18  ;;  %3702 = vmatmul.msk.bf16.gmra.mxu3 %vm1163_vm0, %v3835_v19 }
  0x5f   : > { %3607 = vmatmul.msk.bf16.gmra.mxu0 %vm1163_vm0, %v3740_v20  ;;  %3639 = vmatmul.msk.bf16.gmra.mxu1 %vm1163_vm0, %v3772_v21 }
  0x60   : > { %3671 = vmatmul.msk.bf16.gmra.mxu2 %vm1163_vm0, %v3804_v22  ;;  %3703 = vmatmul.msk.bf16.gmra.mxu3 %vm1163_vm0, %v3836_v23  ;;  %v3746_v23 = vld [vmem:[%s5260_s23 + $0x50] sm:$0xff] }
  0x6f   : > { %3608 = vmatmul.msk.bf16.gmra.mxu0 %vm1163_vm0, %v3741_v24  ;;  %3640 = vmatmul.msk.bf16.gmra.mxu1 %vm1163_vm0, %v3773_v25  ;;  %v3778_v24 = vld [vmem:[%s5260_s23 + $0x150] sm:$0xff] }
  0x70   : > { %3672 = vmatmul.msk.bf16.gmra.mxu2 %vm1163_vm0, %v3805_v26  ;;  %3704 = vmatmul.msk.bf16.gmra.mxu3 %vm1163_vm0, %v3837_v27 }
  0x7f   : > { %3609 = vmatmul.msk.bf16.gmra.mxu0 %vm1163_vm0, %v3742_v28  ;;  %3641 = vmatmul.msk.bf16.gmra.mxu1 %vm1163_vm0, %v3774_v29 }
  0x80   : > { %3673 = vmatmul.msk.bf16.gmra.mxu2 %vm1163_vm0, %v3806_v30  ;;  %3705 = vmatmul.msk.bf16.gmra.mxu3 %vm1163_vm0, %v3838_v31  ;;  %v3810_v30 = vld [vmem:[%s5260_s23 + $0x250] sm:$0xff] }
  0x81   : > { %v3842_v31 = vld [vmem:[%s5260_s23 + $0x350] sm:$0xff] }
  0x8f   : > { %3610 = vmatmul.msk.bf16.gmra.mxu0 %vm1163_vm0, %v3743_v32  ;;  %3642 = vmatmul.msk.bf16.gmra.mxu1 %vm1163_vm0, %v3775_v33 }
  0x90   : > { %3674 = vmatmul.msk.bf16.gmra.mxu2 %vm1163_vm0, %v3807_v34  ;;  %3706 = vmatmul.msk.bf16.gmra.mxu3 %vm1163_vm0, %v3839_v35 }
  0x9c   : > { %v1557_v38 = vpop.f32.mrf.mxu0  ;;  %v1717_v39 = vpop.f32.mrf.mxu1 }
  0x9d   : > { %v1558_v43 = vadd.f32 %v5333_v42, %v1557_v38  ;;  %v1718_v44 = vadd.f32 %v5333_v42, %v1717_v39 }
  0x9f   : > { %3611 = vmatmul.msk.bf16.gmra.mxu0 %vm1163_vm0, %v3744_v36  ;;  %3643 = vmatmul.msk.bf16.gmra.mxu1 %vm1163_vm0, %v3776_v37  ;;  %4672 = vtanh.f32 %v1558_v43 }
  0xa0   : > { %3675 = vmatmul.msk.bf16.gmra.mxu2 %vm1163_vm0, %v3808_v40  ;;  %3707 = vmatmul.msk.bf16.gmra.mxu3 %vm1163_vm0, %v3840_v41  ;;  %4674 = vtanh.f32 %v1718_v44 }
  0xa3   : > { %v1877_v45 = vpop.f32.mrf.mxu2  ;;  %v2037_v46 = vpop.f32.mrf.mxu3 }
  0xa4   : > { %v1559_v47 = vpop.f32.mrf.mxu0  ;;  %v1719_v48 = vpop.f32.mrf.mxu1  ;;  %v1878_v51 = vadd.f32 %v5333_v42, %v1877_v45  ;;  %v2038_v52 = vadd.f32 %v5333_v42, %v2037_v46 }
  0xa5   : > { %v1560_v49 = vadd.f32 %v5333_v42, %v1559_v47  ;;  %v1720_v50 = vadd.f32 %v5333_v42, %v1719_v48  ;;  %v4673_v57 = vpop.eup %4672 }
  0xa6   : > { %v4675_v0 = vpop.eup %4674 }
  0xa7   : > { %4676 = vtanh.f32 %v1560_v49 }
  0xa8   : > { %4678 = vtanh.f32 %v1720_v50 }
  0xa9   : > { %4680 = vtanh.f32 %v1878_v51 }
  0xaa   : > { %4682 = vtanh.f32 %v2038_v52 }
  0xab   : > { %v1879_v53 = vpop.f32.mrf.mxu2  ;;  %v2039_v54 = vpop.f32.mrf.mxu3 }
  0xac   : > { %v1880_v58 = vadd.f32 %v5333_v42, %v1879_v53  ;;  %v2040_v59 = vadd.f32 %v5333_v42, %v2039_v54  ;;  %v1562_v60 = vpop.f32.mrf.mxu0  ;;  %v1722_v61 = vpop.f32.mrf.mxu1 }
  0xad   : > { %v4677_v1 = vpop.eup %4676  ;;  %v1563_v6 = vadd.f32 %v5333_v42, %v1562_v60  ;;  %v1723_v8 = vadd.f32 %v5333_v42, %v1722_v61 }
  0xae   : > { %4684 = vtanh.f32 %v1880_v58  ;;  %v4679_v2 = vpop.eup %4678  ;;  %v3871_v3 = vpack.c.bf16 %v4677_v1, %v4673_v57  ;;  %v3779_v57 = vld [vmem:[%s5260_s23 + $0x158] sm:$0xff] }
  0xaf   : > { %4686 = vtanh.f32 %v2040_v59  ;;  %3612 = vmatmul.msk.bf16.gmra.mxu0 %vm1163_vm0, %v3745_v55  ;;  %3644 = vmatmul.msk.bf16.gmra.mxu1 %vm1163_vm0, %v3777_v56  ;;  %v4031_v4 = vpack.c.bf16 %v4679_v2, %v4675_v0  ;;  %v4681_v5 = vpop.eup %4680  ;;  %v3747_v56 = vld [vmem:[%s5260_s23 + $0x58] sm:$0xff] }
  0xb0   : > { %3676 = vmatmul.msk.bf16.gmra.mxu2 %vm1163_vm0, %v3809_v62  ;;  %3708 = vmatmul.msk.bf16.gmra.mxu3 %vm1163_vm0, %v3841_v63  ;;  %3872 = vst [vmem:[%s5356_s28] sm:$0xff] %v3871_v3   ;;  %v4683_v7 = vpop.eup %4682  ;;  %4688 = vtanh.f32 %v1563_v6  ;;  %v3811_v63 = vld [vmem:[%s5260_s23 + $0x258] sm:$0xff] }
  0xb1   : > { %4539 = vst [vmem:[%s5356_s28 + $0x100] sm:$0xff] %v4031_v4   ;;  %4690 = vtanh.f32 %v1723_v8  ;;  %v3843_v0 = vld [vmem:[%s5260_s23 + $0x358] sm:$0xff] }
  0xb3   : > { %v1882_v9 = vpop.f32.mrf.mxu2  ;;  %v2042_v10 = vpop.f32.mrf.mxu3 }
  0xb4   : > { %v4685_v11 = vpop.eup %4684  ;;  %v1564_v12 = vpop.f32.mrf.mxu0  ;;  %v1883_v19 = vadd.f32 %v5333_v42, %v1882_v9  ;;  %v2043_v20 = vadd.f32 %v5333_v42, %v2042_v10 }
  0xb5   : > { %v1724_v13 = vpop.f32.mrf.mxu1  ;;  %v4687_v14 = vpop.eup %4686  ;;  %v4191_v15 = vpack.c.bf16 %v4685_v11, %v4681_v5  ;;  %v1565_v16 = vadd.f32 %v5333_v42, %v1564_v12 }
  0xb6   : > { %v1725_v17 = vadd.f32 %v5333_v42, %v1724_v13  ;;  %v4351_v18 = vpack.c.bf16 %v4687_v14, %v4683_v7  ;;  %v4689_v25 = vpop.eup %4688 }
  0xb7   : > { %4571 = vst [vmem:[%s5356_s28 + $0x200] sm:$0xff] %v4191_v15   ;;  %4692 = vtanh.f32 %v1565_v16  ;;  %v4691_v32 = vpop.eup %4690 }
  0xb8   : > { %4603 = vst [vmem:[%s5356_s28 + $0x300] sm:$0xff] %v4351_v18   ;;  %4694 = vtanh.f32 %v1725_v17 }
  0xb9   : > { %4696 = vtanh.f32 %v1883_v19 }
  0xba   : > { %4698 = vtanh.f32 %v2043_v20 }
  0xbb   : > { %v1884_v21 = vpop.f32.mrf.mxu2  ;;  %v2044_v22 = vpop.f32.mrf.mxu3 }
  0xbc   : > { %v1885_v26 = vadd.f32 %v5333_v42, %v1884_v21  ;;  %v2045_v27 = vadd.f32 %v5333_v42, %v2044_v22  ;;  %v1567_v28 = vpop.f32.mrf.mxu0 }
  0xbd   : > { %v1727_v29 = vpop.f32.mrf.mxu1  ;;  %v4693_v33 = vpop.eup %4692  ;;  %v1568_v38 = vadd.f32 %v5333_v42, %v1567_v28 }
  0xbe   : > { %4700 = vtanh.f32 %v1885_v26  ;;  %v4695_v34 = vpop.eup %4694  ;;  %v3876_v35 = vpack.c.bf16 %v4693_v33, %v4689_v25  ;;  %v1728_v40 = vadd.f32 %v5333_v42, %v1727_v29  ;;  %v3780_v25 = vld [vmem:[%s5260_s23 + $0x160] sm:$0xff] }
  0xbf   : > { %4702 = vtanh.f32 %v2045_v27  ;;  %3613 = vmatmul.msk.bf16.gmra.mxu0 %vm1163_vm0, %v3746_v23  ;;  %3645 = vmatmul.msk.bf16.gmra.mxu1 %vm1163_vm0, %v3778_v24  ;;  %v4036_v36 = vpack.c.bf16 %v4695_v34, %v4691_v32  ;;  %v4697_v37 = vpop.eup %4696  ;;  %v3748_v24 = vld [vmem:[%s5260_s23 + $0x60] sm:$0xff] }
  0xc0   : > { %3677 = vmatmul.msk.bf16.gmra.mxu2 %vm1163_vm0, %v3810_v30  ;;  %3709 = vmatmul.msk.bf16.gmra.mxu3 %vm1163_vm0, %v3842_v31  ;;  %4508 = vst [vmem:[%s5356_s28 + $0x8] sm:$0xff] %v3876_v35   ;;  %v4699_v39 = vpop.eup %4698  ;;  %4704 = vtanh.f32 %v1568_v38  ;;  %v3812_v31 = vld [vmem:[%s5260_s23 + $0x260] sm:$0xff] }
  0xc1   : > { %4540 = vst [vmem:[%s5356_s28 + $0x108] sm:$0xff] %v4036_v36   ;;  %4706 = vtanh.f32 %v1728_v40  ;;  %v3844_v32 = vld [vmem:[%s5260_s23 + $0x360] sm:$0xff] }
  0xc3   : > { %v1887_v41 = vpop.f32.mrf.mxu2  ;;  %v2047_v43 = vpop.f32.mrf.mxu3 }
  0xc4   : > { %v4701_v44 = vpop.eup %4700  ;;  %v1569_v45 = vpop.f32.mrf.mxu0  ;;  %v1888_v52 = vadd.f32 %v5333_v42, %v1887_v41  ;;  %v2048_v53 = vadd.f32 %v5333_v42, %v2047_v43 }
  0xc5   : > { %v1729_v46 = vpop.f32.mrf.mxu1  ;;  %v4703_v47 = vpop.eup %4702  ;;  %v4196_v48 = vpack.c.bf16 %v4701_v44, %v4697_v37  ;;  %v1570_v49 = vadd.f32 %v5333_v42, %v1569_v45 }
  0xc6   : > { %v1730_v50 = vadd.f32 %v5333_v42, %v1729_v46  ;;  %v4356_v51 = vpack.c.bf16 %v4703_v47, %v4699_v39  ;;  %v4705_v58 = vpop.eup %4704 }
  0xc7   : > { %4572 = vst [vmem:[%s5356_s28 + $0x208] sm:$0xff] %v4196_v48   ;;  %4708 = vtanh.f32 %v1570_v49  ;;  %v4707_v1 = vpop.eup %4706 }
  0xc8   : > { %4604 = vst [vmem:[%s5356_s28 + $0x308] sm:$0xff] %v4356_v51   ;;  %4710 = vtanh.f32 %v1730_v50 }
  0xc9   : > { %4712 = vtanh.f32 %v1888_v52 }
  0xca   : > { %4714 = vtanh.f32 %v2048_v53 }
  0xcb   : > { %v1889_v54 = vpop.f32.mrf.mxu2  ;;  %v2049_v55 = vpop.f32.mrf.mxu3 }
  0xcc   : > { %v1890_v59 = vadd.f32 %v5333_v42, %v1889_v54  ;;  %v2050_v60 = vadd.f32 %v5333_v42, %v2049_v55  ;;  %v1572_v61 = vpop.f32.mrf.mxu0 }
  0xcd   : > { %v1732_v62 = vpop.f32.mrf.mxu1  ;;  %v4709_v2 = vpop.eup %4708  ;;  %v1573_v7 = vadd.f32 %v5333_v42, %v1572_v61 }
  0xce   : > { %4716 = vtanh.f32 %v1890_v59  ;;  %v4711_v3 = vpop.eup %4710  ;;  %v3881_v4 = vpack.c.bf16 %v4709_v2, %v4705_v58  ;;  %v1733_v9 = vadd.f32 %v5333_v42, %v1732_v62  ;;  %v3781_v58 = vld [vmem:[%s5260_s23 + $0x168] sm:$0xff] }
  0xcf   : > { %4718 = vtanh.f32 %v2050_v60  ;;  %3614 = vmatmul.msk.bf16.gmra.mxu0 %vm1163_vm0, %v3747_v56  ;;  %3646 = vmatmul.msk.bf16.gmra.mxu1 %vm1163_vm0, %v3779_v57  ;;  %v4041_v5 = vpack.c.bf16 %v4711_v3, %v4707_v1  ;;  %v4713_v6 = vpop.eup %4712  ;;  %v3749_v57 = vld [vmem:[%s5260_s23 + $0x68] sm:$0xff] }
  0xd0   : > { %3678 = vmatmul.msk.bf16.gmra.mxu2 %vm1163_vm0, %v3811_v63  ;;  %3710 = vmatmul.msk.bf16.gmra.mxu3 %vm1163_vm0, %v3843_v0  ;;  %4509 = vst [vmem:[%s5356_s28 + $0x10] sm:$0xff] %v3881_v4   ;;  %v4715_v8 = vpop.eup %4714  ;;  %4720 = vtanh.f32 %v1573_v7  ;;  %v3813_v0 = vld [vmem:[%s5260_s23 + $0x268] sm:$0xff] }
  0xd1   : > { %4541 = vst [vmem:[%s5356_s28 + $0x110] sm:$0xff] %v4041_v5   ;;  %4722 = vtanh.f32 %v1733_v9  ;;  %v3845_v1 = vld [vmem:[%s5260_s23 + $0x368] sm:$0xff] }
  0xd3   : > { %v1892_v10 = vpop.f32.mrf.mxu2  ;;  %v2052_v11 = vpop.f32.mrf.mxu3 }
  0xd4   : > { %v4717_v12 = vpop.eup %4716  ;;  %v1574_v13 = vpop.f32.mrf.mxu0  ;;  %v1893_v20 = vadd.f32 %v5333_v42, %v1892_v10  ;;  %v2053_v21 = vadd.f32 %v5333_v42, %v2052_v11 }
  0xd5   : > { %v1734_v14 = vpop.f32.mrf.mxu1  ;;  %v4719_v15 = vpop.eup %4718  ;;  %v4201_v16 = vpack.c.bf16 %v4717_v12, %v4713_v6  ;;  %v1575_v17 = vadd.f32 %v5333_v42, %v1574_v13 }
  0xd6   : > { %v1735_v18 = vadd.f32 %v5333_v42, %v1734_v14  ;;  %v4361_v19 = vpack.c.bf16 %v4719_v15, %v4715_v8  ;;  %v4721_v26 = vpop.eup %4720 }
  0xd7   : > { %4573 = vst [vmem:[%s5356_s28 + $0x210] sm:$0xff] %v4201_v16   ;;  %4724 = vtanh.f32 %v1575_v17  ;;  %v4723_v33 = vpop.eup %4722 }
  0xd8   : > { %4605 = vst [vmem:[%s5356_s28 + $0x310] sm:$0xff] %v4361_v19   ;;  %4726 = vtanh.f32 %v1735_v18 }
  0xd9   : > { %4728 = vtanh.f32 %v1893_v20 }
  0xda   : > { %4730 = vtanh.f32 %v2053_v21 }
  0xdb   : > { %v1894_v22 = vpop.f32.mrf.mxu2  ;;  %v2054_v23 = vpop.f32.mrf.mxu3 }
  0xdc   : > { %v1895_v27 = vadd.f32 %v5333_v42, %v1894_v22  ;;  %v2055_v28 = vadd.f32 %v5333_v42, %v2054_v23  ;;  %v1577_v29 = vpop.f32.mrf.mxu0 }
  0xdd   : > { %v1737_v30 = vpop.f32.mrf.mxu1  ;;  %v4725_v34 = vpop.eup %4724  ;;  %v1578_v39 = vadd.f32 %v5333_v42, %v1577_v29 }
  0xde   : > { %4732 = vtanh.f32 %v1895_v27  ;;  %v4727_v35 = vpop.eup %4726  ;;  %v3886_v36 = vpack.c.bf16 %v4725_v34, %v4721_v26  ;;  %v1738_v41 = vadd.f32 %v5333_v42, %v1737_v30  ;;  %v3782_v26 = vld [vmem:[%s5260_s23 + $0x170] sm:$0xff] }
  0xdf   : > { %4734 = vtanh.f32 %v2055_v28  ;;  %3615 = vmatmul.msk.bf16.gmra.mxu0 %vm1163_vm0, %v3748_v24  ;;  %3647 = vmatmul.msk.bf16.gmra.mxu1 %vm1163_vm0, %v3780_v25  ;;  %v4046_v37 = vpack.c.bf16 %v4727_v35, %v4723_v33  ;;  %v4729_v38 = vpop.eup %4728  ;;  %v3750_v25 = vld [vmem:[%s5260_s23 + $0x70] sm:$0xff] }
  0xe0   : > { %3679 = vmatmul.msk.bf16.gmra.mxu2 %vm1163_vm0, %v3812_v31  ;;  %3711 = vmatmul.msk.bf16.gmra.mxu3 %vm1163_vm0, %v3844_v32  ;;  %4510 = vst [vmem:[%s5356_s28 + $0x18] sm:$0xff] %v3886_v36   ;;  %v4731_v40 = vpop.eup %4730  ;;  %4736 = vtanh.f32 %v1578_v39  ;;  %v3814_v32 = vld [vmem:[%s5260_s23 + $0x270] sm:$0xff] }
  0xe1   : > { %4542 = vst [vmem:[%s5356_s28 + $0x118] sm:$0xff] %v4046_v37   ;;  %4738 = vtanh.f32 %v1738_v41  ;;  %v3846_v33 = vld [vmem:[%s5260_s23 + $0x370] sm:$0xff] }
  0xe3   : > { %v1897_v43 = vpop.f32.mrf.mxu2  ;;  %v2057_v44 = vpop.f32.mrf.mxu3 }
  0xe4   : > { %v4733_v45 = vpop.eup %4732  ;;  %v1579_v46 = vpop.f32.mrf.mxu0  ;;  %v1898_v53 = vadd.f32 %v5333_v42, %v1897_v43  ;;  %v2058_v54 = vadd.f32 %v5333_v42, %v2057_v44 }
  0xe5   : > { %v1739_v47 = vpop.f32.mrf.mxu1  ;;  %v4735_v48 = vpop.eup %4734  ;;  %v4206_v49 = vpack.c.bf16 %v4733_v45, %v4729_v38  ;;  %v1580_v50 = vadd.f32 %v5333_v42, %v1579_v46 }
  0xe6   : > { %v1740_v51 = vadd.f32 %v5333_v42, %v1739_v47  ;;  %v4366_v52 = vpack.c.bf16 %v4735_v48, %v4731_v40  ;;  %v4737_v59 = vpop.eup %4736 }
  0xe7   : > { %4574 = vst [vmem:[%s5356_s28 + $0x218] sm:$0xff] %v4206_v49   ;;  %4740 = vtanh.f32 %v1580_v50  ;;  %v4739_v2 = vpop.eup %4738 }
  0xe8   : > { %4606 = vst [vmem:[%s5356_s28 + $0x318] sm:$0xff] %v4366_v52   ;;  %4742 = vtanh.f32 %v1740_v51 }
  0xe9   : > { %4744 = vtanh.f32 %v1898_v53 }
  0xea   : > { %4746 = vtanh.f32 %v2058_v54 }
  0xeb   : > { %v1899_v55 = vpop.f32.mrf.mxu2  ;;  %v2059_v56 = vpop.f32.mrf.mxu3 }
  0xec   : > { %v1900_v60 = vadd.f32 %v5333_v42, %v1899_v55  ;;  %v2060_v61 = vadd.f32 %v5333_v42, %v2059_v56  ;;  %v1582_v62 = vpop.f32.mrf.mxu0 }
  0xed   : > { %v1742_v63 = vpop.f32.mrf.mxu1  ;;  %v4741_v3 = vpop.eup %4740  ;;  %v1583_v8 = vadd.f32 %v5333_v42, %v1582_v62 }
  0xee   : > { %4748 = vtanh.f32 %v1900_v60  ;;  %v4743_v4 = vpop.eup %4742  ;;  %v3891_v5 = vpack.c.bf16 %v4741_v3, %v4737_v59  ;;  %v1743_v10 = vadd.f32 %v5333_v42, %v1742_v63  ;;  %v3783_v59 = vld [vmem:[%s5260_s23 + $0x178] sm:$0xff] }
  0xef   : > { %4750 = vtanh.f32 %v2060_v61  ;;  %3616 = vmatmul.msk.bf16.gmra.mxu0 %vm1163_vm0, %v3749_v57  ;;  %3648 = vmatmul.msk.bf16.gmra.mxu1 %vm1163_vm0, %v3781_v58  ;;  %v4051_v6 = vpack.c.bf16 %v4743_v4, %v4739_v2  ;;  %v4745_v7 = vpop.eup %4744  ;;  %v3751_v58 = vld [vmem:[%s5260_s23 + $0x78] sm:$0xff] }
  0xf0   : > { %3680 = vmatmul.msk.bf16.gmra.mxu2 %vm1163_vm0, %v3813_v0  ;;  %3712 = vmatmul.msk.bf16.gmra.mxu3 %vm1163_vm0, %v3845_v1  ;;  %4511 = vst [vmem:[%s5356_s28 + $0x20] sm:$0xff] %v3891_v5   ;;  %v4747_v9 = vpop.eup %4746  ;;  %4752 = vtanh.f32 %v1583_v8  ;;  %v3815_v1 = vld [vmem:[%s5260_s23 + $0x278] sm:$0xff] }
  0xf1   : > { %4543 = vst [vmem:[%s5356_s28 + $0x120] sm:$0xff] %v4051_v6   ;;  %4754 = vtanh.f32 %v1743_v10  ;;  %v3847_v2 = vld [vmem:[%s5260_s23 + $0x378] sm:$0xff] }
  0xf3   : > { %v1902_v11 = vpop.f32.mrf.mxu2  ;;  %v2062_v12 = vpop.f32.mrf.mxu3 }
  0xf4   : > { %v4749_v13 = vpop.eup %4748  ;;  %v1584_v14 = vpop.f32.mrf.mxu0  ;;  %v1903_v21 = vadd.f32 %v5333_v42, %v1902_v11  ;;  %v2063_v22 = vadd.f32 %v5333_v42, %v2062_v12 }
  0xf5   : > { %v1744_v15 = vpop.f32.mrf.mxu1  ;;  %v4751_v16 = vpop.eup %4750  ;;  %v4211_v17 = vpack.c.bf16 %v4749_v13, %v4745_v7  ;;  %v1585_v18 = vadd.f32 %v5333_v42, %v1584_v14 }
  0xf6   : > { %v1745_v19 = vadd.f32 %v5333_v42, %v1744_v15  ;;  %v4371_v20 = vpack.c.bf16 %v4751_v16, %v4747_v9  ;;  %v4753_v27 = vpop.eup %4752 }
  0xf7   : > { %4575 = vst [vmem:[%s5356_s28 + $0x220] sm:$0xff] %v4211_v17   ;;  %4756 = vtanh.f32 %v1585_v18  ;;  %v4755_v34 = vpop.eup %4754 }
  0xf8   : > { %4607 = vst [vmem:[%s5356_s28 + $0x320] sm:$0xff] %v4371_v20   ;;  %4758 = vtanh.f32 %v1745_v19 }
  0xf9   : > { %4760 = vtanh.f32 %v1903_v21 }
  0xfa   : > { %4762 = vtanh.f32 %v2063_v22 }
  0xfb   : > { %v1904_v23 = vpop.f32.mrf.mxu2  ;;  %v2064_v24 = vpop.f32.mrf.mxu3 }
  0xfc   : > { %v1905_v28 = vadd.f32 %v5333_v42, %v1904_v23  ;;  %v2065_v29 = vadd.f32 %v5333_v42, %v2064_v24  ;;  %v1587_v30 = vpop.f32.mrf.mxu0 }
  0xfd   : > { %v1747_v31 = vpop.f32.mrf.mxu1  ;;  %v4757_v35 = vpop.eup %4756  ;;  %v1588_v40 = vadd.f32 %v5333_v42, %v1587_v30 }
  0xfe   : > { %4764 = vtanh.f32 %v1905_v28  ;;  %v4759_v36 = vpop.eup %4758  ;;  %v3896_v37 = vpack.c.bf16 %v4757_v35, %v4753_v27  ;;  %v1748_v43 = vadd.f32 %v5333_v42, %v1747_v31  ;;  %v3784_v27 = vld [vmem:[%s5260_s23 + $0x180] sm:$0xff] }
  0xff   : > { %4766 = vtanh.f32 %v2065_v29  ;;  %3617 = vmatmul.msk.bf16.gmra.mxu0 %vm1163_vm0, %v3750_v25  ;;  %3649 = vmatmul.msk.bf16.gmra.mxu1 %vm1163_vm0, %v3782_v26  ;;  %v4056_v38 = vpack.c.bf16 %v4759_v36, %v4755_v34  ;;  %v4761_v39 = vpop.eup %4760  ;;  %v3752_v26 = vld [vmem:[%s5260_s23 + $0x80] sm:$0xff] }
 0x100   : > { %3681 = vmatmul.msk.bf16.gmra.mxu2 %vm1163_vm0, %v3814_v32  ;;  %3713 = vmatmul.msk.bf16.gmra.mxu3 %vm1163_vm0, %v3846_v33  ;;  %4512 = vst [vmem:[%s5356_s28 + $0x28] sm:$0xff] %v3896_v37   ;;  %v4763_v41 = vpop.eup %4762  ;;  %4768 = vtanh.f32 %v1588_v40  ;;  %v3816_v33 = vld [vmem:[%s5260_s23 + $0x280] sm:$0xff] }
 0x101   : > { %4544 = vst [vmem:[%s5356_s28 + $0x128] sm:$0xff] %v4056_v38   ;;  %4770 = vtanh.f32 %v1748_v43  ;;  %v3848_v34 = vld [vmem:[%s5260_s23 + $0x380] sm:$0xff] }
 0x103   : > { %v1907_v44 = vpop.f32.mrf.mxu2  ;;  %v2067_v45 = vpop.f32.mrf.mxu3 }
 0x104   : > { %v4765_v46 = vpop.eup %4764  ;;  %v1589_v47 = vpop.f32.mrf.mxu0  ;;  %v1908_v54 = vadd.f32 %v5333_v42, %v1907_v44  ;;  %v2068_v55 = vadd.f32 %v5333_v42, %v2067_v45 }
 0x105   : > { %v1749_v48 = vpop.f32.mrf.mxu1  ;;  %v4767_v49 = vpop.eup %4766  ;;  %v4216_v50 = vpack.c.bf16 %v4765_v46, %v4761_v39  ;;  %v1590_v51 = vadd.f32 %v5333_v42, %v1589_v47 }
 0x106   : > { %v1750_v52 = vadd.f32 %v5333_v42, %v1749_v48  ;;  %v4376_v53 = vpack.c.bf16 %v4767_v49, %v4763_v41  ;;  %v4769_v60 = vpop.eup %4768 }
 0x107   : > { %4576 = vst [vmem:[%s5356_s28 + $0x228] sm:$0xff] %v4216_v50   ;;  %4772 = vtanh.f32 %v1590_v51  ;;  %v4771_v3 = vpop.eup %4770 }
 0x108   : > { %4608 = vst [vmem:[%s5356_s28 + $0x328] sm:$0xff] %v4376_v53   ;;  %4774 = vtanh.f32 %v1750_v52 }
 0x109   : > { %4776 = vtanh.f32 %v1908_v54 }
 0x10a   : > { %4778 = vtanh.f32 %v2068_v55 }
 0x10b   : > { %v1909_v56 = vpop.f32.mrf.mxu2  ;;  %v2069_v57 = vpop.f32.mrf.mxu3 }
 0x10c   : > { %v1910_v61 = vadd.f32 %v5333_v42, %v1909_v56  ;;  %v2070_v62 = vadd.f32 %v5333_v42, %v2069_v57  ;;  %v1592_v63 = vpop.f32.mrf.mxu0 }
 0x10d   : > { %v1752_v0 = vpop.f32.mrf.mxu1  ;;  %v4773_v4 = vpop.eup %4772  ;;  %v1593_v9 = vadd.f32 %v5333_v42, %v1592_v63 }
 0x10e   : > { %4780 = vtanh.f32 %v1910_v61  ;;  %v4775_v5 = vpop.eup %4774  ;;  %v3901_v6 = vpack.c.bf16 %v4773_v4, %v4769_v60  ;;  %v1753_v11 = vadd.f32 %v5333_v42, %v1752_v0  ;;  %v3785_v60 = vld [vmem:[%s5260_s23 + $0x188] sm:$0xff] }
 0x10f   : > { %4782 = vtanh.f32 %v2070_v62  ;;  %3618 = vmatmul.msk.bf16.gmra.mxu0 %vm1163_vm0, %v3751_v58  ;;  %3650 = vmatmul.msk.bf16.gmra.mxu1 %vm1163_vm0, %v3783_v59  ;;  %v4061_v7 = vpack.c.bf16 %v4775_v5, %v4771_v3  ;;  %v4777_v8 = vpop.eup %4776  ;;  %v3753_v59 = vld [vmem:[%s5260_s23 + $0x88] sm:$0xff] }
 0x110   : > { %3682 = vmatmul.msk.bf16.gmra.mxu2 %vm1163_vm0, %v3815_v1  ;;  %3714 = vmatmul.msk.bf16.gmra.mxu3 %vm1163_vm0, %v3847_v2  ;;  %4513 = vst [vmem:[%s5356_s28 + $0x30] sm:$0xff] %v3901_v6   ;;  %v4779_v10 = vpop.eup %4778  ;;  %4784 = vtanh.f32 %v1593_v9  ;;  %v3817_v2 = vld [vmem:[%s5260_s23 + $0x288] sm:$0xff] }
 0x111   : > { %4545 = vst [vmem:[%s5356_s28 + $0x130] sm:$0xff] %v4061_v7   ;;  %4786 = vtanh.f32 %v1753_v11  ;;  %v3849_v3 = vld [vmem:[%s5260_s23 + $0x388] sm:$0xff] }
 0x113   : > { %v1912_v12 = vpop.f32.mrf.mxu2  ;;  %v2072_v13 = vpop.f32.mrf.mxu3 }
 0x114   : > { %v4781_v14 = vpop.eup %4780  ;;  %v1594_v15 = vpop.f32.mrf.mxu0  ;;  %v1913_v22 = vadd.f32 %v5333_v42, %v1912_v12  ;;  %v2073_v23 = vadd.f32 %v5333_v42, %v2072_v13 }
 0x115   : > { %v1754_v16 = vpop.f32.mrf.mxu1  ;;  %v4783_v17 = vpop.eup %4782  ;;  %v4221_v18 = vpack.c.bf16 %v4781_v14, %v4777_v8  ;;  %v1595_v19 = vadd.f32 %v5333_v42, %v1594_v15 }
 0x116   : > { %v1755_v20 = vadd.f32 %v5333_v42, %v1754_v16  ;;  %v4381_v21 = vpack.c.bf16 %v4783_v17, %v4779_v10  ;;  %v4785_v28 = vpop.eup %4784 }
 0x117   : > { %4577 = vst [vmem:[%s5356_s28 + $0x230] sm:$0xff] %v4221_v18   ;;  %4788 = vtanh.f32 %v1595_v19  ;;  %v4787_v35 = vpop.eup %4786 }
 0x118   : > { %4609 = vst [vmem:[%s5356_s28 + $0x330] sm:$0xff] %v4381_v21   ;;  %4790 = vtanh.f32 %v1755_v20 }
 0x119   : > { %4792 = vtanh.f32 %v1913_v22 }
 0x11a   : > { %4794 = vtanh.f32 %v2073_v23 }
 0x11b   : > { %v1914_v24 = vpop.f32.mrf.mxu2  ;;  %v2074_v25 = vpop.f32.mrf.mxu3 }
 0x11c   : > { %v1915_v29 = vadd.f32 %v5333_v42, %v1914_v24  ;;  %v2075_v30 = vadd.f32 %v5333_v42, %v2074_v25  ;;  %v1597_v31 = vpop.f32.mrf.mxu0 }
 0x11d   : > { %v1757_v32 = vpop.f32.mrf.mxu1  ;;  %v4789_v36 = vpop.eup %4788  ;;  %v1598_v41 = vadd.f32 %v5333_v42, %v1597_v31 }
 0x11e   : > { %4796 = vtanh.f32 %v1915_v29  ;;  %v4791_v37 = vpop.eup %4790  ;;  %v3906_v38 = vpack.c.bf16 %v4789_v36, %v4785_v28  ;;  %v1758_v44 = vadd.f32 %v5333_v42, %v1757_v32  ;;  %v3786_v28 = vld [vmem:[%s5260_s23 + $0x190] sm:$0xff] }
 0x11f   : > { %4798 = vtanh.f32 %v2075_v30  ;;  %3619 = vmatmul.msk.bf16.gmra.mxu0 %vm1163_vm0, %v3752_v26  ;;  %3651 = vmatmul.msk.bf16.gmra.mxu1 %vm1163_vm0, %v3784_v27  ;;  %v4066_v39 = vpack.c.bf16 %v4791_v37, %v4787_v35  ;;  %v4793_v40 = vpop.eup %4792  ;;  %v3754_v27 = vld [vmem:[%s5260_s23 + $0x90] sm:$0xff] }
 0x120   : > { %3683 = vmatmul.msk.bf16.gmra.mxu2 %vm1163_vm0, %v3816_v33  ;;  %3715 = vmatmul.msk.bf16.gmra.mxu3 %vm1163_vm0, %v3848_v34  ;;  %4514 = vst [vmem:[%s5356_s28 + $0x38] sm:$0xff] %v3906_v38   ;;  %v4795_v43 = vpop.eup %4794  ;;  %4800 = vtanh.f32 %v1598_v41  ;;  %v3818_v34 = vld [vmem:[%s5260_s23 + $0x290] sm:$0xff] }
 0x121   : > { %4546 = vst [vmem:[%s5356_s28 + $0x138] sm:$0xff] %v4066_v39   ;;  %4802 = vtanh.f32 %v1758_v44  ;;  %v3850_v35 = vld [vmem:[%s5260_s23 + $0x390] sm:$0xff] }
 0x123   : > { %v1917_v45 = vpop.f32.mrf.mxu2  ;;  %v2077_v46 = vpop.f32.mrf.mxu3 }
 0x124   : > { %v4797_v47 = vpop.eup %4796  ;;  %v1599_v48 = vpop.f32.mrf.mxu0  ;;  %v1918_v55 = vadd.f32 %v5333_v42, %v1917_v45  ;;  %v2078_v56 = vadd.f32 %v5333_v42, %v2077_v46 }
 0x125   : > { %v1759_v49 = vpop.f32.mrf.mxu1  ;;  %v4799_v50 = vpop.eup %4798  ;;  %v4226_v51 = vpack.c.bf16 %v4797_v47, %v4793_v40  ;;  %v1600_v52 = vadd.f32 %v5333_v42, %v1599_v48 }
 0x126   : > { %v1760_v53 = vadd.f32 %v5333_v42, %v1759_v49  ;;  %v4386_v54 = vpack.c.bf16 %v4799_v50, %v4795_v43  ;;  %v4801_v61 = vpop.eup %4800 }
 0x127   : > { %4578 = vst [vmem:[%s5356_s28 + $0x238] sm:$0xff] %v4226_v51   ;;  %4804 = vtanh.f32 %v1600_v52  ;;  %v4803_v4 = vpop.eup %4802 }
 0x128   : > { %4610 = vst [vmem:[%s5356_s28 + $0x338] sm:$0xff] %v4386_v54   ;;  %4806 = vtanh.f32 %v1760_v53 }
 0x129   : > { %4808 = vtanh.f32 %v1918_v55 }
 0x12a   : > { %4810 = vtanh.f32 %v2078_v56 }
 0x12b   : > { %v1919_v57 = vpop.f32.mrf.mxu2  ;;  %v2079_v58 = vpop.f32.mrf.mxu3 }
 0x12c   : > { %v1920_v62 = vadd.f32 %v5333_v42, %v1919_v57  ;;  %v2080_v63 = vadd.f32 %v5333_v42, %v2079_v58  ;;  %v1602_v0 = vpop.f32.mrf.mxu0 }
 0x12d   : > { %v1762_v1 = vpop.f32.mrf.mxu1  ;;  %v4805_v5 = vpop.eup %4804  ;;  %v1603_v10 = vadd.f32 %v5333_v42, %v1602_v0 }
 0x12e   : > { %4812 = vtanh.f32 %v1920_v62  ;;  %v4807_v6 = vpop.eup %4806  ;;  %v3911_v7 = vpack.c.bf16 %v4805_v5, %v4801_v61  ;;  %v1763_v12 = vadd.f32 %v5333_v42, %v1762_v1  ;;  %v3787_v61 = vld [vmem:[%s5260_s23 + $0x198] sm:$0xff] }
 0x12f   : > { %4814 = vtanh.f32 %v2080_v63  ;;  %3620 = vmatmul.msk.bf16.gmra.mxu0 %vm1163_vm0, %v3753_v59  ;;  %3652 = vmatmul.msk.bf16.gmra.mxu1 %vm1163_vm0, %v3785_v60  ;;  %v4071_v8 = vpack.c.bf16 %v4807_v6, %v4803_v4  ;;  %v4809_v9 = vpop.eup %4808  ;;  %v3755_v60 = vld [vmem:[%s5260_s23 + $0x98] sm:$0xff] }
 0x130   : > { %3684 = vmatmul.msk.bf16.gmra.mxu2 %vm1163_vm0, %v3817_v2  ;;  %3716 = vmatmul.msk.bf16.gmra.mxu3 %vm1163_vm0, %v3849_v3  ;;  %4515 = vst [vmem:[%s5356_s28 + $0x40] sm:$0xff] %v3911_v7   ;;  %v4811_v11 = vpop.eup %4810  ;;  %4816 = vtanh.f32 %v1603_v10  ;;  %v3819_v3 = vld [vmem:[%s5260_s23 + $0x298] sm:$0xff]  ;;  %v5567_v10 = vld [vmem:[%s5935_s2] ss:$0 sm:$0xff] }
 0x131   : > { %4547 = vst [vmem:[%s5356_s28 + $0x140] sm:$0xff] %v4071_v8   ;;  %4818 = vtanh.f32 %v1763_v12  ;;  %v3851_v4 = vld [vmem:[%s5260_s23 + $0x398] sm:$0xff] }
 0x133   : > { %v1922_v13 = vpop.f32.mrf.mxu2  ;;  %v2082_v14 = vpop.f32.mrf.mxu3 }
 0x134   : > { %v4813_v15 = vpop.eup %4812  ;;  %v1604_v16 = vpop.f32.mrf.mxu0  ;;  %v1923_v23 = vadd.f32 %v5333_v42, %v1922_v13  ;;  %v2083_v24 = vadd.f32 %v5333_v42, %v2082_v14 }
 0x135   : > { %v1764_v17 = vpop.f32.mrf.mxu1  ;;  %v4815_v18 = vpop.eup %4814  ;;  %v4231_v19 = vpack.c.bf16 %v4813_v15, %v4809_v9  ;;  %v1605_v20 = vadd.f32 %v5333_v42, %v1604_v16 }
 0x136   : > { %v1765_v21 = vadd.f32 %v5333_v42, %v1764_v17  ;;  %v4391_v22 = vpack.c.bf16 %v4815_v18, %v4811_v11  ;;  %v4817_v29 = vpop.eup %4816 }
 0x137   : > { %4579 = vst [vmem:[%s5356_s28 + $0x240] sm:$0xff] %v4231_v19   ;;  %4820 = vtanh.f32 %v1605_v20  ;;  %v4819_v36 = vpop.eup %4818 }
 0x138   : > { %4611 = vst [vmem:[%s5356_s28 + $0x340] sm:$0xff] %v4391_v22   ;;  %4822 = vtanh.f32 %v1765_v21 }
 0x139   : > { %4824 = vtanh.f32 %v1923_v23 }
 0x13a   : > { %4826 = vtanh.f32 %v2083_v24 }
 0x13b   : > { %v1924_v25 = vpop.f32.mrf.mxu2  ;;  %v2084_v26 = vpop.f32.mrf.mxu3 }
 0x13c   : > { %v1925_v30 = vadd.f32 %v5333_v42, %v1924_v25  ;;  %v2085_v31 = vadd.f32 %v5333_v42, %v2084_v26  ;;  %v1607_v32 = vpop.f32.mrf.mxu0 }
 0x13d   : > { %v1767_v33 = vpop.f32.mrf.mxu1  ;;  %v4821_v37 = vpop.eup %4820  ;;  %v1608_v43 = vadd.f32 %v5333_v42, %v1607_v32 }
 0x13e   : > { %4828 = vtanh.f32 %v1925_v30  ;;  %v4823_v38 = vpop.eup %4822  ;;  %v3916_v39 = vpack.c.bf16 %v4821_v37, %v4817_v29  ;;  %v1768_v45 = vadd.f32 %v5333_v42, %v1767_v33  ;;  %v3788_v29 = vld [vmem:[%s5260_s23 + $0x1a0] sm:$0xff] }
 0x13f   : > { %4830 = vtanh.f32 %v2085_v31  ;;  %3621 = vmatmul.msk.bf16.gmra.mxu0 %vm1163_vm0, %v3754_v27  ;;  %3653 = vmatmul.msk.bf16.gmra.mxu1 %vm1163_vm0, %v3786_v28  ;;  %v4076_v40 = vpack.c.bf16 %v4823_v38, %v4819_v36  ;;  %v4825_v41 = vpop.eup %4824  ;;  %v3756_v28 = vld [vmem:[%s5260_s23 + $0xa0] sm:$0xff] }
 0x140   : > { %3685 = vmatmul.msk.bf16.gmra.mxu2 %vm1163_vm0, %v3818_v34  ;;  %3717 = vmatmul.msk.bf16.gmra.mxu3 %vm1163_vm0, %v3850_v35  ;;  %4516 = vst [vmem:[%s5356_s28 + $0x48] sm:$0xff] %v3916_v39   ;;  %v4827_v44 = vpop.eup %4826  ;;  %4832 = vtanh.f32 %v1608_v43  ;;  %v3820_v35 = vld [vmem:[%s5260_s23 + $0x2a0] sm:$0xff] }
 0x141   : > { %4548 = vst [vmem:[%s5356_s28 + $0x148] sm:$0xff] %v4076_v40   ;;  %4834 = vtanh.f32 %v1768_v45  ;;  %v3852_v36 = vld [vmem:[%s5260_s23 + $0x3a0] sm:$0xff] }
 0x143   : > { %v1927_v46 = vpop.f32.mrf.mxu2  ;;  %v2087_v47 = vpop.f32.mrf.mxu3 }
 0x144   : > { %v4829_v48 = vpop.eup %4828  ;;  %v1609_v49 = vpop.f32.mrf.mxu0  ;;  %v1928_v56 = vadd.f32 %v5333_v42, %v1927_v46  ;;  %v2088_v57 = vadd.f32 %v5333_v42, %v2087_v47 }
 0x145   : > { %v1769_v50 = vpop.f32.mrf.mxu1  ;;  %v4831_v51 = vpop.eup %4830  ;;  %v4236_v52 = vpack.c.bf16 %v4829_v48, %v4825_v41  ;;  %v1610_v53 = vadd.f32 %v5333_v42, %v1609_v49 }
 0x146   : > { %v1770_v54 = vadd.f32 %v5333_v42, %v1769_v50  ;;  %v4396_v55 = vpack.c.bf16 %v4831_v51, %v4827_v44  ;;  %v4833_v62 = vpop.eup %4832 }
 0x147   : > { %4580 = vst [vmem:[%s5356_s28 + $0x248] sm:$0xff] %v4236_v52   ;;  %4836 = vtanh.f32 %v1610_v53  ;;  %v4835_v5 = vpop.eup %4834 }
 0x148   : > { %4612 = vst [vmem:[%s5356_s28 + $0x348] sm:$0xff] %v4396_v55   ;;  %4838 = vtanh.f32 %v1770_v54 }
 0x149   : > { %4840 = vtanh.f32 %v1928_v56 }
 0x14a   : > { %4842 = vtanh.f32 %v2088_v57 }
 0x14b   : > { %v1929_v58 = vpop.f32.mrf.mxu2  ;;  %v2089_v59 = vpop.f32.mrf.mxu3 }
 0x14c   : > { %v1930_v63 = vadd.f32 %v5333_v42, %v1929_v58  ;;  %v2090_v0 = vadd.f32 %v5333_v42, %v2089_v59  ;;  %v1612_v1 = vpop.f32.mrf.mxu0 }
 0x14d   : > { %v1772_v2 = vpop.f32.mrf.mxu1  ;;  %v4837_v6 = vpop.eup %4836  ;;  %v1613_v11 = vadd.f32 %v5567_v10, %v1612_v1 }
 0x14e   : > { %4844 = vtanh.f32 %v1930_v63  ;;  %v4839_v7 = vpop.eup %4838  ;;  %v3921_v8 = vpack.c.bf16 %v4837_v6, %v4833_v62  ;;  %v1773_v13 = vadd.f32 %v5567_v10, %v1772_v2  ;;  %v3789_v62 = vld [vmem:[%s5260_s23 + $0x1a8] sm:$0xff] }
 0x14f   : > { %4846 = vtanh.f32 %v2090_v0  ;;  %3622 = vmatmul.msk.bf16.gmra.mxu0 %vm1163_vm0, %v3755_v60  ;;  %3654 = vmatmul.msk.bf16.gmra.mxu1 %vm1163_vm0, %v3787_v61  ;;  %v4081_v9 = vpack.c.bf16 %v4839_v7, %v4835_v5  ;;  %v4841_v42 = vpop.eup %4840  ;;  %v3757_v61 = vld [vmem:[%s5260_s23 + $0xa8] sm:$0xff] }
 0x150   : > { %3686 = vmatmul.msk.bf16.gmra.mxu2 %vm1163_vm0, %v3819_v3  ;;  %3718 = vmatmul.msk.bf16.gmra.mxu3 %vm1163_vm0, %v3851_v4  ;;  %4517 = vst [vmem:[%s5356_s28 + $0x50] sm:$0xff] %v3921_v8   ;;  %v4843_v12 = vpop.eup %4842  ;;  %4848 = vtanh.f32 %v1613_v11  ;;  %v3821_v4 = vld [vmem:[%s5260_s23 + $0x2a8] sm:$0xff] }
 0x151   : > { %4549 = vst [vmem:[%s5356_s28 + $0x150] sm:$0xff] %v4081_v9   ;;  %4850 = vtanh.f32 %v1773_v13  ;;  %v3853_v5 = vld [vmem:[%s5260_s23 + $0x3a8] sm:$0xff] }
 0x153   : > { %v1932_v14 = vpop.f32.mrf.mxu2  ;;  %v2092_v15 = vpop.f32.mrf.mxu3 }
 0x154   : > { %v4845_v16 = vpop.eup %4844  ;;  %v1614_v17 = vpop.f32.mrf.mxu0  ;;  %v1933_v24 = vadd.f32 %v5567_v10, %v1932_v14  ;;  %v2093_v25 = vadd.f32 %v5567_v10, %v2092_v15 }
 0x155   : > { %v1774_v18 = vpop.f32.mrf.mxu1  ;;  %v4847_v19 = vpop.eup %4846  ;;  %v4241_v20 = vpack.c.bf16 %v4845_v16, %v4841_v42  ;;  %v1615_v21 = vadd.f32 %v5567_v10, %v1614_v17 }
 0x156   : > { %v1775_v22 = vadd.f32 %v5567_v10, %v1774_v18  ;;  %v4401_v23 = vpack.c.bf16 %v4847_v19, %v4843_v12  ;;  %v4849_v30 = vpop.eup %4848 }
 0x157   : > { %4581 = vst [vmem:[%s5356_s28 + $0x250] sm:$0xff] %v4241_v20   ;;  %4852 = vtanh.f32 %v1615_v21  ;;  %v4851_v37 = vpop.eup %4850 }
 0x158   : > { %4613 = vst [vmem:[%s5356_s28 + $0x350] sm:$0xff] %v4401_v23   ;;  %4854 = vtanh.f32 %v1775_v22 }
 0x159   : > { %4856 = vtanh.f32 %v1933_v24 }
 0x15a   : > { %4858 = vtanh.f32 %v2093_v25 }
 0x15b   : > { %v1934_v26 = vpop.f32.mrf.mxu2  ;;  %v2094_v27 = vpop.f32.mrf.mxu3 }
 0x15c   : > { %v1935_v31 = vadd.f32 %v5567_v10, %v1934_v26  ;;  %v2095_v32 = vadd.f32 %v5567_v10, %v2094_v27  ;;  %v1617_v33 = vpop.f32.mrf.mxu0 }
 0x15d   : > { %v1777_v34 = vpop.f32.mrf.mxu1  ;;  %v4853_v38 = vpop.eup %4852  ;;  %v1618_v44 = vadd.f32 %v5567_v10, %v1617_v33 }
 0x15e   : > { %4860 = vtanh.f32 %v1935_v31  ;;  %v4855_v39 = vpop.eup %4854  ;;  %v3926_v40 = vpack.c.bf16 %v4853_v38, %v4849_v30  ;;  %v1778_v46 = vadd.f32 %v5567_v10, %v1777_v34  ;;  %v3790_v30 = vld [vmem:[%s5260_s23 + $0x1b0] sm:$0xff] }
 0x15f   : > { %4862 = vtanh.f32 %v2095_v32  ;;  %3623 = vmatmul.msk.bf16.gmra.mxu0 %vm1163_vm0, %v3756_v28  ;;  %3655 = vmatmul.msk.bf16.gmra.mxu1 %vm1163_vm0, %v3788_v29  ;;  %v4086_v41 = vpack.c.bf16 %v4855_v39, %v4851_v37  ;;  %v4857_v43 = vpop.eup %4856  ;;  %v3758_v29 = vld [vmem:[%s5260_s23 + $0xb0] sm:$0xff] }
 0x160   : > { %3687 = vmatmul.msk.bf16.gmra.mxu2 %vm1163_vm0, %v3820_v35  ;;  %3719 = vmatmul.msk.bf16.gmra.mxu3 %vm1163_vm0, %v3852_v36  ;;  %4518 = vst [vmem:[%s5356_s28 + $0x58] sm:$0xff] %v3926_v40   ;;  %v4859_v45 = vpop.eup %4858  ;;  %4864 = vtanh.f32 %v1618_v44  ;;  %v3822_v36 = vld [vmem:[%s5260_s23 + $0x2b0] sm:$0xff] }
 0x161   : > { %4550 = vst [vmem:[%s5356_s28 + $0x158] sm:$0xff] %v4086_v41   ;;  %4866 = vtanh.f32 %v1778_v46  ;;  %v3854_v37 = vld [vmem:[%s5260_s23 + $0x3b0] sm:$0xff] }
 0x163   : > { %v1937_v47 = vpop.f32.mrf.mxu2  ;;  %v2097_v48 = vpop.f32.mrf.mxu3 }
 0x164   : > { %v4861_v49 = vpop.eup %4860  ;;  %v1619_v50 = vpop.f32.mrf.mxu0  ;;  %v1938_v57 = vadd.f32 %v5567_v10, %v1937_v47  ;;  %v2098_v58 = vadd.f32 %v5567_v10, %v2097_v48 }
 0x165   : > { %v1779_v51 = vpop.f32.mrf.mxu1  ;;  %v4863_v52 = vpop.eup %4862  ;;  %v4246_v53 = vpack.c.bf16 %v4861_v49, %v4857_v43  ;;  %v1620_v54 = vadd.f32 %v5567_v10, %v1619_v50 }
 0x166   : > { %v1780_v55 = vadd.f32 %v5567_v10, %v1779_v51  ;;  %v4406_v56 = vpack.c.bf16 %v4863_v52, %v4859_v45  ;;  %v4865_v63 = vpop.eup %4864 }
 0x167   : > { %4582 = vst [vmem:[%s5356_s28 + $0x258] sm:$0xff] %v4246_v53   ;;  %4868 = vtanh.f32 %v1620_v54  ;;  %v4867_v6 = vpop.eup %4866 }
 0x168   : > { %4614 = vst [vmem:[%s5356_s28 + $0x358] sm:$0xff] %v4406_v56   ;;  %4870 = vtanh.f32 %v1780_v55 }
 0x169   : > { %4872 = vtanh.f32 %v1938_v57 }
 0x16a   : > { %4874 = vtanh.f32 %v2098_v58 }
 0x16b   : > { %v1939_v59 = vpop.f32.mrf.mxu2  ;;  %v2099_v60 = vpop.f32.mrf.mxu3 }
 0x16c   : > { %v1940_v0 = vadd.f32 %v5567_v10, %v1939_v59  ;;  %v2100_v1 = vadd.f32 %v5567_v10, %v2099_v60  ;;  %v1622_v2 = vpop.f32.mrf.mxu0 }
 0x16d   : > { %v1782_v3 = vpop.f32.mrf.mxu1  ;;  %v4869_v7 = vpop.eup %4868  ;;  %v1623_v12 = vadd.f32 %v5567_v10, %v1622_v2 }
 0x16e   : > { %4876 = vtanh.f32 %v1940_v0  ;;  %v4871_v8 = vpop.eup %4870  ;;  %v3931_v9 = vpack.c.bf16 %v4869_v7, %v4865_v63  ;;  %v1783_v14 = vadd.f32 %v5567_v10, %v1782_v3  ;;  %v3791_v63 = vld [vmem:[%s5260_s23 + $0x1b8] sm:$0xff] }
 0x16f   : > { %4878 = vtanh.f32 %v2100_v1  ;;  %3624 = vmatmul.msk.bf16.gmra.mxu0 %vm1163_vm0, %v3757_v61  ;;  %3656 = vmatmul.msk.bf16.gmra.mxu1 %vm1163_vm0, %v3789_v62  ;;  %v4091_v42 = vpack.c.bf16 %v4871_v8, %v4867_v6  ;;  %v4873_v11 = vpop.eup %4872  ;;  %v3759_v62 = vld [vmem:[%s5260_s23 + $0xb8] sm:$0xff] }
 0x170   : > { %3688 = vmatmul.msk.bf16.gmra.mxu2 %vm1163_vm0, %v3821_v4  ;;  %3720 = vmatmul.msk.bf16.gmra.mxu3 %vm1163_vm0, %v3853_v5  ;;  %4519 = vst [vmem:[%s5356_s28 + $0x60] sm:$0xff] %v3931_v9   ;;  %v4875_v13 = vpop.eup %4874  ;;  %4880 = vtanh.f32 %v1623_v12  ;;  %v3823_v5 = vld [vmem:[%s5260_s23 + $0x2b8] sm:$0xff] }
 0x171   : > { %4551 = vst [vmem:[%s5356_s28 + $0x160] sm:$0xff] %v4091_v42   ;;  %4882 = vtanh.f32 %v1783_v14  ;;  %v3855_v6 = vld [vmem:[%s5260_s23 + $0x3b8] sm:$0xff] }
 0x173   : > { %v1942_v15 = vpop.f32.mrf.mxu2  ;;  %v2102_v16 = vpop.f32.mrf.mxu3 }
 0x174   : > { %v4877_v17 = vpop.eup %4876  ;;  %v1624_v18 = vpop.f32.mrf.mxu0  ;;  %v1943_v25 = vadd.f32 %v5567_v10, %v1942_v15  ;;  %v2103_v26 = vadd.f32 %v5567_v10, %v2102_v16 }
 0x175   : > { %v1784_v19 = vpop.f32.mrf.mxu1  ;;  %v4879_v20 = vpop.eup %4878  ;;  %v4251_v21 = vpack.c.bf16 %v4877_v17, %v4873_v11  ;;  %v1625_v22 = vadd.f32 %v5567_v10, %v1624_v18 }
 0x176   : > { %v1785_v23 = vadd.f32 %v5567_v10, %v1784_v19  ;;  %v4411_v24 = vpack.c.bf16 %v4879_v20, %v4875_v13  ;;  %v4881_v31 = vpop.eup %4880 }
 0x177   : > { %4583 = vst [vmem:[%s5356_s28 + $0x260] sm:$0xff] %v4251_v21   ;;  %4884 = vtanh.f32 %v1625_v22  ;;  %v4883_v38 = vpop.eup %4882 }
 0x178   : > { %4615 = vst [vmem:[%s5356_s28 + $0x360] sm:$0xff] %v4411_v24   ;;  %4886 = vtanh.f32 %v1785_v23 }
 0x179   : > { %4888 = vtanh.f32 %v1943_v25 }
 0x17a   : > { %4890 = vtanh.f32 %v2103_v26 }
 0x17b   : > { %v1944_v27 = vpop.f32.mrf.mxu2  ;;  %v2104_v28 = vpop.f32.mrf.mxu3 }
 0x17c   : > { %v1945_v32 = vadd.f32 %v5567_v10, %v1944_v27  ;;  %v2105_v33 = vadd.f32 %v5567_v10, %v2104_v28  ;;  %v1627_v34 = vpop.f32.mrf.mxu0 }
 0x17d   : > { %v1787_v35 = vpop.f32.mrf.mxu1  ;;  %v4885_v39 = vpop.eup %4884  ;;  %v1628_v45 = vadd.f32 %v5567_v10, %v1627_v34 }
 0x17e   : > { %4892 = vtanh.f32 %v1945_v32  ;;  %v4887_v40 = vpop.eup %4886  ;;  %v3936_v41 = vpack.c.bf16 %v4885_v39, %v4881_v31  ;;  %v1788_v47 = vadd.f32 %v5567_v10, %v1787_v35  ;;  %v3792_v31 = vld [vmem:[%s5260_s23 + $0x1c0] sm:$0xff] }
 0x17f   : > { %4894 = vtanh.f32 %v2105_v33  ;;  %3625 = vmatmul.msk.bf16.gmra.mxu0 %vm1163_vm0, %v3758_v29  ;;  %3657 = vmatmul.msk.bf16.gmra.mxu1 %vm1163_vm0, %v3790_v30  ;;  %v4096_v43 = vpack.c.bf16 %v4887_v40, %v4883_v38  ;;  %v4889_v44 = vpop.eup %4888  ;;  %v3760_v30 = vld [vmem:[%s5260_s23 + $0xc0] sm:$0xff] }
 0x180   : > { %3689 = vmatmul.msk.bf16.gmra.mxu2 %vm1163_vm0, %v3822_v36  ;;  %3721 = vmatmul.msk.bf16.gmra.mxu3 %vm1163_vm0, %v3854_v37  ;;  %4520 = vst [vmem:[%s5356_s28 + $0x68] sm:$0xff] %v3936_v41   ;;  %v4891_v46 = vpop.eup %4890  ;;  %4896 = vtanh.f32 %v1628_v45  ;;  %v3824_v37 = vld [vmem:[%s5260_s23 + $0x2c0] sm:$0xff] }
 0x181   : > { %4552 = vst [vmem:[%s5356_s28 + $0x168] sm:$0xff] %v4096_v43   ;;  %4898 = vtanh.f32 %v1788_v47  ;;  %v3856_v38 = vld [vmem:[%s5260_s23 + $0x3c0] sm:$0xff] }
 0x183   : > { %v1947_v48 = vpop.f32.mrf.mxu2  ;;  %v2107_v49 = vpop.f32.mrf.mxu3 }
 0x184   : > { %v4893_v50 = vpop.eup %4892  ;;  %v1629_v51 = vpop.f32.mrf.mxu0  ;;  %v1948_v58 = vadd.f32 %v5567_v10, %v1947_v48  ;;  %v2108_v59 = vadd.f32 %v5567_v10, %v2107_v49 }
 0x185   : > { %v1789_v52 = vpop.f32.mrf.mxu1  ;;  %v4895_v53 = vpop.eup %4894  ;;  %v4256_v54 = vpack.c.bf16 %v4893_v50, %v4889_v44  ;;  %v1630_v55 = vadd.f32 %v5567_v10, %v1629_v51 }
 0x186   : > { %v1790_v56 = vadd.f32 %v5567_v10, %v1789_v52  ;;  %v4416_v57 = vpack.c.bf16 %v4895_v53, %v4891_v46  ;;  %v4897_v0 = vpop.eup %4896 }
 0x187   : > { %4584 = vst [vmem:[%s5356_s28 + $0x268] sm:$0xff] %v4256_v54   ;;  %4900 = vtanh.f32 %v1630_v55  ;;  %v4899_v7 = vpop.eup %4898 }
 0x188   : > { %4616 = vst [vmem:[%s5356_s28 + $0x368] sm:$0xff] %v4416_v57   ;;  %4902 = vtanh.f32 %v1790_v56 }
 0x189   : > { %4904 = vtanh.f32 %v1948_v58 }
 0x18a   : > { %4906 = vtanh.f32 %v2108_v59 }
 0x18b   : > { %v1949_v60 = vpop.f32.mrf.mxu2  ;;  %v2109_v61 = vpop.f32.mrf.mxu3 }
 0x18c   : > { %v1950_v1 = vadd.f32 %v5567_v10, %v1949_v60  ;;  %v2110_v2 = vadd.f32 %v5567_v10, %v2109_v61  ;;  %v1632_v3 = vpop.f32.mrf.mxu0 }
 0x18d   : > { %v1792_v4 = vpop.f32.mrf.mxu1  ;;  %v4901_v8 = vpop.eup %4900  ;;  %v1633_v13 = vadd.f32 %v5567_v10, %v1632_v3 }
 0x18e   : > { %4908 = vtanh.f32 %v1950_v1  ;;  %v4903_v9 = vpop.eup %4902  ;;  %v3941_v42 = vpack.c.bf16 %v4901_v8, %v4897_v0  ;;  %v1793_v15 = vadd.f32 %v5567_v10, %v1792_v4  ;;  %v3793_v0 = vld [vmem:[%s5260_s23 + $0x1c8] sm:$0xff] }
 0x18f   : > { %4910 = vtanh.f32 %v2110_v2  ;;  %3626 = vmatmul.msk.bf16.gmra.mxu0 %vm1163_vm0, %v3759_v62  ;;  %3658 = vmatmul.msk.bf16.gmra.mxu1 %vm1163_vm0, %v3791_v63  ;;  %v4101_v11 = vpack.c.bf16 %v4903_v9, %v4899_v7  ;;  %v4905_v12 = vpop.eup %4904  ;;  %v3761_v63 = vld [vmem:[%s5260_s23 + $0xc8] sm:$0xff] }
 0x190   : > { %3690 = vmatmul.msk.bf16.gmra.mxu2 %vm1163_vm0, %v3823_v5  ;;  %3722 = vmatmul.msk.bf16.gmra.mxu3 %vm1163_vm0, %v3855_v6  ;;  %4521 = vst [vmem:[%s5356_s28 + $0x70] sm:$0xff] %v3941_v42   ;;  %v4907_v14 = vpop.eup %4906  ;;  %4912 = vtanh.f32 %v1633_v13  ;;  %v3825_v6 = vld [vmem:[%s5260_s23 + $0x2c8] sm:$0xff] }
 0x191   : > { %4553 = vst [vmem:[%s5356_s28 + $0x170] sm:$0xff] %v4101_v11   ;;  %4914 = vtanh.f32 %v1793_v15  ;;  %v3857_v7 = vld [vmem:[%s5260_s23 + $0x3c8] sm:$0xff] }
 0x193   : > { %v1952_v16 = vpop.f32.mrf.mxu2  ;;  %v2112_v17 = vpop.f32.mrf.mxu3 }
 0x194   : > { %v4909_v18 = vpop.eup %4908  ;;  %v1634_v19 = vpop.f32.mrf.mxu0  ;;  %v1953_v26 = vadd.f32 %v5567_v10, %v1952_v16  ;;  %v2113_v27 = vadd.f32 %v5567_v10, %v2112_v17 }
 0x195   : > { %v1794_v20 = vpop.f32.mrf.mxu1  ;;  %v4911_v21 = vpop.eup %4910  ;;  %v4261_v22 = vpack.c.bf16 %v4909_v18, %v4905_v12  ;;  %v1635_v23 = vadd.f32 %v5567_v10, %v1634_v19 }
 0x196   : > { %v1795_v24 = vadd.f32 %v5567_v10, %v1794_v20  ;;  %v4421_v25 = vpack.c.bf16 %v4911_v21, %v4907_v14  ;;  %v4913_v32 = vpop.eup %4912 }
 0x197   : > { %4585 = vst [vmem:[%s5356_s28 + $0x270] sm:$0xff] %v4261_v22   ;;  %4916 = vtanh.f32 %v1635_v23  ;;  %v4915_v39 = vpop.eup %4914 }
 0x198   : > { %4617 = vst [vmem:[%s5356_s28 + $0x370] sm:$0xff] %v4421_v25   ;;  %4918 = vtanh.f32 %v1795_v24 }
 0x199   : > { %4920 = vtanh.f32 %v1953_v26 }
 0x19a   : > { %4922 = vtanh.f32 %v2113_v27 }
 0x19b   : > { %v1954_v28 = vpop.f32.mrf.mxu2  ;;  %v2114_v29 = vpop.f32.mrf.mxu3 }
 0x19c   : > { %v1955_v33 = vadd.f32 %v5567_v10, %v1954_v28  ;;  %v2115_v34 = vadd.f32 %v5567_v10, %v2114_v29  ;;  %v1637_v35 = vpop.f32.mrf.mxu0 }
 0x19d   : > { %v1797_v36 = vpop.f32.mrf.mxu1  ;;  %v4917_v40 = vpop.eup %4916  ;;  %v1638_v46 = vadd.f32 %v5567_v10, %v1637_v35 }
 0x19e   : > { %4924 = vtanh.f32 %v1955_v33  ;;  %v4919_v41 = vpop.eup %4918  ;;  %v3946_v43 = vpack.c.bf16 %v4917_v40, %v4913_v32  ;;  %v1798_v48 = vadd.f32 %v5567_v10, %v1797_v36  ;;  %v3794_v32 = vld [vmem:[%s5260_s23 + $0x1d0] sm:$0xff] }
 0x19f   : > { %4926 = vtanh.f32 %v2115_v34  ;;  %3627 = vmatmul.msk.bf16.gmra.mxu0 %vm1163_vm0, %v3760_v30  ;;  %3659 = vmatmul.msk.bf16.gmra.mxu1 %vm1163_vm0, %v3792_v31  ;;  %v4106_v44 = vpack.c.bf16 %v4919_v41, %v4915_v39  ;;  %v4921_v45 = vpop.eup %4920  ;;  %v3762_v31 = vld [vmem:[%s5260_s23 + $0xd0] sm:$0xff] }
 0x1a0   : > { %3691 = vmatmul.msk.bf16.gmra.mxu2 %vm1163_vm0, %v3824_v37  ;;  %3723 = vmatmul.msk.bf16.gmra.mxu3 %vm1163_vm0, %v3856_v38  ;;  %4522 = vst [vmem:[%s5356_s28 + $0x78] sm:$0xff] %v3946_v43   ;;  %v4923_v47 = vpop.eup %4922  ;;  %4928 = vtanh.f32 %v1638_v46  ;;  %v3826_v38 = vld [vmem:[%s5260_s23 + $0x2d0] sm:$0xff] }
 0x1a1   : > { %4554 = vst [vmem:[%s5356_s28 + $0x178] sm:$0xff] %v4106_v44   ;;  %4930 = vtanh.f32 %v1798_v48  ;;  %v3858_v39 = vld [vmem:[%s5260_s23 + $0x3d0] sm:$0xff] }
 0x1a3   : > { %v1957_v49 = vpop.f32.mrf.mxu2  ;;  %v2117_v50 = vpop.f32.mrf.mxu3 }
 0x1a4   : > { %v4925_v51 = vpop.eup %4924  ;;  %v1639_v52 = vpop.f32.mrf.mxu0  ;;  %v1958_v59 = vadd.f32 %v5567_v10, %v1957_v49  ;;  %v2118_v60 = vadd.f32 %v5567_v10, %v2117_v50 }
 0x1a5   : > { %v1799_v53 = vpop.f32.mrf.mxu1  ;;  %v4927_v54 = vpop.eup %4926  ;;  %v4266_v55 = vpack.c.bf16 %v4925_v51, %v4921_v45  ;;  %v1640_v56 = vadd.f32 %v5567_v10, %v1639_v52 }
 0x1a6   : > { %v1800_v57 = vadd.f32 %v5567_v10, %v1799_v53  ;;  %v4426_v58 = vpack.c.bf16 %v4927_v54, %v4923_v47  ;;  %v4929_v1 = vpop.eup %4928 }
 0x1a7   : > { %4586 = vst [vmem:[%s5356_s28 + $0x278] sm:$0xff] %v4266_v55   ;;  %4932 = vtanh.f32 %v1640_v56  ;;  %v4931_v8 = vpop.eup %4930 }
 0x1a8   : > { %4618 = vst [vmem:[%s5356_s28 + $0x378] sm:$0xff] %v4426_v58   ;;  %4934 = vtanh.f32 %v1800_v57 }
 0x1a9   : > { %4936 = vtanh.f32 %v1958_v59 }
 0x1aa   : > { %4938 = vtanh.f32 %v2118_v60 }
 0x1ab   : > { %v1959_v61 = vpop.f32.mrf.mxu2  ;;  %v2119_v62 = vpop.f32.mrf.mxu3 }
 0x1ac   : > { %v1960_v2 = vadd.f32 %v5567_v10, %v1959_v61  ;;  %v2120_v3 = vadd.f32 %v5567_v10, %v2119_v62  ;;  %v1642_v4 = vpop.f32.mrf.mxu0 }
 0x1ad   : > { %v1802_v5 = vpop.f32.mrf.mxu1  ;;  %v4933_v9 = vpop.eup %4932  ;;  %v1643_v14 = vadd.f32 %v5567_v10, %v1642_v4 }
 0x1ae   : > { %4940 = vtanh.f32 %v1960_v2  ;;  %v4935_v42 = vpop.eup %4934  ;;  %v3951_v11 = vpack.c.bf16 %v4933_v9, %v4929_v1  ;;  %v1803_v16 = vadd.f32 %v5567_v10, %v1802_v5  ;;  %v3795_v1 = vld [vmem:[%s5260_s23 + $0x1d8] sm:$0xff] }
 0x1af   : > { %4942 = vtanh.f32 %v2120_v3  ;;  %3628 = vmatmul.msk.bf16.gmra.mxu0 %vm1163_vm0, %v3761_v63  ;;  %3660 = vmatmul.msk.bf16.gmra.mxu1 %vm1163_vm0, %v3793_v0  ;;  %v4111_v12 = vpack.c.bf16 %v4935_v42, %v4931_v8  ;;  %v4937_v13 = vpop.eup %4936  ;;  %v3763_v0 = vld [vmem:[%s5260_s23 + $0xd8] sm:$0xff] }
 0x1b0   : > { %3692 = vmatmul.msk.bf16.gmra.mxu2 %vm1163_vm0, %v3825_v6  ;;  %3724 = vmatmul.msk.bf16.gmra.mxu3 %vm1163_vm0, %v3857_v7  ;;  %4523 = vst [vmem:[%s5356_s28 + $0x80] sm:$0xff] %v3951_v11   ;;  %v4939_v15 = vpop.eup %4938  ;;  %4944 = vtanh.f32 %v1643_v14  ;;  %v3827_v7 = vld [vmem:[%s5260_s23 + $0x2d8] sm:$0xff] }
 0x1b1   : > { %4555 = vst [vmem:[%s5356_s28 + $0x180] sm:$0xff] %v4111_v12   ;;  %4946 = vtanh.f32 %v1803_v16  ;;  %v3859_v8 = vld [vmem:[%s5260_s23 + $0x3d8] sm:$0xff] }
 0x1b3   : > { %v1962_v17 = vpop.f32.mrf.mxu2  ;;  %v2122_v18 = vpop.f32.mrf.mxu3 }
 0x1b4   : > { %v4941_v19 = vpop.eup %4940  ;;  %v1644_v20 = vpop.f32.mrf.mxu0  ;;  %v1963_v27 = vadd.f32 %v5567_v10, %v1962_v17  ;;  %v2123_v28 = vadd.f32 %v5567_v10, %v2122_v18 }
 0x1b5   : > { %v1804_v21 = vpop.f32.mrf.mxu1  ;;  %v4943_v22 = vpop.eup %4942  ;;  %v4271_v23 = vpack.c.bf16 %v4941_v19, %v4937_v13  ;;  %v1645_v24 = vadd.f32 %v5567_v10, %v1644_v20 }
 0x1b6   : > { %v1805_v25 = vadd.f32 %v5567_v10, %v1804_v21  ;;  %v4431_v26 = vpack.c.bf16 %v4943_v22, %v4939_v15  ;;  %v4945_v33 = vpop.eup %4944 }
 0x1b7   : > { %4587 = vst [vmem:[%s5356_s28 + $0x280] sm:$0xff] %v4271_v23   ;;  %4948 = vtanh.f32 %v1645_v24  ;;  %v4947_v40 = vpop.eup %4946 }
 0x1b8   : > { %4619 = vst [vmem:[%s5356_s28 + $0x380] sm:$0xff] %v4431_v26   ;;  %4950 = vtanh.f32 %v1805_v25 }
 0x1b9   : > { %4952 = vtanh.f32 %v1963_v27 }
 0x1ba   : > { %4954 = vtanh.f32 %v2123_v28 }
 0x1bb   : > { %v1964_v29 = vpop.f32.mrf.mxu2  ;;  %v2124_v30 = vpop.f32.mrf.mxu3 }
 0x1bc   : > { %v1965_v34 = vadd.f32 %v5567_v10, %v1964_v29  ;;  %v2125_v35 = vadd.f32 %v5567_v10, %v2124_v30  ;;  %v1647_v36 = vpop.f32.mrf.mxu0 }
 0x1bd   : > { %v1807_v37 = vpop.f32.mrf.mxu1  ;;  %v4949_v41 = vpop.eup %4948  ;;  %v1648_v47 = vadd.f32 %v5567_v10, %v1647_v36 }
 0x1be   : > { %4956 = vtanh.f32 %v1965_v34  ;;  %v4951_v43 = vpop.eup %4950  ;;  %v3956_v44 = vpack.c.bf16 %v4949_v41, %v4945_v33  ;;  %v1808_v49 = vadd.f32 %v5567_v10, %v1807_v37  ;;  %v3796_v33 = vld [vmem:[%s5260_s23 + $0x1e0] sm:$0xff] }
 0x1bf   : > { %4958 = vtanh.f32 %v2125_v35  ;;  %3629 = vmatmul.msk.bf16.gmra.mxu0 %vm1163_vm0, %v3762_v31  ;;  %3661 = vmatmul.msk.bf16.gmra.mxu1 %vm1163_vm0, %v3794_v32  ;;  %v4116_v45 = vpack.c.bf16 %v4951_v43, %v4947_v40  ;;  %v4953_v46 = vpop.eup %4952  ;;  %v3764_v32 = vld [vmem:[%s5260_s23 + $0xe0] sm:$0xff] }
 0x1c0   : > { %3693 = vmatmul.msk.bf16.gmra.mxu2 %vm1163_vm0, %v3826_v38  ;;  %3725 = vmatmul.msk.bf16.gmra.mxu3 %vm1163_vm0, %v3858_v39  ;;  %4524 = vst [vmem:[%s5356_s28 + $0x88] sm:$0xff] %v3956_v44   ;;  %v4955_v48 = vpop.eup %4954  ;;  %4960 = vtanh.f32 %v1648_v47  ;;  %v3828_v39 = vld [vmem:[%s5260_s23 + $0x2e0] sm:$0xff] }
 0x1c1   : > { %4556 = vst [vmem:[%s5356_s28 + $0x188] sm:$0xff] %v4116_v45   ;;  %4962 = vtanh.f32 %v1808_v49  ;;  %v3860_v40 = vld [vmem:[%s5260_s23 + $0x3e0] sm:$0xff] }
 0x1c3   : > { %v1967_v50 = vpop.f32.mrf.mxu2  ;;  %v2127_v51 = vpop.f32.mrf.mxu3 }
 0x1c4   : > { %v4957_v52 = vpop.eup %4956  ;;  %v1649_v53 = vpop.f32.mrf.mxu0  ;;  %v1968_v60 = vadd.f32 %v5567_v10, %v1967_v50  ;;  %v2128_v61 = vadd.f32 %v5567_v10, %v2127_v51 }
 0x1c5   : > { %v1809_v54 = vpop.f32.mrf.mxu1  ;;  %v4959_v55 = vpop.eup %4958  ;;  %v4276_v56 = vpack.c.bf16 %v4957_v52, %v4953_v46  ;;  %v1650_v57 = vadd.f32 %v5567_v10, %v1649_v53 }
 0x1c6   : > { %v1810_v58 = vadd.f32 %v5567_v10, %v1809_v54  ;;  %v4436_v59 = vpack.c.bf16 %v4959_v55, %v4955_v48  ;;  %v4961_v2 = vpop.eup %4960 }
 0x1c7   : > { %4588 = vst [vmem:[%s5356_s28 + $0x288] sm:$0xff] %v4276_v56   ;;  %4964 = vtanh.f32 %v1650_v57  ;;  %v4963_v9 = vpop.eup %4962 }
 0x1c8   : > { %4620 = vst [vmem:[%s5356_s28 + $0x388] sm:$0xff] %v4436_v59   ;;  %4966 = vtanh.f32 %v1810_v58 }
 0x1c9   : > { %4968 = vtanh.f32 %v1968_v60 }
 0x1ca   : > { %4970 = vtanh.f32 %v2128_v61 }
 0x1cb   : > { %v1969_v62 = vpop.f32.mrf.mxu2  ;;  %v2129_v63 = vpop.f32.mrf.mxu3 }
 0x1cc   : > { %v1970_v3 = vadd.f32 %v5567_v10, %v1969_v62  ;;  %v2130_v4 = vadd.f32 %v5567_v10, %v2129_v63  ;;  %v1652_v5 = vpop.f32.mrf.mxu0 }
 0x1cd   : > { %v1812_v6 = vpop.f32.mrf.mxu1  ;;  %v4965_v42 = vpop.eup %4964  ;;  %v1653_v15 = vadd.f32 %v5567_v10, %v1652_v5 }
 0x1ce   : > { %4972 = vtanh.f32 %v1970_v3  ;;  %v4967_v11 = vpop.eup %4966  ;;  %v3961_v12 = vpack.c.bf16 %v4965_v42, %v4961_v2  ;;  %v1813_v17 = vadd.f32 %v5567_v10, %v1812_v6  ;;  %v3797_v2 = vld [vmem:[%s5260_s23 + $0x1e8] sm:$0xff] }
 0x1cf   : > { %4974 = vtanh.f32 %v2130_v4  ;;  %3630 = vmatmul.msk.bf16.gmra.mxu0 %vm1163_vm0, %v3763_v0  ;;  %3662 = vmatmul.msk.bf16.gmra.mxu1 %vm1163_vm0, %v3795_v1  ;;  %v4121_v13 = vpack.c.bf16 %v4967_v11, %v4963_v9  ;;  %v4969_v14 = vpop.eup %4968  ;;  %v3765_v1 = vld [vmem:[%s5260_s23 + $0xe8] sm:$0xff] }
 0x1d0   : > { %3694 = vmatmul.msk.bf16.gmra.mxu2 %vm1163_vm0, %v3827_v7  ;;  %3726 = vmatmul.msk.bf16.gmra.mxu3 %vm1163_vm0, %v3859_v8  ;;  %4525 = vst [vmem:[%s5356_s28 + $0x90] sm:$0xff] %v3961_v12   ;;  %v4971_v16 = vpop.eup %4970  ;;  %4976 = vtanh.f32 %v1653_v15  ;;  %v3829_v8 = vld [vmem:[%s5260_s23 + $0x2e8] sm:$0xff] }
 0x1d1   : > { %4557 = vst [vmem:[%s5356_s28 + $0x190] sm:$0xff] %v4121_v13   ;;  %4978 = vtanh.f32 %v1813_v17  ;;  %v3861_v9 = vld [vmem:[%s5260_s23 + $0x3e8] sm:$0xff] }
 0x1d3   : > { %v1972_v18 = vpop.f32.mrf.mxu2  ;;  %v2132_v19 = vpop.f32.mrf.mxu3 }
 0x1d4   : > { %v4973_v20 = vpop.eup %4972  ;;  %v1654_v21 = vpop.f32.mrf.mxu0  ;;  %v1973_v28 = vadd.f32 %v5567_v10, %v1972_v18  ;;  %v2133_v29 = vadd.f32 %v5567_v10, %v2132_v19 }
 0x1d5   : > { %v1814_v22 = vpop.f32.mrf.mxu1  ;;  %v4975_v23 = vpop.eup %4974  ;;  %v4281_v24 = vpack.c.bf16 %v4973_v20, %v4969_v14  ;;  %v1655_v25 = vadd.f32 %v5567_v10, %v1654_v21 }
 0x1d6   : > { %v1815_v26 = vadd.f32 %v5567_v10, %v1814_v22  ;;  %v4441_v27 = vpack.c.bf16 %v4975_v23, %v4971_v16  ;;  %v4977_v34 = vpop.eup %4976 }
 0x1d7   : > { %4589 = vst [vmem:[%s5356_s28 + $0x290] sm:$0xff] %v4281_v24   ;;  %4980 = vtanh.f32 %v1655_v25  ;;  %v4979_v41 = vpop.eup %4978 }
 0x1d8   : > { %4621 = vst [vmem:[%s5356_s28 + $0x390] sm:$0xff] %v4441_v27   ;;  %4982 = vtanh.f32 %v1815_v26 }
 0x1d9   : > { %4984 = vtanh.f32 %v1973_v28 }
 0x1da   : > { %4986 = vtanh.f32 %v2133_v29 }
 0x1db   : > { %v1974_v30 = vpop.f32.mrf.mxu2  ;;  %v2134_v31 = vpop.f32.mrf.mxu3 }
 0x1dc   : > { %v1975_v35 = vadd.f32 %v5567_v10, %v1974_v30  ;;  %v2135_v36 = vadd.f32 %v5567_v10, %v2134_v31  ;;  %v1657_v37 = vpop.f32.mrf.mxu0 }
 0x1dd   : > { %v1817_v38 = vpop.f32.mrf.mxu1  ;;  %v4981_v43 = vpop.eup %4980  ;;  %v1658_v48 = vadd.f32 %v5567_v10, %v1657_v37 }
 0x1de   : > { %4988 = vtanh.f32 %v1975_v35  ;;  %v4983_v44 = vpop.eup %4982  ;;  %v3966_v45 = vpack.c.bf16 %v4981_v43, %v4977_v34  ;;  %v1818_v50 = vadd.f32 %v5567_v10, %v1817_v38  ;;  %v3798_v34 = vld [vmem:[%s5260_s23 + $0x1f0] sm:$0xff] }
 0x1df   : > { %4990 = vtanh.f32 %v2135_v36  ;;  %3631 = vmatmul.msk.bf16.gmra.mxu0 %vm1163_vm0, %v3764_v32  ;;  %3663 = vmatmul.msk.bf16.gmra.mxu1 %vm1163_vm0, %v3796_v33  ;;  %v4126_v46 = vpack.c.bf16 %v4983_v44, %v4979_v41  ;;  %v4985_v47 = vpop.eup %4984  ;;  %v3766_v33 = vld [vmem:[%s5260_s23 + $0xf0] sm:$0xff] }
 0x1e0   : > { %3695 = vmatmul.msk.bf16.gmra.mxu2 %vm1163_vm0, %v3828_v39  ;;  %3727 = vmatmul.msk.bf16.gmra.mxu3 %vm1163_vm0, %v3860_v40  ;;  %4526 = vst [vmem:[%s5356_s28 + $0x98] sm:$0xff] %v3966_v45   ;;  %v4987_v49 = vpop.eup %4986  ;;  %4992 = vtanh.f32 %v1658_v48  ;;  %v3830_v40 = vld [vmem:[%s5260_s23 + $0x2f0] sm:$0xff]  ;;  %v5792_v48 = vld [vmem:[%s5935_s2] ss:$0 sm:$0xff] }
 0x1e1   : > { %4558 = vst [vmem:[%s5356_s28 + $0x198] sm:$0xff] %v4126_v46   ;;  %4994 = vtanh.f32 %v1818_v50  ;;  %v3862_v41 = vld [vmem:[%s5260_s23 + $0x3f0] sm:$0xff] }
 0x1e3   : > { %v1977_v51 = vpop.f32.mrf.mxu2  ;;  %v2137_v52 = vpop.f32.mrf.mxu3 }
 0x1e4   : > { %v4989_v53 = vpop.eup %4988  ;;  %v1659_v54 = vpop.f32.mrf.mxu0  ;;  %v1978_v61 = vadd.f32 %v5567_v10, %v1977_v51  ;;  %v2138_v62 = vadd.f32 %v5567_v10, %v2137_v52 }
 0x1e5   : > { %v1819_v55 = vpop.f32.mrf.mxu1  ;;  %v4991_v56 = vpop.eup %4990  ;;  %v4286_v57 = vpack.c.bf16 %v4989_v53, %v4985_v47  ;;  %v1660_v58 = vadd.f32 %v5567_v10, %v1659_v54 }
 0x1e6   : > { %v1820_v59 = vadd.f32 %v5567_v10, %v1819_v55  ;;  %v4446_v60 = vpack.c.bf16 %v4991_v56, %v4987_v49  ;;  %v4993_v3 = vpop.eup %4992 }
 0x1e7   : > { %4590 = vst [vmem:[%s5356_s28 + $0x298] sm:$0xff] %v4286_v57   ;;  %4996 = vtanh.f32 %v1660_v58  ;;  %v4995_v42 = vpop.eup %4994 }
 0x1e8   : > { %4622 = vst [vmem:[%s5356_s28 + $0x398] sm:$0xff] %v4446_v60   ;;  %4998 = vtanh.f32 %v1820_v59 }
 0x1e9   : > { %5000 = vtanh.f32 %v1978_v61 }
 0x1ea   : > { %5002 = vtanh.f32 %v2138_v62 }
 0x1eb   : > { %v1979_v63 = vpop.f32.mrf.mxu2  ;;  %v2139_v0 = vpop.f32.mrf.mxu3 }
 0x1ec   : > { %v1980_v4 = vadd.f32 %v5567_v10, %v1979_v63  ;;  %v2140_v5 = vadd.f32 %v5567_v10, %v2139_v0  ;;  %v1662_v6 = vpop.f32.mrf.mxu0 }
 0x1ed   : > { %v1822_v7 = vpop.f32.mrf.mxu1  ;;  %v4997_v11 = vpop.eup %4996  ;;  %v1663_v16 = vadd.f32 %v5567_v10, %v1662_v6 }
 0x1ee   : > { %5004 = vtanh.f32 %v1980_v4  ;;  %v4999_v12 = vpop.eup %4998  ;;  %v3971_v13 = vpack.c.bf16 %v4997_v11, %v4993_v3  ;;  %v1823_v18 = vadd.f32 %v5567_v10, %v1822_v7  ;;  %v3799_v3 = vld [vmem:[%s5260_s23 + $0x1f8] sm:$0xff] }
 0x1ef   : > { %5006 = vtanh.f32 %v2140_v5  ;;  %3632 = vmatmul.msk.bf16.gmra.mxu0 %vm1163_vm0, %v3765_v1  ;;  %3664 = vmatmul.msk.bf16.gmra.mxu1 %vm1163_vm0, %v3797_v2  ;;  %v4131_v14 = vpack.c.bf16 %v4999_v12, %v4995_v42  ;;  %v5001_v15 = vpop.eup %5000  ;;  %v3767_v2 = vld [vmem:[%s5260_s23 + $0xf8] sm:$0xff] }
 0x1f0   : > { %3696 = vmatmul.msk.bf16.gmra.mxu2 %vm1163_vm0, %v3829_v8  ;;  %3728 = vmatmul.msk.bf16.gmra.mxu3 %vm1163_vm0, %v3861_v9  ;;  %4527 = vst [vmem:[%s5356_s28 + $0xa0] sm:$0xff] %v3971_v13   ;;  %v5003_v17 = vpop.eup %5002  ;;  %5008 = vtanh.f32 %v1663_v16  ;;  %v3831_v9 = vld [vmem:[%s5260_s23 + $0x2f8] sm:$0xff] }
 0x1f1   : > { %4559 = vst [vmem:[%s5356_s28 + $0x1a0] sm:$0xff] %v4131_v14   ;;  %5010 = vtanh.f32 %v1823_v18  ;;  %v3863_v42 = vld [vmem:[%s5260_s23 + $0x3f8] sm:$0xff] }
 0x1f3   : > { %v1982_v19 = vpop.f32.mrf.mxu2  ;;  %v2142_v20 = vpop.f32.mrf.mxu3 }
 0x1f4   : > { %v5005_v21 = vpop.eup %5004  ;;  %v1664_v22 = vpop.f32.mrf.mxu0  ;;  %v1983_v29 = vadd.f32 %v5567_v10, %v1982_v19  ;;  %v2143_v30 = vadd.f32 %v5567_v10, %v2142_v20 }
 0x1f5   : > { %v1824_v23 = vpop.f32.mrf.mxu1  ;;  %v5007_v24 = vpop.eup %5006  ;;  %v4291_v25 = vpack.c.bf16 %v5005_v21, %v5001_v15  ;;  %v1665_v26 = vadd.f32 %v5567_v10, %v1664_v22 }
 0x1f6   : > { %v1825_v27 = vadd.f32 %v5567_v10, %v1824_v23  ;;  %v4451_v28 = vpack.c.bf16 %v5007_v24, %v5003_v17  ;;  %v5009_v35 = vpop.eup %5008 }
 0x1f7   : > { %4591 = vst [vmem:[%s5356_s28 + $0x2a0] sm:$0xff] %v4291_v25   ;;  %5012 = vtanh.f32 %v1665_v26  ;;  %v5011_v43 = vpop.eup %5010 }
 0x1f8   : > { %4623 = vst [vmem:[%s5356_s28 + $0x3a0] sm:$0xff] %v4451_v28   ;;  %5014 = vtanh.f32 %v1825_v27 }
 0x1f9   : > { %5016 = vtanh.f32 %v1983_v29 }
 0x1fa   : > { %5018 = vtanh.f32 %v2143_v30 }
 0x1fb   : > { %v1984_v31 = vpop.f32.mrf.mxu2  ;;  %v2144_v32 = vpop.f32.mrf.mxu3 }
 0x1fc   : > { %v1985_v36 = vadd.f32 %v5567_v10, %v1984_v31  ;;  %v2145_v37 = vadd.f32 %v5567_v10, %v2144_v32  ;;  %v1667_v38 = vpop.f32.mrf.mxu0 }
 0x1fd   : > { %v1827_v39 = vpop.f32.mrf.mxu1  ;;  %v5013_v44 = vpop.eup %5012  ;;  %v1668_v49 = vadd.f32 %v5792_v48, %v1667_v38 }
 0x1fe   : > { %5020 = vtanh.f32 %v1985_v36  ;;  %v5015_v45 = vpop.eup %5014  ;;  %v3976_v46 = vpack.c.bf16 %v5013_v44, %v5009_v35  ;;  %v1828_v51 = vadd.f32 %v5792_v48, %v1827_v39 }
 0x1ff   : > { %5022 = vtanh.f32 %v2145_v37  ;;  %3633 = vmatmul.msk.bf16.gmra.mxu0 %vm1163_vm0, %v3766_v33  ;;  %3665 = vmatmul.msk.bf16.gmra.mxu1 %vm1163_vm0, %v3798_v34  ;;  %v4136_v47 = vpack.c.bf16 %v5015_v45, %v5011_v43  ;;  %v5017_v10 = vpop.eup %5016 }
 0x200   : > { %3697 = vmatmul.msk.bf16.gmra.mxu2 %vm1163_vm0, %v3830_v40  ;;  %3729 = vmatmul.msk.bf16.gmra.mxu3 %vm1163_vm0, %v3862_v41  ;;  %4528 = vst [vmem:[%s5356_s28 + $0xa8] sm:$0xff] %v3976_v46   ;;  %v5019_v50 = vpop.eup %5018  ;;  %5024 = vtanh.f32 %v1668_v49 }
 0x201   : > { %4560 = vst [vmem:[%s5356_s28 + $0x1a8] sm:$0xff] %v4136_v47   ;;  %5026 = vtanh.f32 %v1828_v51 }
 0x203   : > { %v1987_v52 = vpop.f32.mrf.mxu2  ;;  %v2147_v53 = vpop.f32.mrf.mxu3 }
 0x204   : > { %v5021_v54 = vpop.eup %5020  ;;  %v1669_v55 = vpop.f32.mrf.mxu0  ;;  %v1988_v62 = vadd.f32 %v5792_v48, %v1987_v52  ;;  %v2148_v63 = vadd.f32 %v5792_v48, %v2147_v53 }
 0x205   : > { %v1829_v56 = vpop.f32.mrf.mxu1  ;;  %v5023_v57 = vpop.eup %5022  ;;  %v4296_v58 = vpack.c.bf16 %v5021_v54, %v5017_v10  ;;  %v1670_v59 = vadd.f32 %v5792_v48, %v1669_v55 }
 0x206   : > { %v1830_v60 = vadd.f32 %v5792_v48, %v1829_v56  ;;  %v4456_v61 = vpack.c.bf16 %v5023_v57, %v5019_v50  ;;  %v5025_v4 = vpop.eup %5024 }
 0x207   : > { %4592 = vst [vmem:[%s5356_s28 + $0x2a8] sm:$0xff] %v4296_v58   ;;  %5028 = vtanh.f32 %v1670_v59  ;;  %v5027_v11 = vpop.eup %5026 }
 0x208   : > { %4624 = vst [vmem:[%s5356_s28 + $0x3a8] sm:$0xff] %v4456_v61   ;;  %5030 = vtanh.f32 %v1830_v60 }
 0x209   : > { %5032 = vtanh.f32 %v1988_v62 }
 0x20a   : > { %5034 = vtanh.f32 %v2148_v63 }
 0x20b   : > { %v1989_v0 = vpop.f32.mrf.mxu2  ;;  %v2149_v1 = vpop.f32.mrf.mxu3 }
 0x20c   : > { %v1990_v5 = vadd.f32 %v5792_v48, %v1989_v0  ;;  %v2150_v6 = vadd.f32 %v5792_v48, %v2149_v1  ;;  %v1672_v7 = vpop.f32.mrf.mxu0 }
 0x20d   : > { %v1832_v8 = vpop.f32.mrf.mxu1  ;;  %v5029_v12 = vpop.eup %5028  ;;  %v1673_v17 = vadd.f32 %v5792_v48, %v1672_v7 }
 0x20e   : > { %5036 = vtanh.f32 %v1990_v5  ;;  %v5031_v13 = vpop.eup %5030  ;;  %v3981_v14 = vpack.c.bf16 %v5029_v12, %v5025_v4  ;;  %v1833_v19 = vadd.f32 %v5792_v48, %v1832_v8 }
 0x20f   : > { %5038 = vtanh.f32 %v2150_v6  ;;  %3634 = vmatmul.msk.bf16.gmra.mxu0 %vm1163_vm0, %v3767_v2  ;;  %3666 = vmatmul.msk.bf16.gmra.mxu1 %vm1163_vm0, %v3799_v3  ;;  %v4141_v15 = vpack.c.bf16 %v5031_v13, %v5027_v11  ;;  %v5033_v16 = vpop.eup %5032 }
 0x210   : > { %3698 = vmatmul.msk.bf16.gmra.mxu2 %vm1163_vm0, %v3831_v9  ;;  %3730 = vmatmul.msk.bf16.gmra.mxu3 %vm1163_vm0, %v3863_v42  ;;  %4529 = vst [vmem:[%s5356_s28 + $0xb0] sm:$0xff] %v3981_v14   ;;  %v5035_v18 = vpop.eup %5034  ;;  %5040 = vtanh.f32 %v1673_v17 }
 0x211   : > { %4561 = vst [vmem:[%s5356_s28 + $0x1b0] sm:$0xff] %v4141_v15   ;;  %5042 = vtanh.f32 %v1833_v19 }
 0x213   : > { %v1992_v20 = vpop.f32.mrf.mxu2  ;;  %v2152_v21 = vpop.f32.mrf.mxu3 }
 0x214   : > { %v5037_v22 = vpop.eup %5036  ;;  %v1674_v23 = vpop.f32.mrf.mxu0  ;;  %v1993_v30 = vadd.f32 %v5792_v48, %v1992_v20  ;;  %v2153_v31 = vadd.f32 %v5792_v48, %v2152_v21 }
 0x215   : > { %v1834_v24 = vpop.f32.mrf.mxu1  ;;  %v5039_v25 = vpop.eup %5038  ;;  %v4301_v26 = vpack.c.bf16 %v5037_v22, %v5033_v16  ;;  %v1675_v27 = vadd.f32 %v5792_v48, %v1674_v23 }
 0x216   : > { %v1835_v28 = vadd.f32 %v5792_v48, %v1834_v24  ;;  %v4461_v29 = vpack.c.bf16 %v5039_v25, %v5035_v18  ;;  %v5041_v34 = vpop.eup %5040 }
 0x217   : > { %4593 = vst [vmem:[%s5356_s28 + $0x2b0] sm:$0xff] %v4301_v26   ;;  %5044 = vtanh.f32 %v1675_v27  ;;  %v5043_v39 = vpop.eup %5042 }
 0x218   : > { %4625 = vst [vmem:[%s5356_s28 + $0x3b0] sm:$0xff] %v4461_v29   ;;  %5046 = vtanh.f32 %v1835_v28 }
 0x219   : > { %5048 = vtanh.f32 %v1993_v30 }
 0x21a   : > { %5050 = vtanh.f32 %v2153_v31 }
 0x21b   : > { %v1994_v32 = vpop.f32.mrf.mxu2  ;;  %v2154_v33 = vpop.f32.mrf.mxu3 }
 0x21c   : > { %v1995_v35 = vadd.f32 %v5792_v48, %v1994_v32  ;;  %v2155_v36 = vadd.f32 %v5792_v48, %v2154_v33  ;;  %v1677_v37 = vpop.f32.mrf.mxu0 }
 0x21d   : > { %v1837_v38 = vpop.f32.mrf.mxu1  ;;  %v5045_v40 = vpop.eup %5044  ;;  %v1678_v46 = vadd.f32 %v5792_v48, %v1677_v37 }
 0x21e   : > { %5052 = vtanh.f32 %v1995_v35  ;;  %v5047_v41 = vpop.eup %5046  ;;  %v3986_v43 = vpack.c.bf16 %v5045_v40, %v5041_v34  ;;  %v1838_v10 = vadd.f32 %v5792_v48, %v1837_v38 }
 0x21f   : > { %5054 = vtanh.f32 %v2155_v36  ;;  %v4146_v44 = vpack.c.bf16 %v5047_v41, %v5043_v39  ;;  %v5049_v45 = vpop.eup %5048 }
 0x220   : > { %4530 = vst [vmem:[%s5356_s28 + $0xb8] sm:$0xff] %v3986_v43   ;;  %v5051_v47 = vpop.eup %5050  ;;  %5056 = vtanh.f32 %v1678_v46 }
 0x221   : > { %4562 = vst [vmem:[%s5356_s28 + $0x1b8] sm:$0xff] %v4146_v44   ;;  %5058 = vtanh.f32 %v1838_v10 }
 0x223   : > { %v1997_v49 = vpop.f32.mrf.mxu2  ;;  %v2157_v50 = vpop.f32.mrf.mxu3 }
 0x224   : > { %v5053_v51 = vpop.eup %5052  ;;  %v1679_v52 = vpop.f32.mrf.mxu0  ;;  %v1998_v59 = vadd.f32 %v5792_v48, %v1997_v49  ;;  %v2158_v60 = vadd.f32 %v5792_v48, %v2157_v50 }
 0x225   : > { %v1839_v53 = vpop.f32.mrf.mxu1  ;;  %v5055_v54 = vpop.eup %5054  ;;  %v4306_v55 = vpack.c.bf16 %v5053_v51, %v5049_v45  ;;  %v1680_v56 = vadd.f32 %v5792_v48, %v1679_v52 }
 0x226   : > { %v1840_v57 = vadd.f32 %v5792_v48, %v1839_v53  ;;  %v4466_v58 = vpack.c.bf16 %v5055_v54, %v5051_v47  ;;  %v5057_v63 = vpop.eup %5056 }
 0x227   : > { %4594 = vst [vmem:[%s5356_s28 + $0x2b8] sm:$0xff] %v4306_v55   ;;  %5060 = vtanh.f32 %v1680_v56  ;;  %v5059_v4 = vpop.eup %5058 }
 0x228   : > { %4626 = vst [vmem:[%s5356_s28 + $0x3b8] sm:$0xff] %v4466_v58   ;;  %5062 = vtanh.f32 %v1840_v57 }
 0x229   : > { %5064 = vtanh.f32 %v1998_v59 }
 0x22a   : > { %5066 = vtanh.f32 %v2158_v60 }
 0x22b   : > { %v1999_v61 = vpop.f32.mrf.mxu2  ;;  %v2159_v62 = vpop.f32.mrf.mxu3 }
 0x22c   : > { %v2000_v0 = vadd.f32 %v5792_v48, %v1999_v61  ;;  %v2160_v1 = vadd.f32 %v5792_v48, %v2159_v62  ;;  %v1682_v2 = vpop.f32.mrf.mxu0 }
 0x22d   : > { %v1842_v3 = vpop.f32.mrf.mxu1  ;;  %v5061_v5 = vpop.eup %5060  ;;  %v1683_v42 = vadd.f32 %v5792_v48, %v1682_v2 }
 0x22e   : > { %5068 = vtanh.f32 %v2000_v0  ;;  %v5063_v6 = vpop.eup %5062  ;;  %v3991_v7 = vpack.c.bf16 %v5061_v5, %v5057_v63  ;;  %v1843_v12 = vadd.f32 %v5792_v48, %v1842_v3 }
 0x22f   : > { %5070 = vtanh.f32 %v2160_v1  ;;  %v4151_v8 = vpack.c.bf16 %v5063_v6, %v5059_v4  ;;  %v5065_v9 = vpop.eup %5064 }
 0x230   : > { %4531 = vst [vmem:[%s5356_s28 + $0xc0] sm:$0xff] %v3991_v7   ;;  %v5067_v11 = vpop.eup %5066  ;;  %5072 = vtanh.f32 %v1683_v42 }
 0x231   : > { %4563 = vst [vmem:[%s5356_s28 + $0x1c0] sm:$0xff] %v4151_v8   ;;  %5074 = vtanh.f32 %v1843_v12 }
 0x233   : > { %v2002_v13 = vpop.f32.mrf.mxu2  ;;  %v2162_v14 = vpop.f32.mrf.mxu3 }
 0x234   : > { %v5069_v15 = vpop.eup %5068  ;;  %v1684_v16 = vpop.f32.mrf.mxu0  ;;  %v2003_v23 = vadd.f32 %v5792_v48, %v2002_v13  ;;  %v2163_v24 = vadd.f32 %v5792_v48, %v2162_v14 }
 0x235   : > { %v1844_v17 = vpop.f32.mrf.mxu1  ;;  %v5071_v18 = vpop.eup %5070  ;;  %v4311_v19 = vpack.c.bf16 %v5069_v15, %v5065_v9  ;;  %v1685_v20 = vadd.f32 %v5792_v48, %v1684_v16 }
 0x236   : > { %v1845_v21 = vadd.f32 %v5792_v48, %v1844_v17  ;;  %v4471_v22 = vpack.c.bf16 %v5071_v18, %v5067_v11  ;;  %v5073_v27 = vpop.eup %5072 }
 0x237   : > { %4595 = vst [vmem:[%s5356_s28 + $0x2c0] sm:$0xff] %v4311_v19   ;;  %5076 = vtanh.f32 %v1685_v20  ;;  %v5075_v32 = vpop.eup %5074 }
 0x238   : > { %4627 = vst [vmem:[%s5356_s28 + $0x3c0] sm:$0xff] %v4471_v22   ;;  %5078 = vtanh.f32 %v1845_v21 }
 0x239   : > { %5080 = vtanh.f32 %v2003_v23 }
 0x23a   : > { %5082 = vtanh.f32 %v2163_v24 }
 0x23b   : > { %v2004_v25 = vpop.f32.mrf.mxu2  ;;  %v2164_v26 = vpop.f32.mrf.mxu3 }
 0x23c   : > { %v2005_v28 = vadd.f32 %v5792_v48, %v2004_v25  ;;  %v2165_v29 = vadd.f32 %v5792_v48, %v2164_v26  ;;  %v1687_v30 = vpop.f32.mrf.mxu0 }
 0x23d   : > { %v1847_v31 = vpop.f32.mrf.mxu1  ;;  %v5077_v33 = vpop.eup %5076  ;;  %v1688_v38 = vadd.f32 %v5792_v48, %v1687_v30 }
 0x23e   : > { %5084 = vtanh.f32 %v2005_v28  ;;  %v5079_v34 = vpop.eup %5078  ;;  %v3996_v35 = vpack.c.bf16 %v5077_v33, %v5073_v27  ;;  %v1848_v40 = vadd.f32 %v5792_v48, %v1847_v31 }
 0x23f   : > { %5086 = vtanh.f32 %v2165_v29  ;;  %v4156_v36 = vpack.c.bf16 %v5079_v34, %v5075_v32  ;;  %v5081_v37 = vpop.eup %5080 }
 0x240   : > { %4532 = vst [vmem:[%s5356_s28 + $0xc8] sm:$0xff] %v3996_v35   ;;  %v5083_v39 = vpop.eup %5082  ;;  %5088 = vtanh.f32 %v1688_v38 }
 0x241   : > { %4564 = vst [vmem:[%s5356_s28 + $0x1c8] sm:$0xff] %v4156_v36   ;;  %5090 = vtanh.f32 %v1848_v40 }
 0x243   : > { %v2007_v41 = vpop.f32.mrf.mxu2  ;;  %v2167_v43 = vpop.f32.mrf.mxu3 }
 0x244   : > { %v5085_v44 = vpop.eup %5084  ;;  %v1689_v45 = vpop.f32.mrf.mxu0  ;;  %v2008_v52 = vadd.f32 %v5792_v48, %v2007_v41  ;;  %v2168_v53 = vadd.f32 %v5792_v48, %v2167_v43 }
 0x245   : > { %v1849_v46 = vpop.f32.mrf.mxu1  ;;  %v5087_v47 = vpop.eup %5086  ;;  %v4316_v10 = vpack.c.bf16 %v5085_v44, %v5081_v37  ;;  %v1690_v49 = vadd.f32 %v5792_v48, %v1689_v45 }
 0x246   : > { %v1850_v50 = vadd.f32 %v5792_v48, %v1849_v46  ;;  %v4476_v51 = vpack.c.bf16 %v5087_v47, %v5083_v39  ;;  %v5089_v56 = vpop.eup %5088 }
 0x247   : > { %4596 = vst [vmem:[%s5356_s28 + $0x2c8] sm:$0xff] %v4316_v10   ;;  %5092 = vtanh.f32 %v1690_v49  ;;  %v5091_v61 = vpop.eup %5090 }
 0x248   : > { %4628 = vst [vmem:[%s5356_s28 + $0x3c8] sm:$0xff] %v4476_v51   ;;  %5094 = vtanh.f32 %v1850_v50 }
 0x249   : > { %5096 = vtanh.f32 %v2008_v52 }
 0x24a   : > { %5098 = vtanh.f32 %v2168_v53 }
 0x24b   : > { %v2009_v54 = vpop.f32.mrf.mxu2  ;;  %v2169_v55 = vpop.f32.mrf.mxu3 }
 0x24c   : > { %v2010_v57 = vadd.f32 %v5792_v48, %v2009_v54  ;;  %v2170_v58 = vadd.f32 %v5792_v48, %v2169_v55  ;;  %v1692_v59 = vpop.f32.mrf.mxu0 }
 0x24d   : > { %v1852_v60 = vpop.f32.mrf.mxu1  ;;  %v5093_v62 = vpop.eup %5092  ;;  %v1693_v3 = vadd.f32 %v5792_v48, %v1692_v59 }
 0x24e   : > { %5100 = vtanh.f32 %v2010_v57  ;;  %v5095_v63 = vpop.eup %5094  ;;  %v4001_v0 = vpack.c.bf16 %v5093_v62, %v5089_v56  ;;  %v1853_v5 = vadd.f32 %v5792_v48, %v1852_v60 }
 0x24f   : > { %5102 = vtanh.f32 %v2170_v58  ;;  %v4161_v1 = vpack.c.bf16 %v5095_v63, %v5091_v61  ;;  %v5097_v2 = vpop.eup %5096 }
 0x250   : > { %4533 = vst [vmem:[%s5356_s28 + $0xd0] sm:$0xff] %v4001_v0   ;;  %v5099_v4 = vpop.eup %5098  ;;  %5104 = vtanh.f32 %v1693_v3 }
 0x251   : > { %4565 = vst [vmem:[%s5356_s28 + $0x1d0] sm:$0xff] %v4161_v1   ;;  %5106 = vtanh.f32 %v1853_v5 }
 0x253   : > { %v2012_v6 = vpop.f32.mrf.mxu2  ;;  %v2172_v7 = vpop.f32.mrf.mxu3 }
 0x254   : > { %v5101_v8 = vpop.eup %5100  ;;  %v1694_v9 = vpop.f32.mrf.mxu0  ;;  %v2013_v16 = vadd.f32 %v5792_v48, %v2012_v6  ;;  %v2173_v17 = vadd.f32 %v5792_v48, %v2172_v7 }
 0x255   : > { %v1854_v42 = vpop.f32.mrf.mxu1  ;;  %v5103_v11 = vpop.eup %5102  ;;  %v4321_v12 = vpack.c.bf16 %v5101_v8, %v5097_v2  ;;  %v1695_v13 = vadd.f32 %v5792_v48, %v1694_v9 }
 0x256   : > { %v1855_v14 = vadd.f32 %v5792_v48, %v1854_v42  ;;  %v4481_v15 = vpack.c.bf16 %v5103_v11, %v5099_v4  ;;  %v5105_v20 = vpop.eup %5104 }
 0x257   : > { %4597 = vst [vmem:[%s5356_s28 + $0x2d0] sm:$0xff] %v4321_v12   ;;  %5108 = vtanh.f32 %v1695_v13  ;;  %v5107_v25 = vpop.eup %5106 }
 0x258   : > { %4629 = vst [vmem:[%s5356_s28 + $0x3d0] sm:$0xff] %v4481_v15   ;;  %5110 = vtanh.f32 %v1855_v14 }
 0x259   : > { %5112 = vtanh.f32 %v2013_v16 }
 0x25a   : > { %5114 = vtanh.f32 %v2173_v17 }
 0x25b   : > { %v2014_v18 = vpop.f32.mrf.mxu2  ;;  %v2174_v19 = vpop.f32.mrf.mxu3 }
 0x25c   : > { %v2015_v21 = vadd.f32 %v5792_v48, %v2014_v18  ;;  %v2175_v22 = vadd.f32 %v5792_v48, %v2174_v19  ;;  %v1697_v23 = vpop.f32.mrf.mxu0 }
 0x25d   : > { %v1857_v24 = vpop.f32.mrf.mxu1  ;;  %v5109_v26 = vpop.eup %5108  ;;  %v1698_v31 = vadd.f32 %v5792_v48, %v1697_v23 }
 0x25e   : > { %5116 = vtanh.f32 %v2015_v21  ;;  %v5111_v27 = vpop.eup %5110  ;;  %v4006_v28 = vpack.c.bf16 %v5109_v26, %v5105_v20  ;;  %v1858_v33 = vadd.f32 %v5792_v48, %v1857_v24 }
 0x25f   : > { %5118 = vtanh.f32 %v2175_v22  ;;  %v4166_v29 = vpack.c.bf16 %v5111_v27, %v5107_v25  ;;  %v5113_v30 = vpop.eup %5112 }
 0x260   : > { %4534 = vst [vmem:[%s5356_s28 + $0xd8] sm:$0xff] %v4006_v28   ;;  %v5115_v32 = vpop.eup %5114  ;;  %5120 = vtanh.f32 %v1698_v31 }
 0x261   : > { %4566 = vst [vmem:[%s5356_s28 + $0x1d8] sm:$0xff] %v4166_v29   ;;  %5122 = vtanh.f32 %v1858_v33 }
 0x263   : > { %v2017_v34 = vpop.f32.mrf.mxu2  ;;  %v2177_v35 = vpop.f32.mrf.mxu3 }
 0x264   : > { %v5117_v36 = vpop.eup %5116  ;;  %v1699_v37 = vpop.f32.mrf.mxu0  ;;  %v2018_v45 = vadd.f32 %v5792_v48, %v2017_v34  ;;  %v2178_v46 = vadd.f32 %v5792_v48, %v2177_v35 }
 0x265   : > { %v1859_v38 = vpop.f32.mrf.mxu1  ;;  %v5119_v39 = vpop.eup %5118  ;;  %v4326_v40 = vpack.c.bf16 %v5117_v36, %v5113_v30  ;;  %v1700_v41 = vadd.f32 %v5792_v48, %v1699_v37 }
 0x266   : > { %v1860_v43 = vadd.f32 %v5792_v48, %v1859_v38  ;;  %v4486_v44 = vpack.c.bf16 %v5119_v39, %v5115_v32  ;;  %v5121_v49 = vpop.eup %5120 }
 0x267   : > { %4598 = vst [vmem:[%s5356_s28 + $0x2d8] sm:$0xff] %v4326_v40   ;;  %5124 = vtanh.f32 %v1700_v41  ;;  %v5123_v54 = vpop.eup %5122 }
 0x268   : > { %4630 = vst [vmem:[%s5356_s28 + $0x3d8] sm:$0xff] %v4486_v44   ;;  %5126 = vtanh.f32 %v1860_v43 }
 0x269   : > { %5128 = vtanh.f32 %v2018_v45 }
 0x26a   : > { %5130 = vtanh.f32 %v2178_v46 }
 0x26b   : > { %v2019_v47 = vpop.f32.mrf.mxu2  ;;  %v2179_v10 = vpop.f32.mrf.mxu3 }
 0x26c   : > { %v2020_v50 = vadd.f32 %v5792_v48, %v2019_v47  ;;  %v2180_v51 = vadd.f32 %v5792_v48, %v2179_v10  ;;  %v1702_v52 = vpop.f32.mrf.mxu0 }
 0x26d   : > { %v1862_v53 = vpop.f32.mrf.mxu1  ;;  %v5125_v55 = vpop.eup %5124  ;;  %v1703_v60 = vadd.f32 %v5792_v48, %v1702_v52 }
 0x26e   : > { %5132 = vtanh.f32 %v2020_v50  ;;  %v5127_v56 = vpop.eup %5126  ;;  %v4011_v57 = vpack.c.bf16 %v5125_v55, %v5121_v49  ;;  %v1863_v62 = vadd.f32 %v5792_v48, %v1862_v53 }
 0x26f   : > { %5134 = vtanh.f32 %v2180_v51  ;;  %v4171_v58 = vpack.c.bf16 %v5127_v56, %v5123_v54  ;;  %v5129_v59 = vpop.eup %5128 }
 0x270   : > { %4535 = vst [vmem:[%s5356_s28 + $0xe0] sm:$0xff] %v4011_v57   ;;  %v5131_v61 = vpop.eup %5130  ;;  %5136 = vtanh.f32 %v1703_v60 }
 0x271   : > { %4567 = vst [vmem:[%s5356_s28 + $0x1e0] sm:$0xff] %v4171_v58   ;;  %5138 = vtanh.f32 %v1863_v62 }
 0x273   : > { %v2022_v63 = vpop.f32.mrf.mxu2  ;;  %v2182_v0 = vpop.f32.mrf.mxu3 }
 0x274   : > { %v5133_v1 = vpop.eup %5132  ;;  %v1704_v2 = vpop.f32.mrf.mxu0  ;;  %v2023_v9 = vadd.f32 %v5792_v48, %v2022_v63  ;;  %v2183_v42 = vadd.f32 %v5792_v48, %v2182_v0 }
 0x275   : > { %v1864_v3 = vpop.f32.mrf.mxu1  ;;  %v5135_v4 = vpop.eup %5134  ;;  %v4331_v5 = vpack.c.bf16 %v5133_v1, %v5129_v59  ;;  %v1705_v6 = vadd.f32 %v5792_v48, %v1704_v2 }
 0x276   : > { %v1865_v7 = vadd.f32 %v5792_v48, %v1864_v3  ;;  %v4491_v8 = vpack.c.bf16 %v5135_v4, %v5131_v61  ;;  %v5137_v13 = vpop.eup %5136 }
 0x277   : > { %4599 = vst [vmem:[%s5356_s28 + $0x2e0] sm:$0xff] %v4331_v5   ;;  %5140 = vtanh.f32 %v1705_v6  ;;  %v5139_v18 = vpop.eup %5138 }
 0x278   : > { %4631 = vst [vmem:[%s5356_s28 + $0x3e0] sm:$0xff] %v4491_v8   ;;  %5142 = vtanh.f32 %v1865_v7 }
 0x279   : > { %5144 = vtanh.f32 %v2023_v9 }
 0x27a   : > { %5146 = vtanh.f32 %v2183_v42 }
 0x27b   : > { %v2024_v11 = vpop.f32.mrf.mxu2  ;;  %v2184_v12 = vpop.f32.mrf.mxu3 }
 0x27c   : > { %v2025_v14 = vadd.f32 %v5792_v48, %v2024_v11  ;;  %v2185_v15 = vadd.f32 %v5792_v48, %v2184_v12  ;;  %v1707_v16 = vpop.f32.mrf.mxu0 }
 0x27d   : > { %v1867_v17 = vpop.f32.mrf.mxu1  ;;  %v5141_v19 = vpop.eup %5140  ;;  %v1708_v24 = vadd.f32 %v5792_v48, %v1707_v16 }
 0x27e   : > { %5148 = vtanh.f32 %v2025_v14  ;;  %v5143_v20 = vpop.eup %5142  ;;  %v4016_v21 = vpack.c.bf16 %v5141_v19, %v5137_v13  ;;  %v1868_v26 = vadd.f32 %v5792_v48, %v1867_v17 }
 0x27f   : > { %5150 = vtanh.f32 %v2185_v15  ;;  %v4176_v22 = vpack.c.bf16 %v5143_v20, %v5139_v18  ;;  %v5145_v23 = vpop.eup %5144 }
 0x280   : > { %4536 = vst [vmem:[%s5356_s28 + $0xe8] sm:$0xff] %v4016_v21   ;;  %v5147_v25 = vpop.eup %5146  ;;  %5152 = vtanh.f32 %v1708_v24 }
 0x281   : > { %4568 = vst [vmem:[%s5356_s28 + $0x1e8] sm:$0xff] %v4176_v22   ;;  %5154 = vtanh.f32 %v1868_v26 }
 0x283   : > { %v2027_v27 = vpop.f32.mrf.mxu2  ;;  %v2187_v28 = vpop.f32.mrf.mxu3 }
 0x284   : > { %v5149_v29 = vpop.eup %5148  ;;  %v1709_v30 = vpop.f32.mrf.mxu0  ;;  %v2028_v37 = vadd.f32 %v5792_v48, %v2027_v27  ;;  %v2188_v38 = vadd.f32 %v5792_v48, %v2187_v28 }
 0x285   : > { %v1869_v31 = vpop.f32.mrf.mxu1  ;;  %v5151_v32 = vpop.eup %5150  ;;  %v4336_v33 = vpack.c.bf16 %v5149_v29, %v5145_v23  ;;  %v1710_v34 = vadd.f32 %v5792_v48, %v1709_v30 }
 0x286   : > { %v1870_v35 = vadd.f32 %v5792_v48, %v1869_v31  ;;  %v4496_v36 = vpack.c.bf16 %v5151_v32, %v5147_v25  ;;  %v5153_v41 = vpop.eup %5152 }
 0x287   : > { %4600 = vst [vmem:[%s5356_s28 + $0x2e8] sm:$0xff] %v4336_v33   ;;  %5156 = vtanh.f32 %v1710_v34  ;;  %v5155_v47 = vpop.eup %5154 }
 0x288   : > { %4632 = vst [vmem:[%s5356_s28 + $0x3e8] sm:$0xff] %v4496_v36   ;;  %5158 = vtanh.f32 %v1870_v35 }
 0x289   : > { %5160 = vtanh.f32 %v2028_v37 }
 0x28a   : > { %5162 = vtanh.f32 %v2188_v38 }
 0x28b   : > { %v2029_v39 = vpop.f32.mrf.mxu2  ;;  %v2189_v40 = vpop.f32.mrf.mxu3 }
 0x28c   : > { %v2030_v43 = vadd.f32 %v5792_v48, %v2029_v39  ;;  %v2190_v44 = vadd.f32 %v5792_v48, %v2189_v40  ;;  %v1712_v45 = vpop.f32.mrf.mxu0 }
 0x28d   : > { %v1872_v46 = vpop.f32.mrf.mxu1  ;;  %v5157_v10 = vpop.eup %5156  ;;  %v1713_v53 = vadd.f32 %v5792_v48, %v1712_v45 }
 0x28e   : > { %5164 = vtanh.f32 %v2030_v43  ;;  %v5159_v49 = vpop.eup %5158  ;;  %v4021_v50 = vpack.c.bf16 %v5157_v10, %v5153_v41  ;;  %v1873_v55 = vadd.f32 %v5792_v48, %v1872_v46 }
 0x28f   : > { %5166 = vtanh.f32 %v2190_v44  ;;  %v4181_v51 = vpack.c.bf16 %v5159_v49, %v5155_v47  ;;  %v5161_v52 = vpop.eup %5160 }
 0x290   : > { %4537 = vst [vmem:[%s5356_s28 + $0xf0] sm:$0xff] %v4021_v50   ;;  %v5163_v54 = vpop.eup %5162  ;;  %5168 = vtanh.f32 %v1713_v53 }
 0x291   : > { %4569 = vst [vmem:[%s5356_s28 + $0x1f0] sm:$0xff] %v4181_v51   ;;  %5170 = vtanh.f32 %v1873_v55 }
 0x293   : > { %v2032_v56 = vpop.f32.mrf.mxu2  ;;  %v2192_v57 = vpop.f32.mrf.mxu3 }
 0x294   : > { %v5165_v58 = vpop.eup %5164  ;;  %v1714_v59 = vpop.f32.mrf.mxu0  ;;  %v2033_v2 = vadd.f32 %v5792_v48, %v2032_v56  ;;  %v2193_v3 = vadd.f32 %v5792_v48, %v2192_v57 }
 0x295   : > { %v1874_v60 = vpop.f32.mrf.mxu1  ;;  %v5167_v61 = vpop.eup %5166  ;;  %v4341_v62 = vpack.c.bf16 %v5165_v58, %v5161_v52  ;;  %v1715_v63 = vadd.f32 %v5792_v48, %v1714_v59 }
 0x296   : > { %v1875_v0 = vadd.f32 %v5792_v48, %v1874_v60  ;;  %v4501_v1 = vpack.c.bf16 %v5167_v61, %v5163_v54  ;;  %v5169_v6 = vpop.eup %5168 }
 0x297   : > { %4601 = vst [vmem:[%s5356_s28 + $0x2f0] sm:$0xff] %v4341_v62   ;;  %5172 = vtanh.f32 %v1715_v63  ;;  %v5171_v9 = vpop.eup %5170 }
 0x298   : > { %4633 = vst [vmem:[%s5356_s28 + $0x3f0] sm:$0xff] %v4501_v1   ;;  %5174 = vtanh.f32 %v1875_v0 }
 0x299   : > { %5176 = vtanh.f32 %v2033_v2 }
 0x29a   : > { %5178 = vtanh.f32 %v2193_v3 }
 0x29b   : > { %v2034_v4 = vpop.f32.mrf.mxu2  ;;  %v2194_v5 = vpop.f32.mrf.mxu3 }
 0x29c   : > { %v2035_v7 = vadd.f32 %v5792_v48, %v2034_v4  ;;  %v2195_v8 = vadd.f32 %v5792_v48, %v2194_v5 }
 0x29d   : > { %v5173_v42 = vpop.eup %5172 }
 0x29e   : > { %5180 = vtanh.f32 %v2035_v7  ;;  %v5175_v11 = vpop.eup %5174  ;;  %v4026_v12 = vpack.c.bf16 %v5173_v42, %v5169_v6 }
 0x29f   : > { %5182 = vtanh.f32 %v2195_v8  ;;  %v4186_v13 = vpack.c.bf16 %v5175_v11, %v5171_v9  ;;  %v5177_v14 = vpop.eup %5176 }
 0x2a0   : > { %4538 = vst [vmem:[%s5356_s28 + $0xf8] sm:$0xff] %v4026_v12   ;;  %v5179_v15 = vpop.eup %5178 }
 0x2a1   : > { %4570 = vst [vmem:[%s5356_s28 + $0x1f8] sm:$0xff] %v4186_v13  }
 0x2a4   : > { %v5181_v16 = vpop.eup %5180 }
 0x2a5   : > { %v5183_v17 = vpop.eup %5182  ;;  %v4346_v18 = vpack.c.bf16 %v5181_v16, %v5177_v14 }
 0x2a6   : > { %v4506_v19 = vpack.c.bf16 %v5183_v17, %v5179_v15 }
 0x2a7   : > { %4602 = vst [vmem:[%s5356_s28 + $0x2f8] sm:$0xff] %v4346_v18  }
 0x2a8   : > { %4634 = vst [vmem:[%s5356_s28 + $0x3f8] sm:$0xff] %v4506_v19  }
 0x2a9 PF: > { %s13_s14 = sadd.s32 1, %s5208_s14   ;;  %s5937_s12 = smov %s5204_s13 }
 0x2aa   : > { %p10_p5 = scmp.ge.s32.totalorder %s13_s14, 6   ;;  %s5938_s13 = smov %s5940_s15 }
 0x2ac   :  { %12 = sbr.rel (!%p10_p5) target bundleno = 2 (0x2), region = 65 }

</bundles_post_ra>
